<compile_context>
chip_gen: v7x
topology: tpu7x:2x2x1
jax: 0.10.0
libtpu: 0.0.40
codegen_flags: <defaults>
</compile_context>

<pallas_src>
import math

import jax
import jax.numpy as jnp
from jax.experimental import pallas as pl
from jax.experimental.pallas import tpu as pltpu

CPAD = 128          # lane-dense channel / hidden / logit padding
KSIZE = 5


# ----------------------------- Pallas kernels ------------------------------

def _conv_relu_pool_kernel(p_ref, w_ref, b_ref, o_ref):
    """Fused conv-as-matmul + bias + ReLU + 2x2 max-pool for one image.

    p_ref: (4*P, K) bf16 im2col patches, rows ordered (a, b, ph, pw) where the
           conv-output pixel is (2*ph + a, 2*pw + b).
    w_ref: (K, CPAD) bf16 flattened conv weights (zero-padded rows/columns).
    b_ref: (1, CPAD) f32 bias (zero-padded).
    o_ref: (P, CPAD) f32 pooled output, rows ordered (ph, pw).
    """
    y = jnp.dot(p_ref[...], w_ref[...], preferred_element_type=jnp.float32)
    y = jnp.maximum(y + b_ref[...], 0.0)              # bias + ReLU
    p = o_ref.shape[0]
    # 2x2 max-pool == elementwise max of the four contiguous (a, b) chunks.
    o_ref[...] = jnp.maximum(
        jnp.maximum(y[0 * p:1 * p, :], y[1 * p:2 * p, :]),
        jnp.maximum(y[2 * p:3 * p, :], y[3 * p:4 * p, :]))


def conv_relu_pool(patches, wm, b, *, rows_per_img, out_rows_per_img, n_img):
    """patches (n_img*rows_per_img, K) bf16 -> (n_img*out_rows_per_img, CPAD) f32."""
    k = patches.shape[1]
    flops = 2 * patches.shape[0] * k * CPAD
    bytes_accessed = (patches.size * patches.dtype.itemsize
                      + wm.size * wm.dtype.itemsize
                      + b.size * 4
                      + n_img * out_rows_per_img * CPAD * 4)
    return pl.pallas_call(
        _conv_relu_pool_kernel,
        out_shape=jax.ShapeDtypeStruct((n_img * out_rows_per_img, CPAD),
                                       jnp.float32),
        grid=(n_img,),
        in_specs=[
            pl.BlockSpec((rows_per_img, k), lambda n: (n, 0)),
            pl.BlockSpec((k, CPAD), lambda n: (0, 0)),
            pl.BlockSpec((1, CPAD), lambda n: (0, 0)),
        ],
        out_specs=pl.BlockSpec((out_rows_per_img, CPAD), lambda n: (n, 0)),
        compiler_params=pltpu.CompilerParams(
            dimension_semantics=("parallel",),
            vmem_limit_bytes=32 * 1024 * 1024),
        cost_estimate=pl.CostEstimate(flops=flops, transcendentals=0,
                                      bytes_accessed=bytes_accessed),
    )(patches, wm, b)


def _head_kernel(x_ref, w1_ref, b1_ref, w2_ref, b2_ref, o_ref):
    """fc1 + sigmoid + fc2 + log_softmax(dim=0) fused into one kernel.

    log_softmax reduces over dim=0 (the batch), so the whole batch lives in a
    single block — this kernel must NOT be tiled over batch.
    """
    h = jnp.dot(x_ref[...], w1_ref[...], preferred_element_type=jnp.float32)
    h = h + b1_ref[...]
    h = pl.reciprocal(1.0 + jnp.exp(-h), approx=True)     # sigmoid via EUP
    y = jnp.dot(h.astype(w2_ref.dtype), w2_ref[...],
                preferred_element_type=jnp.float32)
    y = y + b2_ref[...]
    m = jnp.max(y, axis=0, keepdims=True)
    lse = m + jnp.log(jnp.sum(jnp.exp(y - m), axis=0, keepdims=True))
    o_ref[...] = y - lse


def fc_head(x, w1, b1, w2, b2):
    n, k = x.shape
    h = w1.shape[1]
    c = w2.shape[1]
    return pl.pallas_call(
        _head_kernel,
        out_shape=jax.ShapeDtypeStruct((n, c), jnp.float32),
        grid=(1,),
        in_specs=[
            pl.BlockSpec((n, k), lambda i: (0, 0)),
            pl.BlockSpec((k, h), lambda i: (0, 0)),
            pl.BlockSpec((1, h), lambda i: (0, 0)),
            pl.BlockSpec((h, c), lambda i: (0, 0)),
            pl.BlockSpec((1, c), lambda i: (0, 0)),
        ],
        out_specs=pl.BlockSpec((n, c), lambda i: (0, 0)),
        compiler_params=pltpu.CompilerParams(
            vmem_limit_bytes=32 * 1024 * 1024),
    )(x, w1, b1, w2, b2)


# ------------------------------- JAX glue ----------------------------------

def _round_up(v, m):
    return ((v + m - 1) // m) * m


def _pad_last_to(x, target):
    pad = target - x.shape[-1]
    if pad == 0:
        return x
    return jnp.pad(x, [(0, 0)] * (x.ndim - 1) + [(0, pad)])


def _im2col_pool_order(xc, k_pad):
    """Channels-last im2col for a 'same' 5x5 conv on a zero-extended canvas.

    xc: (N, Hc, Wc, C) bf16, Hc/Wc even, valid image at the top-left, rest 0.
    Returns (N*Hc*Wc, k_pad) bf16 patches with rows ordered (n, a, b, ph, pw)
    so the fused kernel can pool by maxing four contiguous row chunks.
    Column order is (di, dj, c), matching the flattened conv weights.
    """
    # TODO(synk): fold this im2col into the conv kernel (25 shifted dots over a
    # VMEM-resident window) to remove the patch materialization entirely; per
    # the review's minimum, patches are emitted in bf16 here instead.
    n, hc, wc, c = xc.shape
    pad = KSIZE // 2
    xp = jnp.pad(xc, ((0, 0), (pad, pad), (pad, pad), (0, 0)))
    cols = [xp[:, di:di + hc, dj:dj + wc, :]
            for di in range(KSIZE) for dj in range(KSIZE)]
    p = jnp.stack(cols, axis=3).reshape(n, hc, wc, KSIZE * KSIZE * c)
    ph, pw = hc // 2, wc // 2
    p = p.reshape(n, ph, 2, pw, 2, KSIZE * KSIZE * c)
    p = p.transpose(0, 2, 4, 1, 3, 5)                  # (n, a, b, ph, pw, K)
    p = p.reshape(n * hc * wc, KSIZE * KSIZE * c)
    return _pad_last_to(p, k_pad)


# ------------------------- parameters (torch layout) ------------------------

def init_params(key, hidden_size):
    """PyTorch-default uniform(+-1/sqrt(fan_in)) init, torch tensor layouts."""
    def uni(k, shape, fan_in):
        bound = 1.0 / math.sqrt(fan_in)
        return jax.random.uniform(k, shape, jnp.float32, -bound, bound)

    ks = jax.random.split(key, 8)
    return {
        "conv1_w": uni(ks[0], (40, 1, 5, 5), 1 * 5 * 5),
        "conv1_b": uni(ks[1], (40,), 1 * 5 * 5),
        "conv2_w": uni(ks[2], (40, 40, 5, 5), 40 * 5 * 5),
        "conv2_b": uni(ks[3], (40,), 40 * 5 * 5),
        "fc1_w": uni(ks[4], (hidden_size, 7 * 7 * 40), 7 * 7 * 40),
        "fc1_b": uni(ks[5], (hidden_size,), 7 * 7 * 40),
        "fc2_w": uni(ks[6], (10, hidden_size), hidden_size),
        "fc2_b": uni(ks[7], (10,), hidden_size),
    }


def prepare_params(params, hidden_size):
    """One-time conversion of torch-layout params into lane-dense,
    pre-transposed kernel operands (NOT redone per forward call)."""
    hpad = _round_up(hidden_size, 128)

    def conv_wm(w, k_pad):
        co, ci, kh, kw = w.shape
        wm = w.transpose(2, 3, 1, 0).reshape(kh * kw * ci, co)   # (K, Cout)
        wm = jnp.pad(wm, ((0, k_pad - kh * kw * ci), (0, CPAD - co)))
        return wm.astype(jnp.bfloat16)

    def pad_bias(b, n):
        return jnp.pad(b, (0, n - b.shape[0])).reshape(1, n).astype(jnp.float32)

    # fc1: fold torch's (c, h, w) .view flatten order plus the (8, 8, 128)
    # canvas/lane padding of the conv2 output into the weight layout.
    w1 = params["fc1_w"].reshape(hidden_size, 40, 7, 7)
    w1 = w1.transpose(0, 2, 3, 1)                                # (hid, h, w, c)
    w1 = jnp.pad(w1, ((0, 0), (0, 1), (0, 1), (0, CPAD - 40)))   # (hid, 8, 8, 128)
    w1 = w1.reshape(hidden_size, 8 * 8 * CPAD).T                 # (8192, hid)
    w1 = jnp.pad(w1, ((0, 0), (0, hpad - hidden_size))).astype(jnp.bfloat16)

    w2 = params["fc2_w"].T                                        # (hid, 10)
    w2 = jnp.pad(w2, ((0, hpad - hidden_size), (0, CPAD - 10))).astype(jnp.bfloat16)

    return {
        "conv1_wm": conv_wm(params["conv1_w"], _round_up(25, 128)),
        "conv1_b": pad_bias(params["conv1_b"], CPAD),
        "conv2_wm": conv_wm(params["conv2_w"], _round_up(1000, 128)),
        "conv2_b": pad_bias(params["conv2_b"], CPAD),
        "fc1_w": w1,
        "fc1_b": pad_bias(params["fc1_b"], hpad),
        "fc2_w": w2,
        "fc2_b": pad_bias(params["fc2_b"], CPAD),
    }


# ------------------------------ Net (mode = 3) -------------------------------

def net_forward(prep, x):
    """Net(mode=3).forward for NCHW x of shape (N, 1, 28, 28)."""
    n = x.shape[0]
    # NCHW -> channels-last once; zero-extend 28x28 -> 32x32 canvas (canvas
    # zeros coincide with 'same' padding zeros, so valid outputs are exact).
    xc = jnp.transpose(x, (0, 2, 3, 1)).astype(jnp.bfloat16)
    xc = jnp.pad(xc, ((0, 0), (0, 4), (0, 4), (0, 0)))           # (N, 32, 32, 1)

    # conv1 + ReLU + pool1 (fused); pooled canvas 16x16, valid region 14x14.
    p1 = _im2col_pool_order(xc, k_pad=128)                       # (N*1024, 128)
    h1 = conv_relu_pool(p1, prep["conv1_wm"], prep["conv1_b"],
                        rows_per_img=1024, out_rows_per_img=256, n_img=n)
    h1 = h1.reshape(n, 16, 16, CPAD)[:, :14, :14, :40]           # valid region
    h1 = jnp.pad(h1.astype(jnp.bfloat16),
                 ((0, 0), (0, 2), (0, 2), (0, 0)))               # (N, 16, 16, 40)

    # conv2 + ReLU + pool2 (fused); pooled canvas 8x8, valid 7x7 (invalid
    # rows/cols and padded channels are zero-weighted inside fc1's weights).
    p2 = _im2col_pool_order(h1, k_pad=1024)                      # (N*256, 1024)
    h2 = conv_relu_pool(p2, prep["conv2_wm"], prep["conv2_b"],
                        rows_per_img=256, out_rows_per_img=64, n_img=n)

    # classifier head: fc1 + sigmoid + fc2 + log_softmax(dim=0), one kernel.
    flat = h2.reshape(n, 64 * CPAD).astype(jnp.bfloat16)         # (N, 8192)
    out = fc_head(flat, prep["fc1_w"], prep["fc1_b"],
                  prep["fc2_w"], prep["fc2_b"])                  # (N, 128)
    return out[:, :10]


if __name__ == "__main__":
    key = jax.random.PRNGKey(0)
    k_param, k_x = jax.random.split(key)
    hidden_size = 32
    params = init_params(k_param, hidden_size)
    prep = prepare_params(params, hidden_size)
    # Input must be 28x28 single-channel so Model_3's 7*7*40 flatten holds.
    x = jax.random.normal(k_x, (2, 1, 28, 28), dtype=jnp.float32)

    fwd = jax.jit(net_forward)
    out = jax.block_until_ready(fwd(prep, x))
    assert out.shape == (2, 10), out.shape
    assert bool(jnp.all(jnp.isfinite(out)))
    print("KERNEL_OK")
</pallas_src>

<mosaic_0001>
module attributes {stable_mosaic.version = 11 : i64} {
  func.func @_conv_relu_pool_kernel(%arg0: i32, %arg1: memref<1024x128xbf16, #tpu.memory_space<vmem>>, %arg2: memref<128x128xbf16, #tpu.memory_space<vmem>>, %arg3: memref<1x128xf32, #tpu.memory_space<vmem>>, %arg4: memref<256x128xf32, #tpu.memory_space<vmem>>) attributes {dimension_semantics = [#tpu.dimension_semantics<parallel>], iteration_bounds = array<i64: 2>, scalar_prefetch = 0 : i64, scratch_operands = 0 : i64, tpu.core_type = #tpu.core_type<tc>, window_params = [{transform_indices = @transform_0, window_bounds = array<i64: 1024, 128>}, {pipeline_mode = #tpu.pipeline_mode<synchronous>, transform_indices = @transform_1, window_bounds = array<i64: 128, 128>}, {pipeline_mode = #tpu.pipeline_mode<synchronous>, transform_indices = @transform_2, window_bounds = array<i64: 1, 128>}, {transform_indices = @transform_3, window_bounds = array<i64: 256, 128>}]} {
    %c0 = arith.constant 0 : index
    %c0_0 = arith.constant 0 : index
    %0 = vector.load %arg1[%c0, %c0_0] : memref<1024x128xbf16, #tpu.memory_space<vmem>>, vector<1024x128xbf16>
    %c0_1 = arith.constant 0 : index
    %c0_2 = arith.constant 0 : index
    %1 = vector.load %arg2[%c0_1, %c0_2] : memref<128x128xbf16, #tpu.memory_space<vmem>>, vector<128x128xbf16>
    %cst = arith.constant dense<0.000000e+00> : vector<1024x128xf32>
    %2 = tpu.matmul %0, %1, %cst {dimension_numbers = #tpu.dot_dimension_numbers<[1], [0], [0], [1], [0, 0, 1, 1], [], []>} : vector<1024x128xbf16>, vector<128x128xbf16>, vector<1024x128xf32> -> vector<1024x128xf32>
    %c0_3 = arith.constant 0 : index
    %c0_4 = arith.constant 0 : index
    %3 = vector.load %arg3[%c0_3, %c0_4] : memref<1x128xf32, #tpu.memory_space<vmem>>, vector<1x128xf32>
    %4 = vector.broadcast %3 : vector<1x128xf32> to vector<1024x128xf32>
    %5 = arith.addf %2, %4 : vector<1024x128xf32>
    %cst_5 = arith.constant 0.000000e+00 : f32
    %6 = vector.broadcast %cst_5 : f32 to vector<1024x128xf32>
    %7 = arith.maximumf %5, %6 : vector<1024x128xf32>
    %8 = vector.extract_strided_slice %7 {offsets = [0, 0], sizes = [256, 128], strides = [1, 1]} : vector<1024x128xf32> to vector<256x128xf32>
    %9 = vector.extract_strided_slice %7 {offsets = [256, 0], sizes = [256, 128], strides = [1, 1]} : vector<1024x128xf32> to vector<256x128xf32>
    %10 = arith.maximumf %8, %9 : vector<256x128xf32>
    %11 = vector.extract_strided_slice %7 {offsets = [512, 0], sizes = [256, 128], strides = [1, 1]} : vector<1024x128xf32> to vector<256x128xf32>
    %12 = vector.extract_strided_slice %7 {offsets = [768, 0], sizes = [256, 128], strides = [1, 1]} : vector<1024x128xf32> to vector<256x128xf32>
    %13 = arith.maximumf %11, %12 : vector<256x128xf32>
    %14 = arith.maximumf %10, %13 : vector<256x128xf32>
    %c0_6 = arith.constant 0 : index
    %c0_7 = arith.constant 0 : index
    %15 = vector.load %arg4[%c0_6, %c0_7] : memref<256x128xf32, #tpu.memory_space<vmem>>, vector<256x128xf32>
    tpu.vector_store %arg4[%c0_6, %c0_7], %14 {strides = array<i32>} : memref<256x128xf32, #tpu.memory_space<vmem>>, vector<256x128xf32>,
    return
  }
  func.func @transform_0(%arg0: i32) -> (i32, i32) {
    %c0_i32 = arith.constant 0 : i32
    %c0_i32_0 = arith.constant 0 : i32
    return %arg0, %c0_i32 : i32, i32
  }
  func.func @transform_1(%arg0: i32) -> (i32, i32) {
    %c0_i32 = arith.constant 0 : i32
    %c0_i32_0 = arith.constant 0 : i32
    %c0_i32_1 = arith.constant 0 : i32
    return %c0_i32, %c0_i32_0 : i32, i32
  }
  func.func @transform_2(%arg0: i32) -> (i32, i32) {
    %c0_i32 = arith.constant 0 : i32
    %c0_i32_0 = arith.constant 0 : i32
    %c0_i32_1 = arith.constant 0 : i32
    return %c0_i32, %c0_i32_0 : i32, i32
  }
  func.func @transform_3(%arg0: i32) -> (i32, i32) {
    %c0_i32 = arith.constant 0 : i32
    %c0_i32_0 = arith.constant 0 : i32
    return %arg0, %c0_i32 : i32, i32
  }
}

module attributes {stable_mosaic.version = 11 : i64} {
  func.func @_conv_relu_pool_kernel(%arg0: i32, %arg1: memref<256x1024xbf16, #tpu.memory_space<vmem>>, %arg2: memref<1024x128xbf16, #tpu.memory_space<vmem>>, %arg3: memref<1x128xf32, #tpu.memory_space<vmem>>, %arg4: memref<64x128xf32, #tpu.memory_space<vmem>>) attributes {dimension_semantics = [#tpu.dimension_semantics<parallel>], iteration_bounds = array<i64: 2>, scalar_prefetch = 0 : i64, scratch_operands = 0 : i64, tpu.core_type = #tpu.core_type<tc>, window_params = [{transform_indices = @transform_0, window_bounds = array<i64: 256, 1024>}, {pipeline_mode = #tpu.pipeline_mode<synchronous>, transform_indices = @transform_1, window_bounds = array<i64: 1024, 128>}, {pipeline_mode = #tpu.pipeline_mode<synchronous>, transform_indices = @transform_2, window_bounds = array<i64: 1, 128>}, {transform_indices = @transform_3, window_bounds = array<i64: 64, 128>}]} {
    %c0 = arith.constant 0 : index
    %c0_0 = arith.constant 0 : index
    %0 = vector.load %arg1[%c0, %c0_0] : memref<256x1024xbf16, #tpu.memory_space<vmem>>, vector<256x1024xbf16>
    %c0_1 = arith.constant 0 : index
    %c0_2 = arith.constant 0 : index
    %1 = vector.load %arg2[%c0_1, %c0_2] : memref<1024x128xbf16, #tpu.memory_space<vmem>>, vector<1024x128xbf16>
    %cst = arith.constant dense<0.000000e+00> : vector<256x128xf32>
    %2 = tpu.matmul %0, %1, %cst {dimension_numbers = #tpu.dot_dimension_numbers<[1], [0], [0], [1], [0, 0, 1, 1], [], []>} : vector<256x1024xbf16>, vector<1024x128xbf16>, vector<256x128xf32> -> vector<256x128xf32>
    %c0_3 = arith.constant 0 : index
    %c0_4 = arith.constant 0 : index
    %3 = vector.load %arg3[%c0_3, %c0_4] : memref<1x128xf32, #tpu.memory_space<vmem>>, vector<1x128xf32>
    %4 = vector.broadcast %3 : vector<1x128xf32> to vector<256x128xf32>
    %5 = arith.addf %2, %4 : vector<256x128xf32>
    %cst_5 = arith.constant 0.000000e+00 : f32
    %6 = vector.broadcast %cst_5 : f32 to vector<256x128xf32>
    %7 = arith.maximumf %5, %6 : vector<256x128xf32>
    %8 = vector.extract_strided_slice %7 {offsets = [0, 0], sizes = [64, 128], strides = [1, 1]} : vector<256x128xf32> to vector<64x128xf32>
    %9 = vector.extract_strided_slice %7 {offsets = [64, 0], sizes = [64, 128], strides = [1, 1]} : vector<256x128xf32> to vector<64x128xf32>
    %10 = arith.maximumf %8, %9 : vector<64x128xf32>
    %11 = vector.extract_strided_slice %7 {offsets = [128, 0], sizes = [64, 128], strides = [1, 1]} : vector<256x128xf32> to vector<64x128xf32>
    %12 = vector.extract_strided_slice %7 {offsets = [192, 0], sizes = [64, 128], strides = [1, 1]} : vector<256x128xf32> to vector<64x128xf32>
    %13 = arith.maximumf %11, %12 : vector<64x128xf32>
    %14 = arith.maximumf %10, %13 : vector<64x128xf32>
    %c0_6 = arith.constant 0 : index
    %c0_7 = arith.constant 0 : index
    %15 = vector.load %arg4[%c0_6, %c0_7] : memref<64x128xf32, #tpu.memory_space<vmem>>, vector<64x128xf32>
    tpu.vector_store %arg4[%c0_6, %c0_7], %14 {strides = array<i32>} : memref<64x128xf32, #tpu.memory_space<vmem>>, vector<64x128xf32>,
    return
  }
  func.func @transform_0(%arg0: i32) -> (i32, i32) {
    %c0_i32 = arith.constant 0 : i32
    %c0_i32_0 = arith.constant 0 : i32
    return %arg0, %c0_i32 : i32, i32
  }
  func.func @transform_1(%arg0: i32) -> (i32, i32) {
    %c0_i32 = arith.constant 0 : i32
    %c0_i32_0 = arith.constant 0 : i32
    %c0_i32_1 = arith.constant 0 : i32
    return %c0_i32, %c0_i32_0 : i32, i32
  }
  func.func @transform_2(%arg0: i32) -> (i32, i32) {
    %c0_i32 = arith.constant 0 : i32
    %c0_i32_0 = arith.constant 0 : i32
    %c0_i32_1 = arith.constant 0 : i32
    return %c0_i32, %c0_i32_0 : i32, i32
  }
  func.func @transform_3(%arg0: i32) -> (i32, i32) {
    %c0_i32 = arith.constant 0 : i32
    %c0_i32_0 = arith.constant 0 : i32
    return %arg0, %c0_i32 : i32, i32
  }
}

module attributes {stable_mosaic.version = 11 : i64} {
  func.func @_head_kernel(%arg0: i32, %arg1: memref<2x8192xbf16, #tpu.memory_space<vmem>>, %arg2: memref<8192x128xbf16, #tpu.memory_space<vmem>>, %arg3: memref<1x128xf32, #tpu.memory_space<vmem>>, %arg4: memref<128x128xbf16, #tpu.memory_space<vmem>>, %arg5: memref<1x128xf32, #tpu.memory_space<vmem>>, %arg6: memref<2x128xf32, #tpu.memory_space<vmem>>) attributes {dimension_semantics = [#tpu.dimension_semantics<arbitrary>], iteration_bounds = array<i64: 1>, scalar_prefetch = 0 : i64, scratch_operands = 0 : i64, tpu.core_type = #tpu.core_type<tc>, window_params = [{pipeline_mode = #tpu.pipeline_mode<synchronous>, transform_indices = @transform_0, window_bounds = array<i64: 2, 8192>}, {pipeline_mode = #tpu.pipeline_mode<synchronous>, transform_indices = @transform_1, window_bounds = array<i64: 8192, 128>}, {pipeline_mode = #tpu.pipeline_mode<synchronous>, transform_indices = @transform_2, window_bounds = array<i64: 1, 128>}, {pipeline_mode = #tpu.pipeline_mode<synchronous>, transform_indices = @transform_3, window_bounds = array<i64: 128, 128>}, {pipeline_mode = #tpu.pipeline_mode<synchronous>, transform_indices = @transform_4, window_bounds = array<i64: 1, 128>}, {pipeline_mode = #tpu.pipeline_mode<synchronous>, transform_indices = @transform_5, window_bounds = array<i64: 2, 128>}]} {
    %c0 = arith.constant 0 : index
    %c0_0 = arith.constant 0 : index
    %0 = vector.load %arg1[%c0, %c0_0] : memref<2x8192xbf16, #tpu.memory_space<vmem>>, vector<2x8192xbf16>
    %c0_1 = arith.constant 0 : index
    %c0_2 = arith.constant 0 : index
    %1 = vector.load %arg2[%c0_1, %c0_2] : memref<8192x128xbf16, #tpu.memory_space<vmem>>, vector<8192x128xbf16>
    %cst = arith.constant dense<0.000000e+00> : vector<2x128xf32>
    %2 = tpu.matmul %0, %1, %cst {dimension_numbers = #tpu.dot_dimension_numbers<[1], [0], [0], [1], [0, 0, 1, 1], [], []>} : vector<2x8192xbf16>, vector<8192x128xbf16>, vector<2x128xf32> -> vector<2x128xf32>
    %c0_3 = arith.constant 0 : index
    %c0_4 = arith.constant 0 : index
    %3 = vector.load %arg3[%c0_3, %c0_4] : memref<1x128xf32, #tpu.memory_space<vmem>>, vector<1x128xf32>
    %4 = vector.broadcast %3 : vector<1x128xf32> to vector<2x128xf32>
    %5 = arith.addf %2, %4 : vector<2x128xf32>
    %cst_5 = arith.constant 0.000000e+00 : f32
    %6 = vector.broadcast %cst_5 : f32 to vector<2x128xf32>
    %7 = arith.subf %6, %5 : vector<2x128xf32>
    %8 = math.exp %7 : vector<2x128xf32>
    %cst_6 = arith.constant 1.000000e+00 : f32
    %9 = vector.broadcast %cst_6 : f32 to vector<2x128xf32>
    %10 = arith.addf %9, %8 : vector<2x128xf32>
    %11 = tpu.reciprocal %10 {approx = true} : vector<2x128xf32> -> vector<2x128xf32>
    %12 = arith.truncf %11 : vector<2x128xf32> to vector<2x128xbf16>
    %c0_7 = arith.constant 0 : index
    %c0_8 = arith.constant 0 : index
    %13 = vector.load %arg4[%c0_7, %c0_8] : memref<128x128xbf16, #tpu.memory_space<vmem>>, vector<128x128xbf16>
    %cst_9 = arith.constant dense<0.000000e+00> : vector<2x128xf32>
    %14 = tpu.matmul %12, %13, %cst_9 {dimension_numbers = #tpu.dot_dimension_numbers<[1], [0], [0], [1], [0, 0, 1, 1], [], []>} : vector<2x128xbf16>, vector<128x128xbf16>, vector<2x128xf32> -> vector<2x128xf32>
    %c0_10 = arith.constant 0 : index
    %c0_11 = arith.constant 0 : index
    %15 = vector.load %arg5[%c0_10, %c0_11] : memref<1x128xf32, #tpu.memory_space<vmem>>, vector<1x128xf32>
    %16 = vector.broadcast %15 : vector<1x128xf32> to vector<2x128xf32>
    %17 = arith.addf %14, %16 : vector<2x128xf32>
    %cst_12 = arith.constant dense<0xFF800000> : vector<128xf32>
    %18 = vector.multi_reduction <maximumf>, %17, %cst_12 [0] : vector<2x128xf32> to vector<128xf32>
    %19 = vector.shape_cast %18 : vector<128xf32> to vector<1x128xf32>
    %20 = vector.broadcast %19 : vector<1x128xf32> to vector<2x128xf32>
    %21 = arith.subf %17, %20 : vector<2x128xf32>
    %22 = math.exp %21 : vector<2x128xf32>
    %cst_13 = arith.constant dense<0.000000e+00> : vector<128xf32>
    %23 = vector.multi_reduction <add>, %22, %cst_13 [0] : vector<2x128xf32> to vector<128xf32>
    %24 = vector.shape_cast %23 : vector<128xf32> to vector<1x128xf32>
    %25 = math.log %24 : vector<1x128xf32>
    %26 = arith.addf %19, %25 : vector<1x128xf32>
    %27 = vector.broadcast %26 : vector<1x128xf32> to vector<2x128xf32>
    %28 = arith.subf %17, %27 : vector<2x128xf32>
    %c0_14 = arith.constant 0 : index
    %c0_15 = arith.constant 0 : index
    %29 = vector.load %arg6[%c0_14, %c0_15] : memref<2x128xf32, #tpu.memory_space<vmem>>, vector<2x128xf32>
    tpu.vector_store %arg6[%c0_14, %c0_15], %28 {strides = array<i32>} : memref<2x128xf32, #tpu.memory_space<vmem>>, vector<2x128xf32>,
    return
  }
  func.func @transform_0(%arg0: i32) -> (i32, i32) {
    %c0_i32 = arith.constant 0 : i32
    %c0_i32_0 = arith.constant 0 : i32
    %c0_i32_1 = arith.constant 0 : i32
    return %c0_i32, %c0_i32_0 : i32, i32
  }
  func.func @transform_1(%arg0: i32) -> (i32, i32) {
    %c0_i32 = arith.constant 0 : i32
    %c0_i32_0 = arith.constant 0 : i32
    %c0_i32_1 = arith.constant 0 : i32
    return %c0_i32, %c0_i32_0 : i32, i32
  }
  func.func @transform_2(%arg0: i32) -> (i32, i32) {
    %c0_i32 = arith.constant 0 : i32
    %c0_i32_0 = arith.constant 0 : i32
    %c0_i32_1 = arith.constant 0 : i32
    return %c0_i32, %c0_i32_0 : i32, i32
  }
  func.func @transform_3(%arg0: i32) -> (i32, i32) {
    %c0_i32 = arith.constant 0 : i32
    %c0_i32_0 = arith.constant 0 : i32
    %c0_i32_1 = arith.constant 0 : i32
    return %c0_i32, %c0_i32_0 : i32, i32
  }
  func.func @transform_4(%arg0: i32) -> (i32, i32) {
    %c0_i32 = arith.constant 0 : i32
    %c0_i32_0 = arith.constant 0 : i32
    %c0_i32_1 = arith.constant 0 : i32
    return %c0_i32, %c0_i32_0 : i32, i32
  }
  func.func @transform_5(%arg0: i32) -> (i32, i32) {
    %c0_i32 = arith.constant 0 : i32
    %c0_i32_0 = arith.constant 0 : i32
    %c0_i32_1 = arith.constant 0 : i32
    return %c0_i32, %c0_i32_0 : i32, i32
  }
}

</mosaic_0001>

<bundles_post_ra>
// kernel: net_forward.3
= control target key start
LH: loop header
LB: loop body
LE: loop exit
PB: predicated region body
PF: predicated region fallthrough
CT: control target
= control target key end

     0   :  { %s2039_s12 = smov 0   ;;  %s2782_s0 = inlined_call_operand.vmem [shape: bf16[2048,128], index: 0, kind: input, shape index: {}]   ;;  %s2783_s1 = inlined_call_operand.vmem [shape: bf16[128,128], index: 1, kind: input, shape index: {}]   ;;  %s2784_s2 = inlined_call_operand.vmem [shape: f32[1,128], index: 2, kind: input, shape index: {}]   ;;  %s2785_s3 = inlined_call_operand.vmem [shape: f32[512,128], index: 3, kind: output, shape index: {}]  }
   0x1 LB: > { %s1615_s13 = sadd.s32 4294967295, %s2017_s12   ;;  %p1619_p0 = scmp.ge.s32.totalorder %s2017_s12, 1  ;;  %s2017_s12 = sphi %s2039_s12, %s13_s12  }
   0x2   : > { %p138_p1 = scmp.lt.s32.totalorder %s2017_s12, 3 }
   0x4   : > { %p139_p2 = pnand %p1619_p0, %p138_p1 }
   0x6   : > { %142 = sbr.rel (%p139_p2) target bundleno = 402 (0x192), region = 32 }
   0xd   : > { %v1939_v0 = vld [vmem:[%s2783_s1] sm:$0xff]   ;;  %s1620_s16 = sshll.u32 %s1615_s13, 7  ;;  %v1940_v1 = vld [vmem:[%s2783_s1 + $0x8] sm:$0xff]   ;;  %v1941_v2 = vld [vmem:[%s2783_s1 + $0x10] sm:$0xff]   ;;  %s2369_s10 = sshll.u32 %s1615_s13, 5 }
   0xe   : > { %p163_p3 = scmp.lt.s32.totalorder %s1620_s16, 255  ;;  %1771 = vmatprep.subr.bf16.mxu0 %v1939_v0  ;;  %1915 = vmatprep.subr.bf16.mxu1 %v1939_v0  ;;  %v1942_v3 = vld [vmem:[%s2783_s1 + $0x18] sm:$0xff]   ;;  %v1943_v6 = vld [vmem:[%s2783_s1 + $0x20] sm:$0xff]   ;;  %v1944_v7 = vld [vmem:[%s2783_s1 + $0x28] sm:$0xff]   ;;  %p169_p4 = scmp.lt.s32.totalorder %s2369_s10, 63 }
   0xf   : > { %1772 = vmatpush3.bf16.msra.mxu0 %v1939_v0  ;;  %1923 = vmatpush3.bf16.msra.mxu1 %v1939_v0  ;;  %v1945_v8 = vld [vmem:[%s2783_s1 + $0x30] sm:$0xff]   ;;  %v1946_v9 = vld [vmem:[%s2783_s1 + $0x38] sm:$0xff]  }
  0x10   : > { %s2890_s16 = smov (!%p163_p3, %s1620_s16), 255  ;;  %1773 = vmatprep.subr.bf16.mxu0 %v1940_v1  ;;  %1916 = vmatprep.subr.bf16.mxu1 %v1940_v1  ;;  %s2892_s10 = smov (!%p169_p4, %s2369_s10), 63 }
  0x11   : > { %s1621_s21 = sshll.u32 %s2890_s16, 2  ;;  %s1623_s11 = sshll.u32 %s2892_s10, 3 }
  0x12   : > { %s2061_s24 = scalar_lea.vmem %s2782_s0, %s1621_s21  ;;  %s2509_s15 = scalar_lea.vmem %s2785_s3, %s1623_s11 }
  0x13   : > { %1774 = vmatpush3.bf16.msra.mxu0 %v1940_v1  ;;  %1924 = vmatpush3.bf16.msra.mxu1 %v1940_v1  ;;  %v1947_v4 = vld [vmem:[%s2061_s24] sm:$0xff]   ;;  %v1949_v10 = vld [vmem:[%s2061_s24 + $0x8] sm:$0xff]   ;;  %v1951_v12 = vld [vmem:[%s2061_s24 + $0x10] sm:$0xff]  }
  0x14   : > { %1775 = vmatprep.subr.bf16.mxu0 %v1941_v2  ;;  %1917 = vmatprep.subr.bf16.mxu1 %v1941_v2  ;;  %v1948_v5 = vld [vmem:[%s2061_s24 + $0x100] sm:$0xff]   ;;  %v1950_v11 = vld [vmem:[%s2061_s24 + $0x108] sm:$0xff]   ;;  %v1952_v13 = vld [vmem:[%s2061_s24 + $0x110] sm:$0xff]  }
  0x15   : > { %1787 = vmatprep.mubr.bf16.mxu0 %v1947_v4  ;;  %1851 = vmatprep.mubr.bf16.mxu1 %v1948_v5  ;;  %v1953_v14 = vld [vmem:[%s2061_s24 + $0x18] sm:$0xff]   ;;  %v1955_v16 = vld [vmem:[%s2061_s24 + $0x20] sm:$0xff]   ;;  %v1957_v18 = vld [vmem:[%s2061_s24 + $0x28] sm:$0xff]  }
  0x16   : > { %v1954_v15 = vld [vmem:[%s2061_s24 + $0x118] sm:$0xff]   ;;  %v1956_v17 = vld [vmem:[%s2061_s24 + $0x120] sm:$0xff]   ;;  %v1958_v19 = vld [vmem:[%s2061_s24 + $0x128] sm:$0xff]  }
  0x17   : > { %1776 = vmatpush3.bf16.msra.mxu0 %v1941_v2  ;;  %1925 = vmatpush3.bf16.msra.mxu1 %v1941_v2  ;;  %v1959_v20 = vld [vmem:[%s2061_s24 + $0x30] sm:$0xff]   ;;  %v1961_v22 = vld [vmem:[%s2061_s24 + $0x38] sm:$0xff]   ;;  %v1963_v24 = vld [vmem:[%s2061_s24 + $0x40] sm:$0xff]  }
  0x18   : > { %1777 = vmatprep.subr.bf16.mxu0 %v1942_v3  ;;  %1918 = vmatprep.subr.bf16.mxu1 %v1942_v3  ;;  %v1960_v21 = vld [vmem:[%s2061_s24 + $0x130] sm:$0xff]   ;;  %v1962_v23 = vld [vmem:[%s2061_s24 + $0x138] sm:$0xff]   ;;  %v1964_v25 = vld [vmem:[%s2061_s24 + $0x140] sm:$0xff]  }
  0x19   : > { %v1965_v26 = vld [vmem:[%s2061_s24 + $0x48] sm:$0xff]   ;;  %v1967_v28 = vld [vmem:[%s2061_s24 + $0x50] sm:$0xff]   ;;  %v1969_v30 = vld [vmem:[%s2061_s24 + $0x58] sm:$0xff]  }
  0x1a   : > { %v1966_v27 = vld [vmem:[%s2061_s24 + $0x148] sm:$0xff]   ;;  %v1968_v29 = vld [vmem:[%s2061_s24 + $0x150] sm:$0xff]   ;;  %v1970_v31 = vld [vmem:[%s2061_s24 + $0x158] sm:$0xff]  }
  0x1b   : > { %1778 = vmatpush3.bf16.msra.mxu0 %v1942_v3  ;;  %1926 = vmatpush3.bf16.msra.mxu1 %v1942_v3  ;;  %v1971_v32 = vld [vmem:[%s2061_s24 + $0x60] sm:$0xff]   ;;  %v1973_v34 = vld [vmem:[%s2061_s24 + $0x68] sm:$0xff]   ;;  %v1975_v36 = vld [vmem:[%s2061_s24 + $0x70] sm:$0xff]  }
  0x1c   : > { %1779 = vmatprep.subr.bf16.mxu0 %v1943_v6  ;;  %1919 = vmatprep.subr.bf16.mxu1 %v1943_v6  ;;  %v1972_v33 = vld [vmem:[%s2061_s24 + $0x160] sm:$0xff]   ;;  %v1974_v35 = vld [vmem:[%s2061_s24 + $0x168] sm:$0xff]   ;;  %v1976_v37 = vld [vmem:[%s2061_s24 + $0x170] sm:$0xff]  }
  0x1d   : > { %v1977_v38 = vld [vmem:[%s2061_s24 + $0x78] sm:$0xff]   ;;  %v1979_v40 = vld [vmem:[%s2061_s24 + $0x80] sm:$0xff]   ;;  %v1981_v42 = vld [vmem:[%s2061_s24 + $0x88] sm:$0xff]  }
  0x1e   : > { %v1978_v39 = vld [vmem:[%s2061_s24 + $0x178] sm:$0xff]   ;;  %v1980_v41 = vld [vmem:[%s2061_s24 + $0x180] sm:$0xff]   ;;  %v1982_v43 = vld [vmem:[%s2061_s24 + $0x188] sm:$0xff]  }
  0x1f   : > { %1780 = vmatpush3.bf16.msra.mxu0 %v1943_v6  ;;  %1927 = vmatpush3.bf16.msra.mxu1 %v1943_v6  ;;  %v1983_v44 = vld [vmem:[%s2061_s24 + $0x90] sm:$0xff]   ;;  %v1985_v46 = vld [vmem:[%s2061_s24 + $0x98] sm:$0xff]   ;;  %v1987_v48 = vld [vmem:[%s2061_s24 + $0xa0] sm:$0xff]  }
  0x20   : > { %1781 = vmatprep.subr.bf16.mxu0 %v1944_v7  ;;  %1920 = vmatprep.subr.bf16.mxu1 %v1944_v7  ;;  %v1984_v45 = vld [vmem:[%s2061_s24 + $0x190] sm:$0xff]   ;;  %v1986_v47 = vld [vmem:[%s2061_s24 + $0x198] sm:$0xff]   ;;  %v1988_v49 = vld [vmem:[%s2061_s24 + $0x1a0] sm:$0xff]  }
  0x21   : > { %v1989_v50 = vld [vmem:[%s2061_s24 + $0xa8] sm:$0xff]   ;;  %v1991_v52 = vld [vmem:[%s2061_s24 + $0xb0] sm:$0xff]   ;;  %v1993_v54 = vld [vmem:[%s2061_s24 + $0xb8] sm:$0xff]  }
  0x22   : > { %v1990_v51 = vld [vmem:[%s2061_s24 + $0x1a8] sm:$0xff]   ;;  %v1992_v53 = vld [vmem:[%s2061_s24 + $0x1b0] sm:$0xff]   ;;  %v1994_v55 = vld [vmem:[%s2061_s24 + $0x1b8] sm:$0xff]  }
  0x23   : > { %1782 = vmatpush3.bf16.msra.mxu0 %v1944_v7  ;;  %1928 = vmatpush3.bf16.msra.mxu1 %v1944_v7  ;;  %v1995_v56 = vld [vmem:[%s2061_s24 + $0xc0] sm:$0xff]   ;;  %v1997_v58 = vld [vmem:[%s2061_s24 + $0xc8] sm:$0xff]   ;;  %v1999_v60 = vld [vmem:[%s2061_s24 + $0xd0] sm:$0xff]  }
  0x24   : > { %1783 = vmatprep.subr.bf16.mxu0 %v1945_v8  ;;  %1921 = vmatprep.subr.bf16.mxu1 %v1945_v8  ;;  %v1996_v57 = vld [vmem:[%s2061_s24 + $0x1c0] sm:$0xff]   ;;  %v1998_v59 = vld [vmem:[%s2061_s24 + $0x1c8] sm:$0xff]   ;;  %v2000_v61 = vld [vmem:[%s2061_s24 + $0x1d0] sm:$0xff]  }
  0x25   : > { %v2001_v62 = vld [vmem:[%s2061_s24 + $0xd8] sm:$0xff]   ;;  %v2003_v0 = vld [vmem:[%s2061_s24 + $0xe0] sm:$0xff]   ;;  %v2005_v2 = vld [vmem:[%s2061_s24 + $0xe8] sm:$0xff]  }
  0x26   : > { %v2002_v63 = vld [vmem:[%s2061_s24 + $0x1d8] sm:$0xff]   ;;  %v2004_v1 = vld [vmem:[%s2061_s24 + $0x1e0] sm:$0xff]   ;;  %v2006_v3 = vld [vmem:[%s2061_s24 + $0x1e8] sm:$0xff]  }
  0x27   : > { %1784 = vmatpush3.bf16.msra.mxu0 %v1945_v8  ;;  %1929 = vmatpush3.bf16.msra.mxu1 %v1945_v8  ;;  %v2007_v4 = vld [vmem:[%s2061_s24 + $0xf0] sm:$0xff]   ;;  %v2009_v6 = vld [vmem:[%s2061_s24 + $0xf8] sm:$0xff]  }
  0x28   : > { %1785 = vmatprep.subr.bf16.mxu0 %v1946_v9  ;;  %1922 = vmatprep.subr.bf16.mxu1 %v1946_v9  ;;  %v2008_v5 = vld [vmem:[%s2061_s24 + $0x1f0] sm:$0xff]   ;;  %v2010_v7 = vld [vmem:[%s2061_s24 + $0x1f8] sm:$0xff]  }
  0x2b   : > { %1786 = vmatpush3.bf16.msra.mxu0 %v1946_v9  ;;  %1930 = vmatpush3.bf16.msra.mxu1 %v1946_v9 }
  0x2e   : > { %1788 = vmatmul.mubr.bf16.vlgmr.msra.gmra.mrb[0].mxu0 %v1949_v10  ;;  %1852 = vmatmul.mubr.bf16.vlgmr.msra.gmra.mrb[0].mxu1 %v1950_v11 }
  0x2f   : > { %1791 = vmatprep.mubr.bf16.mxu0 %v1951_v12  ;;  %1855 = vmatprep.mubr.bf16.mxu1 %v1952_v13 }
  0x36   : > { %1792 = vmatmul.mubr.bf16.gmra.mrb[4].mxu0 %v1953_v14  ;;  %1856 = vmatmul.mubr.bf16.gmra.mrb[4].mxu1 %v1954_v15 }
  0x37   : > { %1795 = vmatprep.mubr.bf16.mxu0 %v1955_v16  ;;  %1859 = vmatprep.mubr.bf16.mxu1 %v1956_v17 }
  0x3e   : > { %1796 = vmatmul.mubr.bf16.gmra.mrb[8].mxu0 %v1957_v18  ;;  %1860 = vmatmul.mubr.bf16.gmra.mrb[8].mxu1 %v1958_v19 }
  0x3f   : > { %1799 = vmatprep.mubr.bf16.mxu0 %v1959_v20  ;;  %1863 = vmatprep.mubr.bf16.mxu1 %v1960_v21 }
  0x46   : > { %1800 = vmatmul.mubr.bf16.gmra.mrb[12].mxu0 %v1961_v22  ;;  %1864 = vmatmul.mubr.bf16.gmra.mrb[12].mxu1 %v1962_v23 }
  0x47   : > { %1803 = vmatprep.mubr.bf16.mxu0 %v1963_v24  ;;  %1867 = vmatprep.mubr.bf16.mxu1 %v1964_v25 }
  0x4e   : > { %1804 = vmatmul.mubr.bf16.gmra.mrb[16].mxu0 %v1965_v26  ;;  %1868 = vmatmul.mubr.bf16.gmra.mrb[16].mxu1 %v1966_v27 }
  0x4f   : > { %1807 = vmatprep.mubr.bf16.mxu0 %v1967_v28  ;;  %1871 = vmatprep.mubr.bf16.mxu1 %v1968_v29 }
  0x56   : > { %1808 = vmatmul.mubr.bf16.gmra.mrb[20].mxu0 %v1969_v30  ;;  %1872 = vmatmul.mubr.bf16.gmra.mrb[20].mxu1 %v1970_v31 }
  0x57   : > { %1811 = vmatprep.mubr.bf16.mxu0 %v1971_v32  ;;  %1875 = vmatprep.mubr.bf16.mxu1 %v1972_v33 }
  0x5e   : > { %1812 = vmatmul.mubr.bf16.gmra.mrb[24].mxu0 %v1973_v34  ;;  %1876 = vmatmul.mubr.bf16.gmra.mrb[24].mxu1 %v1974_v35 }
  0x5f   : > { %1815 = vmatprep.mubr.bf16.mxu0 %v1975_v36  ;;  %1879 = vmatprep.mubr.bf16.mxu1 %v1976_v37 }
  0x66   : > { %1816 = vmatmul.mubr.bf16.gmra.mrb[28].mxu0 %v1977_v38  ;;  %1880 = vmatmul.mubr.bf16.gmra.mrb[28].mxu1 %v1978_v39 }
  0x67   : > { %1819 = vmatprep.mubr.bf16.mxu0 %v1979_v40  ;;  %1883 = vmatprep.mubr.bf16.mxu1 %v1980_v41 }
  0x6e   : > { %1820 = vmatmul.mubr.bf16.gmra.mrb[32].mxu0 %v1981_v42  ;;  %1884 = vmatmul.mubr.bf16.gmra.mrb[32].mxu1 %v1982_v43 }
  0x6f   : > { %1823 = vmatprep.mubr.bf16.mxu0 %v1983_v44  ;;  %1887 = vmatprep.mubr.bf16.mxu1 %v1984_v45 }
  0x76   : > { %1824 = vmatmul.mubr.bf16.gmra.mrb[36].mxu0 %v1985_v46  ;;  %1888 = vmatmul.mubr.bf16.gmra.mrb[36].mxu1 %v1986_v47 }
  0x77   : > { %1827 = vmatprep.mubr.bf16.mxu0 %v1987_v48  ;;  %1891 = vmatprep.mubr.bf16.mxu1 %v1988_v49  ;;  %v2193_v48 = vld [vmem:[%s2784_s2] ss:$0 sm:$0xff] }
  0x7e   : > { %1828 = vmatmul.mubr.bf16.gmra.mrb[40].mxu0 %v1989_v50  ;;  %1892 = vmatmul.mubr.bf16.gmra.mrb[40].mxu1 %v1990_v51 }
  0x7f   : > { %1831 = vmatprep.mubr.bf16.mxu0 %v1991_v52  ;;  %1895 = vmatprep.mubr.bf16.mxu1 %v1992_v53 }
  0x86   : > { %1832 = vmatmul.mubr.bf16.gmra.mrb[44].mxu0 %v1993_v54  ;;  %1896 = vmatmul.mubr.bf16.gmra.mrb[44].mxu1 %v1994_v55 }
  0x87   : > { %1835 = vmatprep.mubr.bf16.mxu0 %v1995_v56  ;;  %1899 = vmatprep.mubr.bf16.mxu1 %v1996_v57 }
  0x8e   : > { %1836 = vmatmul.mubr.bf16.gmra.mrb[48].mxu0 %v1997_v58  ;;  %1900 = vmatmul.mubr.bf16.gmra.mrb[48].mxu1 %v1998_v59 }
  0x8f   : > { %1839 = vmatprep.mubr.bf16.mxu0 %v1999_v60  ;;  %1903 = vmatprep.mubr.bf16.mxu1 %v2000_v61 }
  0x96   : > { %1840 = vmatmul.mubr.bf16.gmra.mrb[52].mxu0 %v2001_v62  ;;  %1904 = vmatmul.mubr.bf16.gmra.mrb[52].mxu1 %v2002_v63 }
  0x97   : > { %1843 = vmatprep.mubr.bf16.mxu0 %v2003_v0  ;;  %1907 = vmatprep.mubr.bf16.mxu1 %v2004_v1 }
  0x9e   : > { %1844 = vmatmul.mubr.bf16.gmra.mrb[56].mxu0 %v2005_v2  ;;  %1908 = vmatmul.mubr.bf16.gmra.mrb[56].mxu1 %v2006_v3 }
  0x9f   : > { %1847 = vmatprep.mubr.bf16.mxu0 %v2007_v4  ;;  %1911 = vmatprep.mubr.bf16.mxu1 %v2008_v5 }
  0xa6   : > { %1848 = vmatmul.mubr.bf16.gmra.mrb[60].mxu0 %v2009_v6  ;;  %1912 = vmatmul.mubr.bf16.gmra.mrb[60].mxu1 %v2010_v7 }
 0x101   : > { %v1789_v8 = vpop.f32.mrb[0].mxu0  ;;  %v1853_v9 = vpop.f32.mrb[0].mxu1 }
 0x102   : > { %v792_v10 = vpop.f32.mrb[1].mxu0  ;;  %v1048_v11 = vpop.f32.mrb[1].mxu1  ;;  %v2200_v51 = vadd.f32 %v1789_v8, %v2193_v48  ;;  %v2203_v52 = vadd.f32 %v1853_v9, %v2193_v48 }
 0x103   : > { %v1790_v12 = vpop.f32.mrb[2].mxu0  ;;  %v1854_v13 = vpop.f32.mrb[2].mxu1  ;;  %v2206_v53 = vadd.f32 %v2193_v48, %v792_v10  ;;  %v2209_v54 = vadd.f32 %v2193_v48, %v1048_v11 }
 0x104   : > { %v795_v14 = vpop.f32.mrb[3].mxu0  ;;  %v1051_v15 = vpop.f32.mrb[3].mxu1  ;;  %v2216_v57 = vadd.f32 %v1790_v12, %v2193_v48  ;;  %v2219_v58 = vadd.f32 %v1854_v13, %v2193_v48 }
 0x105   : > { %v2222_v59 = vadd.f32 %v2193_v48, %v795_v14  ;;  %v2225_v60 = vadd.f32 %v2193_v48, %v1051_v15 }
 0x109   : > { %v1793_v16 = vpop.f32.mrb[4].mxu0  ;;  %v1857_v17 = vpop.f32.mrb[4].mxu1 }
 0x10a   : > { %v808_v18 = vpop.f32.mrb[5].mxu0  ;;  %v1064_v19 = vpop.f32.mrb[5].mxu1  ;;  %v2232_v63 = vadd.f32 %v1793_v16, %v2193_v48  ;;  %v2235_v0 = vadd.f32 %v1857_v17, %v2193_v48 }
 0x10b   : > { %v1794_v20 = vpop.f32.mrb[6].mxu0  ;;  %v1858_v21 = vpop.f32.mrb[6].mxu1  ;;  %v2238_v1 = vadd.f32 %v2193_v48, %v808_v18  ;;  %v2241_v2 = vadd.f32 %v2193_v48, %v1064_v19 }
 0x10c   : > { %v811_v22 = vpop.f32.mrb[7].mxu0  ;;  %v1067_v23 = vpop.f32.mrb[7].mxu1  ;;  %v2248_v5 = vadd.f32 %v1794_v20, %v2193_v48  ;;  %v2251_v6 = vadd.f32 %v1858_v21, %v2193_v48 }
 0x10d   : > { %v2254_v7 = vadd.f32 %v2193_v48, %v811_v22  ;;  %v2257_v8 = vadd.f32 %v2193_v48, %v1067_v23 }
 0x10f   : > { %2799 = vst [vmem:[#allocation2_spill] sm:$0xff] %v2257_v8 }
 0x111   : > { %v2142_v24 = vpop.f32.mrb[8].mxu0  ;;  %v2144_v25 = vpop.f32.mrb[8].mxu1 }
 0x112   : > { %v2146_v26 = vpop.f32.mrb[9].mxu0  ;;  %v2148_v27 = vpop.f32.mrb[9].mxu1  ;;  %v2281_v17 = vadd.f32 %v2142_v24, %v2193_v48  ;;  %v2285_v19 = vadd.f32 %v2144_v25, %v2193_v48 }
 0x113   : > { %v2150_v28 = vpop.f32.mrb[10].mxu0  ;;  %v2152_v29 = vpop.f32.mrb[10].mxu1  ;;  %v2289_v21 = vadd.f32 %v2193_v48, %v2146_v26  ;;  %v2293_v23 = vadd.f32 %v2193_v48, %v2148_v27 }
 0x114   : > { %v2154_v30 = vpop.f32.mrb[11].mxu0  ;;  %v2156_v31 = vpop.f32.mrb[11].mxu1  ;;  %v2301_v24 = vadd.f32 %v2150_v28, %v2193_v48  ;;  %v2305_v25 = vadd.f32 %v2152_v29, %v2193_v48 }
 0x115   : > { %v2309_v26 = vadd.f32 %v2193_v48, %v2154_v30  ;;  %v2313_v27 = vadd.f32 %v2193_v48, %v2156_v31 }
 0x119   : > { %v2158_v32 = vpop.f32.mrb[12].mxu0  ;;  %v2160_v33 = vpop.f32.mrb[12].mxu1 }
 0x11a   : > { %v2162_v34 = vpop.f32.mrb[13].mxu0  ;;  %v2164_v35 = vpop.f32.mrb[13].mxu1  ;;  %v2321_v28 = vadd.f32 %v2158_v32, %v2193_v48  ;;  %v2325_v29 = vadd.f32 %v2160_v33, %v2193_v48 }
 0x11b   : > { %v2166_v36 = vpop.f32.mrb[14].mxu0  ;;  %v2168_v37 = vpop.f32.mrb[14].mxu1  ;;  %v2329_v30 = vadd.f32 %v2193_v48, %v2162_v34  ;;  %v2333_v31 = vadd.f32 %v2193_v48, %v2164_v35 }
 0x11c   : > { %v2170_v38 = vpop.f32.mrb[15].mxu0  ;;  %v2172_v39 = vpop.f32.mrb[15].mxu1  ;;  %v2341_v32 = vadd.f32 %v2166_v36, %v2193_v48  ;;  %v2345_v33 = vadd.f32 %v2168_v37, %v2193_v48 }
 0x11d   : > { %v2349_v34 = vadd.f32 %v2193_v48, %v2170_v38  ;;  %v2353_v35 = vadd.f32 %v2193_v48, %v2172_v39 }
 0x11f   : > { %2802 = vst [vmem:[#allocation5_spill] sm:$0xff] %v2349_v34  ;;  %2803 = vst [vmem:[#allocation6_spill] sm:$0xff] %v2353_v35 }
 0x121   : > { %v2174_v40 = vpop.f32.mrb[16].mxu0  ;;  %v2176_v41 = vpop.f32.mrb[16].mxu1 }
 0x122   : > { %v2178_v42 = vpop.f32.mrb[17].mxu0  ;;  %v2180_v43 = vpop.f32.mrb[17].mxu1  ;;  %v2381_v11 = vadd.f32 %v2174_v40, %v2193_v48  ;;  %v2385_v10 = vadd.f32 %v2176_v41, %v2193_v48 }
 0x123   : > { %v2182_v44 = vpop.f32.mrb[18].mxu0  ;;  %v2184_v45 = vpop.f32.mrb[18].mxu1  ;;  %v2389_v9 = vadd.f32 %v2193_v48, %v2178_v42 }
 0x124   : > { %v2186_v46 = vpop.f32.mrb[19].mxu0  ;;  %v2188_v47 = vpop.f32.mrb[19].mxu1  ;;  %v2401_v40 = vadd.f32 %v2182_v44, %v2193_v48  ;;  %v2405_v41 = vadd.f32 %v2184_v45, %v2193_v48 }
 0x125   : > { %v2409_v42 = vadd.f32 %v2193_v48, %v2186_v46 }
 0x127   : > { %2806 = vst [vmem:[#allocation9_spill] sm:$0xff] %v2409_v42 }
 0x129   : > { %v2195_v49 = vpop.f32.mrb[20].mxu0  ;;  %v2197_v50 = vpop.f32.mrb[20].mxu1 }
 0x12a   : > { %v2211_v55 = vpop.f32.mrb[21].mxu0  ;;  %v2213_v56 = vpop.f32.mrb[21].mxu1  ;;  %v2421_v44 = vadd.f32 %v2195_v49, %v2193_v48  ;;  %v2425_v45 = vadd.f32 %v2197_v50, %v2193_v48 }
 0x12b   : > { %v2227_v61 = vpop.f32.mrb[22].mxu0  ;;  %v2229_v62 = vpop.f32.mrb[22].mxu1  ;;  %v2429_v46 = vadd.f32 %v2193_v48, %v2211_v55 }
 0x12c   : > { %v2243_v3 = vpop.f32.mrb[23].mxu0  ;;  %v2245_v4 = vpop.f32.mrb[23].mxu1  ;;  %2810 = vst [vmem:[#allocation13_spill] sm:$0xff] %v2421_v44  ;;  %2811 = vst [vmem:[#allocation14_spill] sm:$0xff] %v2425_v45  ;;  %v2442_v49 = vadd.f32 %v2227_v61, %v2193_v48  ;;  %v2446_v50 = vadd.f32 %v2229_v62, %v2193_v48 }
 0x12d   : > { %2812 = vst [vmem:[#allocation15_spill] sm:$0xff] %v2429_v46  ;;  %v2450_v55 = vadd.f32 %v2193_v48, %v2243_v3 }
 0x12e   : > { %2816 = vst [vmem:[#allocation19_spill] sm:$0xff] %v2442_v49  ;;  %2817 = vst [vmem:[#allocation20_spill] sm:$0xff] %v2446_v50 }
 0x12f   : > { %2818 = vst [vmem:[#allocation21_spill] sm:$0xff] %v2450_v55 }
 0x131   : > { %v2275_v13 = vpop.f32.mrb[24].mxu0  ;;  %v2277_v15 = vpop.f32.mrb[24].mxu1 }
 0x132   : > { %v2295_v14 = vpop.f32.mrb[25].mxu0  ;;  %v2297_v22 = vpop.f32.mrb[25].mxu1 }
 0x133   : > { %v2315_v20 = vpop.f32.mrb[26].mxu0  ;;  %v2317_v18 = vpop.f32.mrb[26].mxu1  ;;  %v2489_v35 = vadd.f32 %v2193_v48, %v2295_v14  ;;  %v2493_v62 = vadd.f32 %v2193_v48, %v2297_v22 }
 0x134   : > { %v2335_v16 = vpop.f32.mrb[27].mxu0  ;;  %v2337_v12 = vpop.f32.mrb[27].mxu1 }
 0x135   : > { %2800 = vst [vmem:[#allocation3_spill] sm:$0xff] %v2335_v16  ;;  %2801 = vst [vmem:[#allocation4_spill] sm:$0xff] %v2337_v12  ;;  %v2393_v16 = vadd.f32 %v2193_v48, %v2180_v43  ;;  %v2413_v43 = vadd.f32 %v2193_v48, %v2188_v47  ;;  %v2433_v47 = vadd.f32 %v2193_v48, %v2213_v56 }
 0x136   : > { %v2454_v56 = vadd.f32 %v2193_v48, %v2245_v4  ;;  %v2479_v4 = vadd.f32 %v2275_v13, %v2193_v48 }
 0x137   : > { %2807 = vst [vmem:[#allocation10_spill] sm:$0xff] %v2413_v43  ;;  %2813 = vst [vmem:[#allocation16_spill] sm:$0xff] %v2433_v47  ;;  %v2821_v43 = vmax.f32 %v2203_v52, 0.0 }
 0x138   : > { %2819 = vst [vmem:[#allocation22_spill] sm:$0xff] %v2454_v56 }
 0x139   : > { %v2375_v38 = vpop.f32.mrb[28].mxu0  ;;  %v2377_v8 = vpop.f32.mrb[28].mxu1 }
 0x13a   : > { %v2395_v37 = vpop.f32.mrb[29].mxu0  ;;  %v2397_v12 = vpop.f32.mrb[29].mxu1 }
 0x13b   : > { %2804 = vst [vmem:[#allocation7_spill] sm:$0xff] %v2395_v37  ;;  %2805 = vst [vmem:[#allocation8_spill] sm:$0xff] %v2397_v12  ;;  %v2415_v39 = vpop.f32.mrb[30].mxu0  ;;  %v2417_v36 = vpop.f32.mrb[30].mxu1 }
 0x13c   : > { %2808 = vst [vmem:[#allocation11_spill] sm:$0xff] %v2415_v39  ;;  %2809 = vst [vmem:[#allocation12_spill] sm:$0xff] %v2417_v36  ;;  %v2435_v12 = vpop.f32.mrb[31].mxu0  ;;  %v2437_v39 = vpop.f32.mrb[31].mxu1 }
 0x13d   : > { %2814 = vst [vmem:[#allocation17_spill] sm:$0xff] %v2435_v12  ;;  %2815 = vst [vmem:[#allocation18_spill] sm:$0xff] %v2437_v39  ;;  %v2483_v12 = vadd.f32 %v2277_v15, %v2193_v48 }
 0x141   : > { %v1821_v3 = vpop.f32.mrb[32].mxu0  ;;  %v1885_v34 = vpop.f32.mrb[32].mxu1 }
 0x142   : > { %v929_v39 = vadd.f32 %v1821_v3, %v2193_v48  ;;  %v1185_v36 = vadd.f32 %v1885_v34, %v2193_v48  ;;  %v920_v37 = vpop.f32.mrb[33].mxu0  ;;  %v1176_v61 = vpop.f32.mrb[33].mxu1 }
 0x143   : > { %v921_v13 = vadd.f32 %v2193_v48, %v920_v37  ;;  %v1177_v56 = vadd.f32 %v2193_v48, %v1176_v61  ;;  %v1822_v15 = vpop.f32.mrb[34].mxu0  ;;  %v1886_v55 = vpop.f32.mrb[34].mxu1  ;;  %v2820_v37 = vmax.f32 %v2200_v51, 0.0 }
 0x144   : > { %v1337_v50 = vmax.f32 %v929_v39, 0.0  ;;  %v1401_v3 = vmax.f32 %v1185_v36, 0.0  ;;  %v932_v34 = vadd.f32 %v1822_v15, %v2193_v48  ;;  %v1188_v49 = vadd.f32 %v1886_v55, %v2193_v48  ;;  %v923_v47 = vpop.f32.mrb[35].mxu0  ;;  %v1179_v14 = vpop.f32.mrb[35].mxu1 }
 0x145   : > { %v1335_v46 = vmax.f32 %v921_v13, 0.0  ;;  %v1399_v45 = vmax.f32 %v1177_v56, 0.0  ;;  %v924_v22 = vadd.f32 %v2193_v48, %v923_v47  ;;  %v1180_v44 = vadd.f32 %v2193_v48, %v1179_v14 }
 0x146   : > { %v1433_v61 = vmax.f32 %v2820_v37, %v1337_v50  ;;  %v1465_v39 = vmax.f32 %v2821_v43, %v1401_v3  ;;  %v1338_v42 = vmax.f32 %v932_v34, 0.0  ;;  %v1402_v36 = vmax.f32 %v1188_v49, 0.0 }
 0x147   : > { %v2822_v55 = vmax.f32 %v2206_v53, 0.0  ;;  %v2823_v47 = vmax.f32 %v2209_v54, 0.0  ;;  %v1336_v15 = vmax.f32 %v924_v22, 0.0  ;;  %v1400_v51 = vmax.f32 %v1180_v44, 0.0 }
 0x148   : > { %v1329_v50 = vmax.f32 %v2479_v4, 0.0  ;;  %v1497_v52 = vmax.f32 %v1433_v61, %v1465_v39  ;;  %v2824_v43 = vmax.f32 %v2216_v57, 0.0  ;;  %v2825_v3 = vmax.f32 %v2219_v58, 0.0 }
 0x149   : > { %v1431_v56 = vmax.f32 %v2822_v55, %v1335_v46  ;;  %v1463_v13 = vmax.f32 %v2823_v47, %v1399_v45  ;;  %v1393_v14 = vmax.f32 %v2483_v12, 0.0  ;;  %v2826_v46 = vmax.f32 %v2222_v59, 0.0  ;;  %v1825_v44 = vpop.f32.mrb[36].mxu0  ;;  %v1889_v22 = vpop.f32.mrb[36].mxu1 }
 0x14a   : > { %v1434_v49 = vmax.f32 %v2824_v43, %v1338_v42  ;;  %v1466_v34 = vmax.f32 %v2825_v3, %v1402_v36  ;;  %v2827_v54 = vmax.f32 %v2225_v60, 0.0  ;;  %v2527_v57 = vadd.f32 %v2315_v20, %v2193_v48  ;;  %1529 = vst [vmem:[%s2509_s15 + $0x10] sm:$0xff] %v1497_v52  ;;  %v936_v39 = vpop.f32.mrb[37].mxu0  ;;  %v1192_v59 = vpop.f32.mrb[37].mxu1 }
 0x14b   : > { %v1495_v53 = vmax.f32 %v1431_v56, %v1463_v13  ;;  %v1432_v37 = vmax.f32 %v2826_v46, %v1336_v15  ;;  %v945_v42 = vadd.f32 %v1825_v44, %v2193_v48  ;;  %v1201_v61 = vadd.f32 %v1889_v22, %v2193_v48  ;;  %v1826_v56 = vpop.f32.mrb[38].mxu0  ;;  %v1890_v47 = vpop.f32.mrb[38].mxu1 }
 0x14c   : > { %v1464_v45 = vmax.f32 %v2827_v54, %v1400_v51  ;;  %v1498_v58 = vmax.f32 %v1434_v49, %v1466_v34  ;;  %v2534_v60 = vadd.f32 %v2317_v18, %v2193_v48  ;;  %v937_v55 = vadd.f32 %v2193_v48, %v936_v39  ;;  %v939_v43 = vpop.f32.mrb[39].mxu0  ;;  %v1195_v49 = vpop.f32.mrb[39].mxu1 }
 0x14d   : > { %1527 = vst [vmem:[%s2509_s15] sm:$0xff] %v1495_v53  ;;  %v1193_v20 = vadd.f32 %v2193_v48, %v1192_v59  ;;  %v1341_v13 = vmax.f32 %v945_v42, 0.0  ;;  %v1405_v15 = vmax.f32 %v1201_v61, 0.0  ;;  %v948_v51 = vadd.f32 %v1826_v56, %v2193_v48 }
 0x14e   : > { %v1496_v36 = vmax.f32 %v1432_v37, %v1464_v45  ;;  %1530 = vst [vmem:[%s2509_s15 + $0x18] sm:$0xff] %v1498_v58  ;;  %v1204_v52 = vadd.f32 %v1890_v47, %v2193_v48  ;;  %v1339_v18 = vmax.f32 %v937_v55, 0.0  ;;  %v940_v34 = vadd.f32 %v2193_v48, %v939_v43 }
 0x14f   : > { %v1403_v3 = vmax.f32 %v1193_v20, 0.0  ;;  %v1196_v53 = vadd.f32 %v2193_v48, %v1195_v49  ;;  %v2828_v46 = vmax.f32 %v2232_v63, 0.0  ;;  %v2829_v54 = vmax.f32 %v2235_v0, 0.0 }
 0x150   : > { %1528 = vst [vmem:[%s2509_s15 + $0x8] sm:$0xff] %v1496_v36  ;;  %v1342_v44 = vmax.f32 %v948_v51, 0.0  ;;  %v1406_v22 = vmax.f32 %v1204_v52, 0.0  ;;  %v2830_v58 = vmax.f32 %v2238_v1, 0.0  ;;  %v2831_v61 = vmax.f32 %v2241_v2, 0.0  ;;  %v2835_v2 = vld [vmem:[#allocation2_spill] sm:$0xff] }
 0x151   : > { %v1437_v37 = vmax.f32 %v2828_v46, %v1341_v13  ;;  %v1469_v45 = vmax.f32 %v2829_v54, %v1405_v15  ;;  %v1340_v59 = vmax.f32 %v940_v34, 0.0  ;;  %v1404_v36 = vmax.f32 %v1196_v53, 0.0  ;;  %v1829_v49 = vpop.f32.mrb[40].mxu0 }
 0x152   : > { %v1435_v42 = vmax.f32 %v2830_v58, %v1339_v18  ;;  %v1467_v39 = vmax.f32 %v2831_v61, %v1403_v3  ;;  %v1327_v55 = vmax.f32 %v2489_v35, 0.0  ;;  %v2832_v63 = vmax.f32 %v2248_v5, 0.0  ;;  %v1893_v18 = vpop.f32.mrb[40].mxu1  ;;  %v2837_v3 = vld [vmem:[#allocation3_spill] sm:$0xff]  ;;  %v952_v46 = vpop.f32.mrb[41].mxu0 }
 0x153   : > { %v1501_v20 = vmax.f32 %v1437_v37, %v1469_v45  ;;  %v2833_v0 = vmax.f32 %v2251_v6, 0.0  ;;  %v1391_v13 = vmax.f32 %v2493_v62, 0.0  ;;  %v2834_v15 = vmax.f32 %v2254_v7, 0.0  ;;  %v1208_v7 = vpop.f32.mrb[41].mxu1  ;;  %v2838_v37 = vld [vmem:[#allocation4_spill] sm:$0xff]  ;;  %v1830_v58 = vpop.f32.mrb[42].mxu0 }
 0x154   : > { %v1438_v56 = vmax.f32 %v2832_v63, %v1342_v44  ;;  %v1499_v1 = vmax.f32 %v1435_v42, %v1467_v39  ;;  %v2836_v52 = vmax.f32 %v2835_v2, 0.0  ;;  %v2565_v5 = vadd.f32 %v2193_v48, %v2837_v3  ;;  %v1894_v42 = vpop.f32.mrb[42].mxu1 }
 0x155   : > { %v1470_v47 = vmax.f32 %v2833_v0, %v1406_v22  ;;  %v1436_v51 = vmax.f32 %v2834_v15, %v1340_v59  ;;  %1533 = vst [vmem:[%s2509_s15 + $0x30] sm:$0xff] %v1501_v20  ;;  %v961_v34 = vadd.f32 %v1829_v49, %v2193_v48  ;;  %v1217_v53 = vadd.f32 %v1893_v18, %v2193_v48  ;;  %v955_v20 = vpop.f32.mrb[43].mxu0  ;;  %v1211_v63 = vpop.f32.mrb[43].mxu1 }
 0x156   : > { %v1468_v43 = vmax.f32 %v2836_v52, %v1404_v36  ;;  %v2572_v54 = vadd.f32 %v2193_v48, %v2838_v37  ;;  %1531 = vst [vmem:[%s2509_s15 + $0x20] sm:$0xff] %v1499_v1  ;;  %v953_v44 = vadd.f32 %v2193_v48, %v952_v46  ;;  %v1209_v22 = vadd.f32 %v2193_v48, %v1208_v7 }
 0x157   : > { %v1502_v6 = vmax.f32 %v1438_v56, %v1470_v47  ;;  %v1345_v61 = vmax.f32 %v961_v34, 0.0  ;;  %v1409_v39 = vmax.f32 %v1217_v53, 0.0  ;;  %v964_v59 = vadd.f32 %v1830_v58, %v2193_v48 }
 0x158   : > { %v1500_v45 = vmax.f32 %v1436_v51, %v1468_v43  ;;  %v1220_v36 = vadd.f32 %v1894_v42, %v2193_v48  ;;  %v1343_v56 = vmax.f32 %v953_v44, 0.0  ;;  %v1407_v0 = vmax.f32 %v1209_v22, 0.0 }
 0x159   : > { %1534 = vst [vmem:[%s2509_s15 + $0x38] sm:$0xff] %v1502_v6  ;;  %v956_v47 = vadd.f32 %v2193_v48, %v955_v20  ;;  %v1212_v1 = vadd.f32 %v2193_v48, %v1211_v63  ;;  %v2839_v15 = vmax.f32 %v2281_v17, 0.0  ;;  %v2840_v2 = vmax.f32 %v2285_v19, 0.0 }
 0x15a   : > { %1532 = vst [vmem:[%s2509_s15 + $0x28] sm:$0xff] %v1500_v45  ;;  %v1346_v43 = vmax.f32 %v964_v59, 0.0  ;;  %v1410_v49 = vmax.f32 %v1220_v36, 0.0  ;;  %v2841_v18 = vmax.f32 %v2289_v21, 0.0  ;;  %v2842_v6 = vmax.f32 %v2293_v23, 0.0  ;;  %v1897_v59 = vpop.f32.mrb[44].mxu1 }
 0x15b   : > { %v1441_v51 = vmax.f32 %v2839_v15, %v1345_v61  ;;  %v1473_v52 = vmax.f32 %v2840_v2, %v1409_v39  ;;  %v1344_v53 = vmax.f32 %v956_v47, 0.0  ;;  %v1408_v46 = vmax.f32 %v1212_v1, 0.0  ;;  %v1833_v39 = vpop.f32.mrb[44].mxu0 }
 0x15c   : > { %v1439_v3 = vmax.f32 %v2841_v18, %v1343_v56  ;;  %v1471_v34 = vmax.f32 %v2842_v6, %v1407_v0  ;;  %v1330_v7 = vmax.f32 %v2527_v57, 0.0  ;;  %v2843_v17 = vmax.f32 %v2301_v24, 0.0  ;;  %v968_v63 = vpop.f32.mrb[45].mxu0  ;;  %v1224_v56 = vpop.f32.mrb[45].mxu1 }
 0x15d   : > { %v1505_v37 = vmax.f32 %v1441_v51, %v1473_v52  ;;  %v2844_v19 = vmax.f32 %v2305_v25, 0.0  ;;  %v1394_v22 = vmax.f32 %v2534_v60, 0.0  ;;  %v2845_v58 = vmax.f32 %v2309_v26, 0.0  ;;  %v1834_v1 = vpop.f32.mrb[46].mxu0  ;;  %v1898_v15 = vpop.f32.mrb[46].mxu1 }
 0x15e   : > { %v1442_v45 = vmax.f32 %v2843_v17, %v1346_v43  ;;  %v1503_v21 = vmax.f32 %v1439_v3, %v1471_v34  ;;  %v2846_v23 = vmax.f32 %v2313_v27, 0.0  ;;  %v1328_v36 = vmax.f32 %v2565_v5, 0.0  ;;  %v1227_v18 = vpop.f32.mrb[47].mxu1 }
 0x15f   : > { %v1474_v44 = vmax.f32 %v2844_v19, %v1410_v49  ;;  %v1440_v42 = vmax.f32 %v2845_v58, %v1344_v53  ;;  %1537 = vst [vmem:[%s2509_s15 + $0x50] sm:$0xff] %v1505_v37  ;;  %v977_v25 = vadd.f32 %v1833_v39, %v2193_v48  ;;  %v1233_v20 = vadd.f32 %v1897_v59, %v2193_v48  ;;  %v971_v49 = vpop.f32.mrb[47].mxu0 }
 0x160   : > { %v1472_v61 = vmax.f32 %v2846_v23, %v1408_v46  ;;  %v1392_v26 = vmax.f32 %v2572_v54, 0.0  ;;  %1535 = vst [vmem:[%s2509_s15 + $0x40] sm:$0xff] %v1503_v21  ;;  %v969_v27 = vadd.f32 %v2193_v48, %v968_v63  ;;  %v1225_v47 = vadd.f32 %v2193_v48, %v1224_v56  ;;  %v2853_v63 = vld [vmem:[#allocation5_spill] sm:$0xff] }
 0x161   : > { %v1506_v24 = vmax.f32 %v1442_v45, %v1474_v44  ;;  %v1349_v51 = vmax.f32 %v977_v25, 0.0  ;;  %v1413_v2 = vmax.f32 %v1233_v20, 0.0  ;;  %v980_v52 = vadd.f32 %v1834_v1, %v2193_v48  ;;  %v1837_v1 = vpop.f32.mrb[48].mxu0 }
 0x162   : > { %v1504_v0 = vmax.f32 %v1440_v42, %v1472_v61  ;;  %v1236_v43 = vadd.f32 %v1898_v15, %v2193_v48  ;;  %v1347_v3 = vmax.f32 %v969_v27, 0.0  ;;  %v1411_v6 = vmax.f32 %v1225_v47, 0.0  ;;  %v2855_v27 = vld [vmem:[#allocation6_spill] sm:$0xff]  ;;  %v1901_v15 = vpop.f32.mrb[48].mxu1 }
 0x163   : > { %1538 = vst [vmem:[%s2509_s15 + $0x58] sm:$0xff] %v1506_v24  ;;  %v972_v34 = vadd.f32 %v2193_v48, %v971_v49  ;;  %v1228_v53 = vadd.f32 %v2193_v48, %v1227_v18  ;;  %v2847_v46 = vmax.f32 %v2321_v28, 0.0  ;;  %v2848_v17 = vmax.f32 %v2325_v29, 0.0  ;;  %v2858_v49 = vld [vmem:[#allocation8_spill] sm:$0xff] }
 0x164   : > { %1536 = vst [vmem:[%s2509_s15 + $0x48] sm:$0xff] %v1504_v0  ;;  %v1350_v19 = vmax.f32 %v980_v52, 0.0  ;;  %v1414_v44 = vmax.f32 %v1236_v43, 0.0  ;;  %v2849_v21 = vmax.f32 %v2329_v30, 0.0  ;;  %v2850_v42 = vmax.f32 %v2333_v31, 0.0  ;;  %v984_v52 = vpop.f32.mrb[49].mxu0 }
 0x165   : > { %v1445_v37 = vmax.f32 %v2847_v46, %v1349_v51  ;;  %v1477_v45 = vmax.f32 %v2848_v17, %v1413_v2  ;;  %v1348_v61 = vmax.f32 %v972_v34, 0.0  ;;  %v1412_v39 = vmax.f32 %v1228_v53, 0.0  ;;  %v1240_v43 = vpop.f32.mrb[49].mxu1  ;;  %v1838_v53 = vpop.f32.mrb[50].mxu0 }
 0x166   : > { %v1443_v58 = vmax.f32 %v2849_v21, %v1347_v3  ;;  %v1475_v23 = vmax.f32 %v2850_v42, %v1411_v6  ;;  %v2625_v59 = vadd.f32 %v2375_v38, %v2193_v48  ;;  %v2851_v24 = vmax.f32 %v2341_v32, 0.0  ;;  %v2857_v32 = vld [vmem:[#allocation7_spill] sm:$0xff]  ;;  %v1902_v46 = vpop.f32.mrb[50].mxu1 }
 0x167   : > { %v1509_v28 = vmax.f32 %v1445_v37, %v1477_v45  ;;  %v2852_v25 = vmax.f32 %v2345_v33, 0.0  ;;  %v2633_v30 = vadd.f32 %v2377_v8, %v2193_v48  ;;  %v2854_v56 = vmax.f32 %v2853_v63, 0.0  ;;  %v1243_v21 = vpop.f32.mrb[51].mxu1 }
 0x168   : > { %v1446_v29 = vmax.f32 %v2851_v24, %v1350_v19  ;;  %v1507_v31 = vmax.f32 %v1443_v58, %v1475_v23  ;;  %v2856_v47 = vmax.f32 %v2855_v27, 0.0  ;;  %v2641_v51 = vadd.f32 %v2193_v48, %v2857_v32 }
 0x169   : > { %v1478_v20 = vmax.f32 %v2852_v25, %v1414_v44  ;;  %v1444_v0 = vmax.f32 %v2854_v56, %v1348_v61  ;;  %1541 = vst [vmem:[%s2509_s15 + $0x70] sm:$0xff] %v1509_v28  ;;  %v993_v2 = vadd.f32 %v1837_v1, %v2193_v48  ;;  %v1249_v8 = vadd.f32 %v1901_v15, %v2193_v48  ;;  %v987_v44 = vpop.f32.mrb[51].mxu0 }
 0x16a   : > { %v1476_v38 = vmax.f32 %v2856_v47, %v1412_v39  ;;  %v2648_v18 = vadd.f32 %v2193_v48, %v2858_v49  ;;  %1539 = vst [vmem:[%s2509_s15 + $0x60] sm:$0xff] %v1507_v31  ;;  %v985_v6 = vadd.f32 %v2193_v48, %v984_v52  ;;  %v1241_v34 = vadd.f32 %v2193_v48, %v1240_v43 }
 0x16b   : > { %v1510_v33 = vmax.f32 %v1446_v29, %v1478_v20  ;;  %v1353_v37 = vmax.f32 %v993_v2, 0.0  ;;  %v1417_v17 = vmax.f32 %v1249_v8, 0.0  ;;  %v996_v45 = vadd.f32 %v1838_v53, %v2193_v48  ;;  %v2865_v2 = vld [vmem:[#allocation9_spill] sm:$0xff] }
 0x16c   : > { %v1508_v3 = vmax.f32 %v1444_v0, %v1476_v38  ;;  %v1252_v19 = vadd.f32 %v1902_v46, %v2193_v48  ;;  %v1351_v58 = vmax.f32 %v985_v6, 0.0  ;;  %v1415_v42 = vmax.f32 %v1241_v34, 0.0  ;;  %v1905_v6 = vpop.f32.mrb[52].mxu1  ;;  %v2869_v34 = vld [vmem:[#allocation11_spill] sm:$0xff] }
 0x16d   : > { %1542 = vst [vmem:[%s2509_s15 + $0x78] sm:$0xff] %v1510_v33  ;;  %v988_v23 = vadd.f32 %v2193_v48, %v987_v44  ;;  %v1244_v61 = vadd.f32 %v2193_v48, %v1243_v21  ;;  %v2859_v39 = vmax.f32 %v2381_v11, 0.0  ;;  %v2860_v24 = vmax.f32 %v2385_v10, 0.0 }
 0x16e   : > { %1540 = vst [vmem:[%s2509_s15 + $0x68] sm:$0xff] %v1508_v3  ;;  %v1354_v25 = vmax.f32 %v996_v45, 0.0  ;;  %v1418_v20 = vmax.f32 %v1252_v19, 0.0  ;;  %v2861_v31 = vmax.f32 %v2389_v9, 0.0  ;;  %v2862_v56 = vmax.f32 %v2393_v16, 0.0  ;;  %v2867_v16 = vld [vmem:[#allocation10_spill] sm:$0xff] }
 0x16f   : > { %v1449_v28 = vmax.f32 %v2859_v39, %v1353_v37  ;;  %v1481_v29 = vmax.f32 %v2860_v24, %v1417_v17  ;;  %v1352_v27 = vmax.f32 %v988_v23, 0.0  ;;  %v1416_v47 = vmax.f32 %v1244_v61, 0.0  ;;  %v1841_v3 = vpop.f32.mrb[52].mxu0  ;;  %v1256_v17 = vpop.f32.mrb[53].mxu1  ;;  %v2870_v45 = vld [vmem:[#allocation12_spill] sm:$0xff] }
 0x170   : > { %v1447_v63 = vmax.f32 %v2861_v31, %v1351_v58  ;;  %v1479_v0 = vmax.f32 %v2862_v56, %v1415_v42  ;;  %v1333_v38 = vmax.f32 %v2625_v59, 0.0  ;;  %v2863_v11 = vmax.f32 %v2401_v40, 0.0  ;;  %v1000_v37 = vpop.f32.mrb[53].mxu0  ;;  %v1906_v23 = vpop.f32.mrb[54].mxu1 }
 0x171   : > { %v1513_v1 = vmax.f32 %v1449_v28, %v1481_v29  ;;  %v2864_v10 = vmax.f32 %v2405_v41, 0.0  ;;  %v1397_v33 = vmax.f32 %v2633_v30, 0.0  ;;  %v2866_v8 = vmax.f32 %v2865_v2, 0.0  ;;  %v1842_v42 = vpop.f32.mrb[54].mxu0 }
 0x172   : > { %v1450_v15 = vmax.f32 %v2863_v11, %v1354_v25  ;;  %v1511_v9 = vmax.f32 %v1447_v63, %v1479_v0  ;;  %v2868_v43 = vmax.f32 %v2867_v16, 0.0  ;;  %v2679_v40 = vadd.f32 %v2869_v34, %v2193_v48  ;;  %v1003_v29 = vpop.f32.mrb[55].mxu0  ;;  %v1259_v25 = vpop.f32.mrb[55].mxu1  ;;  %v2871_v0 = vld [vmem:[#allocation13_spill] sm:$0xff] }
 0x173   : > { %v1482_v32 = vmax.f32 %v2864_v10, %v1418_v20  ;;  %v1448_v52 = vmax.f32 %v2866_v8, %v1352_v27  ;;  %1545 = vst [vmem:[%s2509_s15 + $0x90] sm:$0xff] %v1513_v1  ;;  %v1009_v53 = vadd.f32 %v1841_v3, %v2193_v48  ;;  %v1265_v46 = vadd.f32 %v1905_v6, %v2193_v48  ;;  %v2873_v1 = vld [vmem:[#allocation14_spill] sm:$0xff] }
 0x174   : > { %v1480_v49 = vmax.f32 %v2868_v43, %v1416_v47  ;;  %v2686_v19 = vadd.f32 %v2870_v45, %v2193_v48  ;;  %1543 = vst [vmem:[%s2509_s15 + $0x80] sm:$0xff] %v1511_v9  ;;  %v1001_v21 = vadd.f32 %v2193_v48, %v1000_v37  ;;  %v1257_v58 = vadd.f32 %v2193_v48, %v1256_v17  ;;  %v2875_v9 = vld [vmem:[#allocation15_spill] sm:$0xff]  ;;  %v2881_v37 = vld [vmem:[#allocation20_spill] sm:$0xff] }
 0x175   : > { %v1514_v41 = vmax.f32 %v1450_v15, %v1482_v32  ;;  %v1357_v61 = vmax.f32 %v1009_v53, 0.0  ;;  %v1421_v39 = vmax.f32 %v1265_v46, 0.0  ;;  %v1012_v28 = vadd.f32 %v1842_v42, %v2193_v48 }
 0x176   : > { %v1512_v44 = vmax.f32 %v1448_v52, %v1480_v49  ;;  %v1268_v24 = vadd.f32 %v1906_v23, %v2193_v48  ;;  %v1355_v20 = vmax.f32 %v1001_v21, 0.0  ;;  %v1419_v31 = vmax.f32 %v1257_v58, 0.0  ;;  %v2877_v52 = vld [vmem:[#allocation16_spill] sm:$0xff]  ;;  %v2883_v58 = vld [vmem:[#allocation21_spill] sm:$0xff] }
 0x177   : > { %1546 = vst [vmem:[%s2509_s15 + $0x98] sm:$0xff] %v1514_v41  ;;  %v1004_v63 = vadd.f32 %v2193_v48, %v1003_v29  ;;  %v1260_v56 = vadd.f32 %v2193_v48, %v1259_v25  ;;  %v2872_v27 = vmax.f32 %v2871_v0, 0.0  ;;  %v2874_v11 = vmax.f32 %v2873_v1, 0.0  ;;  %v2879_v41 = vld [vmem:[#allocation19_spill] sm:$0xff]  ;;  %v1909_v29 = vpop.f32.mrb[56].mxu1  ;;  %v2887_v25 = vld [vmem:[#allocation17_spill] sm:$0xff] }
 0x178   : > { %1544 = vst [vmem:[%s2509_s15 + $0x88] sm:$0xff] %v1512_v44  ;;  %v1358_v10 = vmax.f32 %v1012_v28, 0.0  ;;  %v1422_v32 = vmax.f32 %v1268_v24, 0.0  ;;  %v2876_v2 = vmax.f32 %v2875_v9, 0.0  ;;  %v2878_v16 = vmax.f32 %v2877_v52, 0.0  ;;  %v1845_v24 = vpop.f32.mrb[56].mxu0 }
 0x179   : > { %v1453_v47 = vmax.f32 %v2872_v27, %v1357_v61  ;;  %v1485_v15 = vmax.f32 %v2874_v11, %v1421_v39  ;;  %v1356_v49 = vmax.f32 %v1004_v63, 0.0  ;;  %v1420_v3 = vmax.f32 %v1260_v56, 0.0  ;;  %v2885_v61 = vld [vmem:[#allocation22_spill] sm:$0xff]  ;;  %v1016_v0 = vpop.f32.mrb[57].mxu0  ;;  %v1272_v27 = vpop.f32.mrb[57].mxu1 }
 0x17a   : > { %v1451_v8 = vmax.f32 %v2876_v2, %v1355_v20  ;;  %v1483_v43 = vmax.f32 %v2878_v16, %v1419_v31  ;;  %v1331_v6 = vmax.f32 %v2641_v51, 0.0  ;;  %v2880_v53 = vmax.f32 %v2879_v41, 0.0  ;;  %v1910_v9 = vpop.f32.mrb[58].mxu1 }
 0x17b   : > { %v1517_v34 = vmax.f32 %v1453_v47, %v1485_v15  ;;  %v2882_v17 = vmax.f32 %v2881_v37, 0.0  ;;  %v1395_v44 = vmax.f32 %v2648_v18, 0.0  ;;  %v2884_v42 = vmax.f32 %v2883_v58, 0.0  ;;  %v2888_v47 = vld [vmem:[#allocation18_spill] sm:$0xff] }
 0x17c   : > { %v1454_v46 = vmax.f32 %v2880_v53, %v1358_v10  ;;  %v1515_v21 = vmax.f32 %v1451_v8, %v1483_v43  ;;  %v2886_v39 = vmax.f32 %v2885_v61, 0.0  ;;  %v2717_v20 = vadd.f32 %v2193_v48, %v2887_v25 }
 0x17d   : > { %v1486_v45 = vmax.f32 %v2882_v17, %v1422_v32  ;;  %v1452_v23 = vmax.f32 %v2884_v42, %v1356_v49  ;;  %1549 = vst [vmem:[%s2509_s15 + $0xb0] sm:$0xff] %v1517_v34  ;;  %v1025_v63 = vadd.f32 %v1845_v24, %v2193_v48  ;;  %v1281_v56 = vadd.f32 %v1909_v29, %v2193_v48  ;;  %v1846_v32 = vpop.f32.mrb[58].mxu0  ;;  %v1275_v49 = vpop.f32.mrb[59].mxu1 }
 0x17e   : > { %v1484_v28 = vmax.f32 %v2886_v39, %v1420_v3  ;;  %v2724_v1 = vadd.f32 %v2193_v48, %v2888_v47  ;;  %1547 = vst [vmem:[%s2509_s15 + $0xa0] sm:$0xff] %v1515_v21  ;;  %v1017_v15 = vadd.f32 %v2193_v48, %v1016_v0  ;;  %v1273_v10 = vadd.f32 %v2193_v48, %v1272_v27  ;;  %v1019_v43 = vpop.f32.mrb[59].mxu0 }
 0x17f   : > { %v1518_v31 = vmax.f32 %v1454_v46, %v1486_v45  ;;  %v1361_v2 = vmax.f32 %v1025_v63, 0.0  ;;  %v1425_v8 = vmax.f32 %v1281_v56, 0.0  ;;  %v1028_v52 = vadd.f32 %v1846_v32, %v2193_v48 }
 0x180   : > { %v1516_v11 = vmax.f32 %v1452_v23, %v1484_v28  ;;  %v1284_v16 = vadd.f32 %v1910_v9, %v2193_v48  ;;  %v1359_v3 = vmax.f32 %v1017_v15, 0.0  ;;  %v1423_v34 = vmax.f32 %v1273_v10, 0.0 }
 0x181   : > { %1550 = vst [vmem:[%s2509_s15 + $0xb8] sm:$0xff] %v1518_v31  ;;  %v1020_v41 = vadd.f32 %v2193_v48, %v1019_v43  ;;  %v1276_v53 = vadd.f32 %v2193_v48, %v1275_v49  ;;  %v1457_v46 = vmax.f32 %v1329_v50, %v1361_v2  ;;  %v1489_v37 = vmax.f32 %v1393_v14, %v1425_v8 }
 0x182   : > { %1548 = vst [vmem:[%s2509_s15 + $0xa8] sm:$0xff] %v1516_v11  ;;  %v1362_v17 = vmax.f32 %v1028_v52, 0.0  ;;  %v1426_v45 = vmax.f32 %v1284_v16, 0.0  ;;  %v1455_v21 = vmax.f32 %v1327_v55, %v1359_v3  ;;  %v1487_v58 = vmax.f32 %v1391_v13, %v1423_v34  ;;  %v1849_v55 = vpop.f32.mrb[60].mxu0  ;;  %v1913_v13 = vpop.f32.mrb[60].mxu1 }
 0x183   : > { %v1360_v42 = vmax.f32 %v1020_v41, 0.0  ;;  %v1424_v23 = vmax.f32 %v1276_v53, 0.0  ;;  %v1334_v61 = vmax.f32 %v2679_v40, 0.0  ;;  %v1521_v39 = vmax.f32 %v1457_v46, %v1489_v37 }
 0x184   : > { %v1458_v4 = vmax.f32 %v1330_v7, %v1362_v17  ;;  %v1490_v12 = vmax.f32 %v1394_v22, %v1426_v45  ;;  %v1398_v50 = vmax.f32 %v2686_v19, 0.0  ;;  %v1519_v35 = vmax.f32 %v1455_v21, %v1487_v58  ;;  %v1032_v22 = vpop.f32.mrb[61].mxu0  ;;  %v1288_v19 = vpop.f32.mrb[61].mxu1 }
 0x185   : > { %v1456_v14 = vmax.f32 %v1328_v36, %v1360_v42  ;;  %v1488_v62 = vmax.f32 %v1392_v26, %v1424_v23  ;;  %v1332_v40 = vmax.f32 %v2717_v20, 0.0  ;;  %1553 = vst [vmem:[%s2509_s15 + $0xd0] sm:$0xff] %v1521_v39  ;;  %v1041_v60 = vadd.f32 %v1849_v55, %v2193_v48  ;;  %v1850_v28 = vpop.f32.mrb[62].mxu0  ;;  %v1914_v24 = vpop.f32.mrb[62].mxu1 }
 0x186   : > { %v1522_v57 = vmax.f32 %v1458_v4, %v1490_v12  ;;  %v1297_v7 = vadd.f32 %v1913_v13, %v2193_v48  ;;  %v1396_v5 = vmax.f32 %v2724_v1, 0.0  ;;  %1551 = vst [vmem:[%s2509_s15 + $0xc0] sm:$0xff] %v1519_v35  ;;  %v1033_v54 = vadd.f32 %v2193_v48, %v1032_v22  ;;  %v1035_v63 = vpop.f32.mrb[63].mxu0  ;;  %v1291_v56 = vpop.f32.mrb[63].mxu1 }
 0x187   : > { %v1520_v36 = vmax.f32 %v1456_v14, %v1488_v62  ;;  %v1289_v26 = vadd.f32 %v2193_v48, %v1288_v19  ;;  %v1365_v29 = vmax.f32 %v1041_v60, 0.0  ;;  %v1044_v20 = vadd.f32 %v1850_v28, %v2193_v48 }
 0x188   : > { %1554 = vst [vmem:[%s2509_s15 + $0xd8] sm:$0xff] %v1522_v57  ;;  %v1429_v25 = vmax.f32 %v1297_v7, 0.0  ;;  %v1300_v31 = vadd.f32 %v1914_v24, %v2193_v48  ;;  %v1363_v0 = vmax.f32 %v1033_v54, 0.0  ;;  %v1036_v47 = vadd.f32 %v2193_v48, %v1035_v63 }
 0x189   : > { %1552 = vst [vmem:[%s2509_s15 + $0xc8] sm:$0xff] %v1520_v36  ;;  %v1427_v27 = vmax.f32 %v1289_v26, 0.0  ;;  %v1292_v1 = vadd.f32 %v2193_v48, %v1291_v56  ;;  %v1461_v11 = vmax.f32 %v1333_v38, %v1365_v29  ;;  %v1366_v10 = vmax.f32 %v1044_v20, 0.0 }
 0x18a   : > { %v1493_v15 = vmax.f32 %v1397_v33, %v1429_v25  ;;  %v1430_v32 = vmax.f32 %v1300_v31, 0.0  ;;  %v1459_v9 = vmax.f32 %v1331_v6, %v1363_v0  ;;  %v1364_v8 = vmax.f32 %v1036_v47, 0.0 }
 0x18b   : > { %v1491_v2 = vmax.f32 %v1395_v44, %v1427_v27  ;;  %v1428_v52 = vmax.f32 %v1292_v1, 0.0  ;;  %v1462_v16 = vmax.f32 %v1334_v61, %v1366_v10 }
 0x18c   : > { %v1525_v48 = vmax.f32 %v1461_v11, %v1493_v15  ;;  %v1494_v59 = vmax.f32 %v1398_v50, %v1430_v32  ;;  %v1460_v43 = vmax.f32 %v1332_v40, %v1364_v8 }
 0x18d   : > { %v1523_v38 = vmax.f32 %v1459_v9, %v1491_v2  ;;  %v1492_v30 = vmax.f32 %v1396_v5, %v1428_v52 }
 0x18e   : > { %1557 = vst [vmem:[%s2509_s15 + $0xf0] sm:$0xff] %v1525_v48  ;;  %v1526_v33 = vmax.f32 %v1462_v16, %v1494_v59 }
 0x18f   : > { %1555 = vst [vmem:[%s2509_s15 + $0xe0] sm:$0xff] %v1523_v38  ;;  %v1524_v49 = vmax.f32 %v1460_v43, %v1492_v30 }
 0x190   : > { %1558 = vst [vmem:[%s2509_s15 + $0xf8] sm:$0xff] %v1526_v33 }
 0x191   : > { %1556 = vst [vmem:[%s2509_s15 + $0xe8] sm:$0xff] %v1524_v49 }
 0x192 PF: > { %s13_s12 = sadd.s32 1, %s2017_s12  }
 0x193   : > { %p10_p5 = scmp.ge.s32.totalorder %s13_s12, 4  }
 0x195   :  { %12 = sbr.rel (!%p10_p5) target bundleno = 1 (0x1), region = 62 }

// kernel: net_forward.4
= control target key start
LH: loop header
LB: loop body
LE: loop exit
PB: predicated region body
PF: predicated region fallthrough
CT: control target
= control target key end

     0   :  { %s2983_s12 = smov 0   ;;  %s3541_s0 = inlined_call_operand.vmem [shape: bf16[512,1024], index: 0, kind: input, shape index: {}]   ;;  %s3542_s1 = inlined_call_operand.vmem [shape: bf16[1024,128], index: 1, kind: input, shape index: {}]   ;;  %s3543_s2 = inlined_call_operand.vmem [shape: f32[1,128], index: 2, kind: input, shape index: {}]   ;;  %s3544_s3 = inlined_call_operand.vmem [shape: f32[128,128], index: 3, kind: output, shape index: {}]  }
   0x1 LB: > { %s2229_s13 = sadd.s32 4294967295, %s2961_s12   ;;  %p2233_p0 = scmp.ge.s32.totalorder %s2961_s12, 1  ;;  %s2961_s12 = sphi %s2983_s12, %s13_s12  }
   0x2   : > { %p139_p1 = scmp.lt.s32.totalorder %s2961_s12, 3 }
   0x4   : > { %p140_p2 = pnand %p2233_p0, %p139_p1 }
   0x5   : > { %v2891_v0 = vld [vmem:[%s3542_s1 + $0x40] sm:$0xff] (!%p140_p2)   ;;  %v2895_v4 = vld [vmem:[%s3542_s1 + $0x48] sm:$0xff] (!%p140_p2)   ;;  %v2899_v8 = vld [vmem:[%s3542_s1 + $0x50] sm:$0xff] (!%p140_p2)   ;;  %s2234_s21 = sshll.u32 (!%p140_p2), %s2229_s13, 5 }
   0x6   : > { %143 = sbr.rel (%p140_p2) target bundleno = 515 (0x203), region = 32  ;;  %v2892_v1 = vld [vmem:[%s3542_s1 + $0xc0] sm:$0xff] (!%p140_p2)   ;;  %2435 = vmatprep.subr.bf16.mxu0 (!%p140_p2), %v2891_v0  ;;  %v2896_v5 = vld [vmem:[%s3542_s1 + $0xc8] sm:$0xff] (!%p140_p2)   ;;  %v2900_v9 = vld [vmem:[%s3542_s1 + $0xd0] sm:$0xff] (!%p140_p2)   ;;  %p165_p3 = scmp.lt.s32.totalorder (!%p140_p2), %s2234_s21, 63 }
   0x7   : > { %v2893_v2 = vld [vmem:[%s3542_s1] sm:$0xff] (!%p140_p2)   ;;  %2547 = vmatprep.subr.bf16.mxu1 (!%p140_p2), %v2892_v1  ;;  %v2897_v6 = vld [vmem:[%s3542_s1 + $0x8] sm:$0xff] (!%p140_p2)   ;;  %v2901_v10 = vld [vmem:[%s3542_s1 + $0x10] sm:$0xff] (!%p140_p2)  }
   0x8   : > { %v2894_v3 = vld [vmem:[%s3542_s1 + $0x80] sm:$0xff] (!%p140_p2)   ;;  %2436 = vmatpush3.bf16.msra.mxu0 (!%p140_p2), %v2893_v2  ;;  %v2898_v7 = vld [vmem:[%s3542_s1 + $0x88] sm:$0xff] (!%p140_p2)   ;;  %v2902_v11 = vld [vmem:[%s3542_s1 + $0x90] sm:$0xff] (!%p140_p2)  }
   0x9   : > { %2548 = vmatpush3.bf16.msra.mxu1 (!%p140_p2), %v2894_v3  ;;  %2437 = vmatprep.subr.bf16.mxu0 (!%p140_p2), %v2895_v4  ;;  %v2903_v12 = vld [vmem:[%s3542_s1 + $0x58] sm:$0xff] (!%p140_p2)   ;;  %v2907_v16 = vld [vmem:[%s3542_s1 + $0x60] sm:$0xff] (!%p140_p2)   ;;  %v2911_v20 = vld [vmem:[%s3542_s1 + $0x68] sm:$0xff] (!%p140_p2)  }
   0xa   : > { %2549 = vmatprep.subr.bf16.mxu1 (!%p140_p2), %v2896_v5  ;;  %v2904_v13 = vld [vmem:[%s3542_s1 + $0xd8] sm:$0xff] (!%p140_p2)   ;;  %v2908_v17 = vld [vmem:[%s3542_s1 + $0xe0] sm:$0xff] (!%p140_p2)   ;;  %v2912_v21 = vld [vmem:[%s3542_s1 + $0xe8] sm:$0xff] (!%p140_p2)  }
   0xb   : > { %v2905_v14 = vld [vmem:[%s3542_s1 + $0x18] sm:$0xff] (!%p140_p2)   ;;  %v2909_v18 = vld [vmem:[%s3542_s1 + $0x20] sm:$0xff] (!%p140_p2)   ;;  %v2913_v22 = vld [vmem:[%s3542_s1 + $0x28] sm:$0xff] (!%p140_p2)  }
   0xc   : > { %2438 = vmatpush3.bf16.msra.mxu0 (!%p140_p2), %v2897_v6  ;;  %v2906_v15 = vld [vmem:[%s3542_s1 + $0x98] sm:$0xff] (!%p140_p2)   ;;  %v2910_v19 = vld [vmem:[%s3542_s1 + $0xa0] sm:$0xff] (!%p140_p2)   ;;  %v2914_v23 = vld [vmem:[%s3542_s1 + $0xa8] sm:$0xff] (!%p140_p2)  }
   0xd   : > { %2550 = vmatpush3.bf16.msra.mxu1 %v2898_v7  ;;  %2439 = vmatprep.subr.bf16.mxu0 %v2899_v8  ;;  %s3546_s21 = smov (!%p165_p3, %s2234_s21), 63  ;;  %v2915_v24 = vld [vmem:[%s3542_s1 + $0x70] sm:$0xff]   ;;  %v2919_v28 = vld [vmem:[%s3542_s1 + $0x78] sm:$0xff]   ;;  %v2923_v40 = vld [vmem:[%s3542_s1 + $0x140] sm:$0xff]  }
   0xe   : > { %2551 = vmatprep.subr.bf16.mxu1 %v2900_v9  ;;  %v2916_v25 = vld [vmem:[%s3542_s1 + $0xf0] sm:$0xff]   ;;  %s2434_s19 = sshll.u32 %s3546_s21, 5  ;;  %v2920_v29 = vld [vmem:[%s3542_s1 + $0xf8] sm:$0xff]   ;;  %v2924_v41 = vld [vmem:[%s3542_s1 + $0x100] sm:$0xff]  }
   0xf   : > { %v2917_v26 = vld [vmem:[%s3542_s1 + $0x30] sm:$0xff]   ;;  %s3086_s29 = scalar_lea.vmem %s3541_s0, %s2434_s19  ;;  %v2921_v30 = vld [vmem:[%s3542_s1 + $0x38] sm:$0xff]   ;;  %v2925_v42 = vld [vmem:[%s3542_s1 + $0x1c0] sm:$0xff]  }
  0x10   : > { %2440 = vmatpush3.bf16.msra.mxu0 %v2901_v10  ;;  %v2918_v27 = vld [vmem:[%s3542_s1 + $0xb0] sm:$0xff]   ;;  %v2922_v31 = vld [vmem:[%s3542_s1 + $0xb8] sm:$0xff]   ;;  %v178_v32 = vld [vmem:[%s3086_s29] sm:$0xff] }
  0x11   : > { %2552 = vmatpush3.bf16.msra.mxu1 %v2902_v11  ;;  %2441 = vmatprep.subr.bf16.mxu0 %v2903_v12  ;;  %v182_v33 = vld [vmem:[%s3086_s29 + $0x20] sm:$0xff]  ;;  %v179_v34 = vld [vmem:[%s3086_s29 + $0x8] sm:$0xff]  ;;  %v2931_v2 = vld [vmem:[%s3542_s1 + $0x150] sm:$0xff]  }
  0x12   : > { %2553 = vmatprep.subr.bf16.mxu1 %v2904_v13  ;;  %v2240_v35 = vcombine.low %v178_v32, %v182_v33  ;;  %v2241_v36 = vcombine.high %v178_v32, %v182_v33  ;;  %v183_v37 = vld [vmem:[%s3086_s29 + $0x28] sm:$0xff]  ;;  %v2926_v43 = vld [vmem:[%s3542_s1 + $0x180] sm:$0xff]   ;;  %v2932_v4 = vld [vmem:[%s3542_s1 + $0x110] sm:$0xff]  }
  0x13   : > { %v2242_v38 = vcombine.low %v179_v34, %v183_v37  ;;  %v2243_v39 = vcombine.high %v179_v34, %v183_v37  ;;  %v186_v44 = vld [vmem:[%s3086_s29 + $0x40] sm:$0xff]  ;;  %v187_v47 = vld [vmem:[%s3086_s29 + $0x48] sm:$0xff]  ;;  %v2933_v7 = vld [vmem:[%s3542_s1 + $0x1d0] sm:$0xff]  }
  0x14   : > { %2442 = vmatpush3.bf16.msra.mxu0 %v2905_v14  ;;  %1497 = vmatprep.mubr.bf16.mxu0 %v2241_v36  ;;  %v190_v45 = vld [vmem:[%s3086_s29 + $0x60] sm:$0xff]  ;;  %v191_v48 = vld [vmem:[%s3086_s29 + $0x68] sm:$0xff]  ;;  %v2934_v9 = vld [vmem:[%s3542_s1 + $0x190] sm:$0xff]  }
  0x15   : > { %2554 = vmatpush3.bf16.msra.mxu1 %v2906_v15  ;;  %2443 = vmatprep.subr.bf16.mxu0 %v2907_v16  ;;  %v2249_v46 = vcombine.high %v186_v44, %v190_v45  ;;  %v194_v49 = vld [vmem:[%s3086_s29 + $0x80] sm:$0xff]  ;;  %v2251_v50 = vcombine.high %v187_v47, %v191_v48  ;;  %v195_v52 = vld [vmem:[%s3086_s29 + $0x88] sm:$0xff]  ;;  %v2248_v54 = vcombine.low %v186_v44, %v190_v45  ;;  %v2935_v14 = vld [vmem:[%s3542_s1 + $0x158] sm:$0xff]  }
  0x16   : > { %2555 = vmatprep.subr.bf16.mxu1 %v2908_v17  ;;  %1658 = vmatprep.mubr.bf16.mxu1 %v2243_v39  ;;  %v198_v51 = vld [vmem:[%s3086_s29 + $0xa0] sm:$0xff]  ;;  %v199_v53 = vld [vmem:[%s3086_s29 + $0xa8] sm:$0xff]  ;;  %v2250_v56 = vcombine.low %v187_v47, %v191_v48  ;;  %v2936_v15 = vld [vmem:[%s3542_s1 + $0x118] sm:$0xff]  }
  0x17   : > { %v2927_v55 = vld [vmem:[%s3542_s1 + $0x148] sm:$0xff]   ;;  %v2257_v57 = vcombine.high %v194_v49, %v198_v51  ;;  %v2259_v59 = vcombine.high %v195_v52, %v199_v53  ;;  %v202_v62 = vld [vmem:[%s3086_s29 + $0xc0] sm:$0xff]  ;;  %v2256_v3 = vcombine.low %v194_v49, %v198_v51  ;;  %v2258_v5 = vcombine.low %v195_v52, %v199_v53  ;;  %v2937_v17 = vld [vmem:[%s3542_s1 + $0x1d8] sm:$0xff]  }
  0x18   : > { %2444 = vmatpush3.bf16.msra.mxu0 %v2909_v18  ;;  %v2928_v58 = vld [vmem:[%s3542_s1 + $0x108] sm:$0xff]   ;;  %v206_v63 = vld [vmem:[%s3086_s29 + $0xe0] sm:$0xff]  ;;  %v2948_v47 = vld [vmem:[%s3542_s1 + $0x130] sm:$0xff]  }
  0x19   : > { %2556 = vmatpush3.bf16.msra.mxu1 %v2910_v19  ;;  %2445 = vmatprep.subr.bf16.mxu0 %v2911_v20  ;;  %v2929_v60 = vld [vmem:[%s3542_s1 + $0x1c8] sm:$0xff]   ;;  %v2265_v6 = vcombine.high %v202_v62, %v206_v63  ;;  %v210_v10 = vld [vmem:[%s3086_s29 + $0x100] sm:$0xff]  ;;  %v2264_v16 = vcombine.low %v202_v62, %v206_v63  ;;  %v2938_v20 = vld [vmem:[%s3542_s1 + $0x198] sm:$0xff]  }
  0x1a   : > { %2557 = vmatprep.subr.bf16.mxu1 %v2912_v21  ;;  %v2930_v61 = vld [vmem:[%s3542_s1 + $0x188] sm:$0xff]   ;;  %v214_v11 = vld [vmem:[%s3086_s29 + $0x120] sm:$0xff]  ;;  %v2949_v48 = vld [vmem:[%s3542_s1 + $0x1f0] sm:$0xff]  }
  0x1b   : > { %v203_v0 = vld [vmem:[%s3086_s29 + $0xc8] sm:$0xff]  ;;  %v2273_v19 = vcombine.high %v210_v10, %v214_v11  ;;  %v2950_v49 = vld [vmem:[%s3542_s1 + $0x1b0] sm:$0xff]   ;;  %v238_v51 = vld [vmem:[%s3086_s29 + $0x1e0] sm:$0xff] }
  0x1c   : > { %2446 = vmatpush3.bf16.msra.mxu0 %v2913_v22  ;;  %v207_v1 = vld [vmem:[%s3086_s29 + $0xe8] sm:$0xff]  ;;  %v218_v22 = vld [vmem:[%s3086_s29 + $0x140] sm:$0xff] }
  0x1d   : > { %2558 = vmatpush3.bf16.msra.mxu1 %v2914_v23  ;;  %2447 = vmatprep.subr.bf16.mxu0 %v2915_v24  ;;  %v2267_v8 = vcombine.high %v203_v0, %v207_v1  ;;  %v211_v12 = vld [vmem:[%s3086_s29 + $0x108] sm:$0xff]  ;;  %v2266_v18 = vcombine.low %v203_v0, %v207_v1  ;;  %v222_v23 = vld [vmem:[%s3086_s29 + $0x160] sm:$0xff] }
  0x1e   : > { %2559 = vmatprep.subr.bf16.mxu1 %v2916_v25  ;;  %v215_v13 = vld [vmem:[%s3086_s29 + $0x128] sm:$0xff]  ;;  %v2939_v24 = vld [vmem:[%s3542_s1 + $0x160] sm:$0xff]   ;;  %v2281_v32 = vcombine.high %v218_v22, %v222_v23 }
  0x1f   : > { %v2275_v21 = vcombine.high %v211_v12, %v215_v13  ;;  %v219_v25 = vld [vmem:[%s3086_s29 + $0x148] sm:$0xff]  ;;  %v242_v62 = vld [vmem:[%s3086_s29 + $0x200] sm:$0xff] }
  0x20   : > { %2448 = vmatpush3.bf16.msra.mxu0 %v2917_v26  ;;  %v223_v26 = vld [vmem:[%s3086_s29 + $0x168] sm:$0xff]  ;;  %v246_v63 = vld [vmem:[%s3086_s29 + $0x220] sm:$0xff] }
  0x21   : > { %2560 = vmatpush3.bf16.msra.mxu1 %v2918_v27  ;;  %2449 = vmatprep.subr.bf16.mxu0 %v2919_v28  ;;  %v2940_v27 = vld [vmem:[%s3542_s1 + $0x120] sm:$0xff]   ;;  %v2283_v33 = vcombine.high %v219_v25, %v223_v26  ;;  %v2943_v34 = vld [vmem:[%s3542_s1 + $0x168] sm:$0xff]  }
  0x22   : > { %2561 = vmatprep.subr.bf16.mxu1 %v2920_v29  ;;  %v2941_v28 = vld [vmem:[%s3542_s1 + $0x1e0] sm:$0xff]   ;;  %v2944_v36 = vld [vmem:[%s3542_s1 + $0x128] sm:$0xff]  }
  0x23   : > { %v2942_v29 = vld [vmem:[%s3542_s1 + $0x1a0] sm:$0xff]   ;;  %v2945_v37 = vld [vmem:[%s3542_s1 + $0x1e8] sm:$0xff]  }
  0x24   : > { %2450 = vmatpush3.bf16.msra.mxu0 %v2921_v30  ;;  %v2272_v30 = vcombine.low %v210_v10, %v214_v11  ;;  %v2946_v39 = vld [vmem:[%s3542_s1 + $0x1a8] sm:$0xff]   ;;  %v2304_v10 = vcombine.low %v242_v62, %v246_v63 }
  0x25   : > { %2562 = vmatpush3.bf16.msra.mxu1 %v2922_v31  ;;  %2659 = vmatprep.subr.bf16.mxu0 %v2923_v40  ;;  %v2274_v31 = vcombine.low %v211_v12, %v215_v13  ;;  %v227_v40 = vld [vmem:[%s3086_s29 + $0x188] sm:$0xff] }
  0x26   : > { %2771 = vmatprep.subr.bf16.mxu1 %v2925_v42  ;;  %v2280_v42 = vcombine.low %v218_v22, %v222_v23  ;;  %v235_v52 = vld [vmem:[%s3086_s29 + $0x1c8] sm:$0xff]  ;;  %v266_v22 = vld [vmem:[%s3086_s29 + $0x2c0] sm:$0xff] }
  0x27   : > { %1498 = vmatmul.mubr.bf16.vlgmr.msra.gmra.mrb[0].mxu0 %v2240_v35  ;;  %v226_v35 = vld [vmem:[%s3086_s29 + $0x180] sm:$0xff]  ;;  %v239_v53 = vld [vmem:[%s3086_s29 + $0x1e8] sm:$0xff] }
  0x28   : > { %1659 = vmatmul.mubr.bf16.vlgmr.msra.gmra.mrb[0].mxu1 %v2242_v38  ;;  %2660 = vmatpush3.bf16.msra.mxu0 %v2924_v41  ;;  %v230_v38 = vld [vmem:[%s3086_s29 + $0x1a0] sm:$0xff]  ;;  %v231_v41 = vld [vmem:[%s3086_s29 + $0x1a8] sm:$0xff] }
  0x29   : > { %2772 = vmatpush3.bf16.msra.mxu1 %v2926_v43  ;;  %1505 = vmatprep.mubr.bf16.mxu0 %v2249_v46  ;;  %v2282_v43 = vcombine.low %v219_v25, %v223_v26  ;;  %v2289_v44 = vcombine.high %v226_v35, %v230_v38  ;;  %v2291_v45 = vcombine.high %v227_v40, %v231_v41  ;;  %v2947_v46 = vld [vmem:[%s3542_s1 + $0x170] sm:$0xff]   ;;  %v243_v0 = vld [vmem:[%s3086_s29 + $0x208] sm:$0xff]  ;;  %v270_v23 = vld [vmem:[%s3086_s29 + $0x2e0] sm:$0xff] }
  0x2a   : > { %1666 = vmatprep.mubr.bf16.mxu1 %v2251_v50  ;;  %2661 = vmatprep.subr.bf16.mxu0 %v2927_v55  ;;  %v234_v50 = vld [vmem:[%s3086_s29 + $0x1c0] sm:$0xff]  ;;  %v2951_v55 = vld [vmem:[%s3542_s1 + $0x178] sm:$0xff]   ;;  %v247_v1 = vld [vmem:[%s3086_s29 + $0x228] sm:$0xff] }
  0x2b   : > { %2773 = vmatprep.subr.bf16.mxu1 %v2929_v60  ;;  %v2953_v60 = vld [vmem:[%s3542_s1 + $0x1f8] sm:$0xff]   ;;  %v2306_v11 = vcombine.low %v243_v0, %v247_v1  ;;  %v271_v25 = vld [vmem:[%s3086_s29 + $0x2e8] sm:$0xff] }
  0x2c   : > { %2662 = vmatpush3.bf16.msra.mxu0 %v2928_v58  ;;  %v2952_v58 = vld [vmem:[%s3542_s1 + $0x138] sm:$0xff]  }
  0x2d   : > { %2774 = vmatpush3.bf16.msra.mxu1 %v2930_v61  ;;  %2663 = vmatprep.subr.bf16.mxu0 %v2931_v2  ;;  %v2954_v61 = vld [vmem:[%s3542_s1 + $0x1b8] sm:$0xff]   ;;  %v2296_v2 = vcombine.low %v234_v50, %v238_v51 }
  0x2e   : > { %2775 = vmatprep.subr.bf16.mxu1 %v2933_v7  ;;  %v254_v7 = vld [vmem:[%s3086_s29 + $0x260] sm:$0xff] }
  0x2f   : > { %1506 = vmatmul.mubr.bf16.gmra.mrb[4].mxu0 %v2248_v54  ;;  %v2288_v54 = vcombine.low %v226_v35, %v230_v38  ;;  %v282_v38 = vld [vmem:[%s3086_s29 + $0x340] sm:$0xff] }
  0x30   : > { %1667 = vmatmul.mubr.bf16.gmra.mrb[4].mxu1 %v2250_v56  ;;  %1513 = vmatprep.mubr.bf16.mxu0 %v2257_v57  ;;  %v2290_v56 = vcombine.low %v227_v40, %v231_v41  ;;  %v2297_v57 = vcombine.high %v234_v50, %v238_v51  ;;  %v283_v40 = vld [vmem:[%s3086_s29 + $0x348] sm:$0xff] }
  0x31   : > { %1674 = vmatprep.mubr.bf16.mxu1 %v2259_v59  ;;  %2664 = vmatpush3.bf16.msra.mxu0 %v2932_v4  ;;  %v2299_v59 = vcombine.high %v235_v52, %v239_v53  ;;  %v2305_v4 = vcombine.high %v242_v62, %v246_v63  ;;  %v287_v41 = vld [vmem:[%s3086_s29 + $0x368] sm:$0xff]  ;;  %v180_v62 = vld [vmem:[%s3086_s29 + $0x10] sm:$0xff] }
  0x32   : > { %2776 = vmatpush3.bf16.msra.mxu1 %v2934_v9  ;;  %2665 = vmatprep.subr.bf16.mxu0 %v2935_v14  ;;  %v255_v9 = vld [vmem:[%s3086_s29 + $0x268] sm:$0xff]  ;;  %v258_v14 = vld [vmem:[%s3086_s29 + $0x280] sm:$0xff]  ;;  %v2346_v51 = vcombine.low %v283_v40, %v287_v41  ;;  %v184_v63 = vld [vmem:[%s3086_s29 + $0x30] sm:$0xff] }
  0x33   : > { %2777 = vmatprep.subr.bf16.mxu1 %v2937_v17  ;;  %v263_v17 = vld [vmem:[%s3086_s29 + $0x2a8] sm:$0xff] }
  0x35   : > { %2666 = vmatpush3.bf16.msra.mxu0 %v2936_v15  ;;  %v262_v15 = vld [vmem:[%s3086_s29 + $0x2a0] sm:$0xff] }
  0x36   : > { %2778 = vmatpush3.bf16.msra.mxu1 %v2938_v20  ;;  %2667 = vmatprep.subr.bf16.mxu0 %v2939_v24  ;;  %v2321_v20 = vcombine.high %v258_v14, %v262_v15  ;;  %v267_v24 = vld [vmem:[%s3086_s29 + $0x2c8] sm:$0xff]  ;;  %v2320_v26 = vcombine.low %v258_v14, %v262_v15  ;;  %v196_v14 = vld [vmem:[%s3086_s29 + $0x90] sm:$0xff] }
  0x37   : > { %1514 = vmatmul.mubr.bf16.gmra.mrb[8].mxu0 %v2256_v3  ;;  %2779 = vmatprep.subr.bf16.mxu1 %v2941_v28  ;;  %v2298_v3 = vcombine.low %v235_v52, %v239_v53  ;;  %v2329_v28 = vcombine.high %v266_v22, %v270_v23  ;;  %v2330_v35 = vcombine.low %v267_v24, %v271_v25  ;;  %v200_v15 = vld [vmem:[%s3086_s29 + $0xb0] sm:$0xff] }
  0x38   : > { %1675 = vmatmul.mubr.bf16.gmra.mrb[8].mxu1 %v2258_v5  ;;  %1521 = vmatprep.mubr.bf16.mxu0 %v2265_v6  ;;  %v2307_v5 = vcombine.high %v243_v0, %v247_v1  ;;  %v250_v6 = vld [vmem:[%s3086_s29 + $0x240] sm:$0xff]  ;;  %v181_v0 = vld [vmem:[%s3086_s29 + $0x18] sm:$0xff] }
  0x39   : > { %1682 = vmatprep.mubr.bf16.mxu1 %v2267_v8  ;;  %2668 = vmatpush3.bf16.msra.mxu0 %v2940_v27  ;;  %v251_v8 = vld [vmem:[%s3086_s29 + $0x248] sm:$0xff]  ;;  %v2313_v12 = vcombine.high %v250_v6, %v254_v7  ;;  %v185_v1 = vld [vmem:[%s3086_s29 + $0x38] sm:$0xff] }
  0x3a   : > { %2780 = vmatpush3.bf16.msra.mxu1 %v2942_v29  ;;  %2669 = vmatprep.subr.bf16.mxu0 %v2943_v34  ;;  %v2315_v13 = vcombine.high %v251_v8, %v255_v9  ;;  %v2331_v29 = vcombine.high %v267_v24, %v271_v25  ;;  %v2328_v34 = vcombine.low %v266_v22, %v270_v23  ;;  %v204_v22 = vld [vmem:[%s3086_s29 + $0xd0] sm:$0xff]  ;;  %v205_v24 = vld [vmem:[%s3086_s29 + $0xd8] sm:$0xff] }
  0x3b   : > { %2781 = vmatprep.subr.bf16.mxu1 %v2945_v37  ;;  %v208_v23 = vld [vmem:[%s3086_s29 + $0xf0] sm:$0xff]  ;;  %v209_v25 = vld [vmem:[%s3086_s29 + $0xf8] sm:$0xff] }
  0x3d   : > { %2670 = vmatpush3.bf16.msra.mxu0 %v2944_v36 }
  0x3e   : > { %2782 = vmatpush3.bf16.msra.mxu1 %v2946_v39  ;;  %2671 = vmatprep.subr.bf16.mxu0 %v2947_v46  ;;  %v286_v39 = vld [vmem:[%s3086_s29 + $0x360] sm:$0xff] }
  0x3f   : > { %1522 = vmatmul.mubr.bf16.gmra.mrb[12].mxu0 %v2264_v16  ;;  %2783 = vmatprep.subr.bf16.mxu1 %v2949_v48  ;;  %v259_v16 = vld [vmem:[%s3086_s29 + $0x288] sm:$0xff]  ;;  %v290_v46 = vld [vmem:[%s3086_s29 + $0x380] sm:$0xff]  ;;  %v2344_v50 = vcombine.low %v282_v38, %v286_v39 }
  0x40   : > { %1683 = vmatmul.mubr.bf16.gmra.mrb[12].mxu1 %v2266_v18  ;;  %1529 = vmatprep.mubr.bf16.mxu0 %v2273_v19  ;;  %v2312_v18 = vcombine.low %v250_v6, %v254_v7  ;;  %v2314_v19 = vcombine.low %v251_v8, %v255_v9  ;;  %v2322_v27 = vcombine.low %v259_v16, %v263_v17  ;;  %v291_v48 = vld [vmem:[%s3086_s29 + $0x388] sm:$0xff]  ;;  %v188_v6 = vld [vmem:[%s3086_s29 + $0x50] sm:$0xff]  ;;  %v189_v8 = vld [vmem:[%s3086_s29 + $0x58] sm:$0xff] }
  0x41   : > { %1690 = vmatprep.mubr.bf16.mxu1 %v2275_v21  ;;  %2672 = vmatpush3.bf16.msra.mxu0 %v2948_v47  ;;  %v2323_v21 = vcombine.high %v259_v16, %v263_v17  ;;  %v294_v47 = vld [vmem:[%s3086_s29 + $0x3a0] sm:$0xff]  ;;  %v192_v7 = vld [vmem:[%s3086_s29 + $0x70] sm:$0xff]  ;;  %v193_v9 = vld [vmem:[%s3086_s29 + $0x78] sm:$0xff] }
  0x42   : > { %2784 = vmatpush3.bf16.msra.mxu1 %v2950_v49  ;;  %2673 = vmatprep.subr.bf16.mxu0 %v2951_v55  ;;  %v295_v49 = vld [vmem:[%s3086_s29 + $0x3a8] sm:$0xff]  ;;  %v2353_v52 = vcombine.high %v290_v46, %v294_v47  ;;  %v302_v55 = vld [vmem:[%s3086_s29 + $0x3e0] sm:$0xff]  ;;  %v197_v16 = vld [vmem:[%s3086_s29 + $0x98] sm:$0xff] }
  0x43   : > { %2785 = vmatprep.subr.bf16.mxu1 %v2953_v60  ;;  %v2355_v53 = vcombine.high %v291_v48, %v295_v49  ;;  %v201_v17 = vld [vmem:[%s3086_s29 + $0xb8] sm:$0xff] }
  0x45   : > { %2674 = vmatpush3.bf16.msra.mxu0 %v2952_v58  ;;  %v2352_v58 = vcombine.low %v290_v46, %v294_v47  ;;  %v228_v46 = vld [vmem:[%s3086_s29 + $0x190] sm:$0xff] }
  0x46   : > { %2786 = vmatpush3.bf16.msra.mxu1 %v2954_v61  ;;  %v232_v47 = vld [vmem:[%s3086_s29 + $0x1b0] sm:$0xff] }
  0x47   : > { %1530 = vmatmul.mubr.bf16.gmra.mrb[16].mxu0 %v2272_v30  ;;  %v274_v30 = vld [vmem:[%s3086_s29 + $0x300] sm:$0xff] }
  0x48   : > { %1691 = vmatmul.mubr.bf16.gmra.mrb[16].mxu1 %v2274_v31  ;;  %1537 = vmatprep.mubr.bf16.mxu0 %v2281_v32  ;;  %v278_v31 = vld [vmem:[%s3086_s29 + $0x320] sm:$0xff]  ;;  %v275_v32 = vld [vmem:[%s3086_s29 + $0x308] sm:$0xff] }
  0x49   : > { %1698 = vmatprep.mubr.bf16.mxu1 %v2283_v33  ;;  %v279_v33 = vld [vmem:[%s3086_s29 + $0x328] sm:$0xff]  ;;  %v2337_v36 = vcombine.high %v274_v30, %v278_v31 }
  0x4a   : > { %v2339_v37 = vcombine.high %v275_v32, %v279_v33 }
  0x4f   : > { %1538 = vmatmul.mubr.bf16.gmra.mrb[20].mxu0 %v2280_v42  ;;  %v2336_v42 = vcombine.low %v274_v30, %v278_v31  ;;  %v212_v30 = vld [vmem:[%s3086_s29 + $0x110] sm:$0xff] }
  0x50   : > { %1699 = vmatmul.mubr.bf16.gmra.mrb[20].mxu1 %v2282_v43  ;;  %1545 = vmatprep.mubr.bf16.mxu0 %v2289_v44  ;;  %v2338_v43 = vcombine.low %v275_v32, %v279_v33  ;;  %v2345_v44 = vcombine.high %v282_v38, %v286_v39  ;;  %v216_v31 = vld [vmem:[%s3086_s29 + $0x130] sm:$0xff]  ;;  %v213_v32 = vld [vmem:[%s3086_s29 + $0x118] sm:$0xff] }
  0x51   : > { %1706 = vmatprep.mubr.bf16.mxu1 %v2291_v45  ;;  %v2347_v45 = vcombine.high %v283_v40, %v287_v41  ;;  %v217_v33 = vld [vmem:[%s3086_s29 + $0x138] sm:$0xff]  ;;  %v220_v38 = vld [vmem:[%s3086_s29 + $0x150] sm:$0xff] }
  0x52   : > { %v224_v39 = vld [vmem:[%s3086_s29 + $0x170] sm:$0xff]  ;;  %v221_v40 = vld [vmem:[%s3086_s29 + $0x158] sm:$0xff] }
  0x53   : > { %v225_v41 = vld [vmem:[%s3086_s29 + $0x178] sm:$0xff] }
  0x57   : > { %1546 = vmatmul.mubr.bf16.gmra.mrb[24].mxu0 %v2288_v54  ;;  %v298_v54 = vld [vmem:[%s3086_s29 + $0x3c0] sm:$0xff] }
  0x58   : > { %1707 = vmatmul.mubr.bf16.gmra.mrb[24].mxu1 %v2290_v56  ;;  %1553 = vmatprep.mubr.bf16.mxu0 %v2297_v57  ;;  %v299_v56 = vld [vmem:[%s3086_s29 + $0x3c8] sm:$0xff]  ;;  %v2361_v60 = vcombine.high %v298_v54, %v302_v55 }
  0x59   : > { %1714 = vmatprep.mubr.bf16.mxu1 %v2299_v59  ;;  %v303_v57 = vld [vmem:[%s3086_s29 + $0x3e8] sm:$0xff]  ;;  %v2354_v59 = vcombine.low %v291_v48, %v295_v49  ;;  %v229_v48 = vld [vmem:[%s3086_s29 + $0x198] sm:$0xff] }
  0x5a   : > { %v2363_v61 = vcombine.high %v299_v56, %v303_v57  ;;  %v233_v49 = vld [vmem:[%s3086_s29 + $0x1b8] sm:$0xff] }
  0x5f   : > { %1554 = vmatmul.mubr.bf16.gmra.mrb[28].mxu0 %v2296_v2  ;;  %v2360_v2 = vcombine.low %v298_v54, %v302_v55  ;;  %v236_v54 = vld [vmem:[%s3086_s29 + $0x1d0] sm:$0xff] }
  0x60   : > { %1715 = vmatmul.mubr.bf16.gmra.mrb[28].mxu1 %v2298_v3  ;;  %1561 = vmatprep.mubr.bf16.mxu0 %v2305_v4  ;;  %v2362_v3 = vcombine.low %v299_v56, %v303_v57  ;;  %v2245_v4 = vcombine.high %v180_v62, %v184_v63  ;;  %v240_v55 = vld [vmem:[%s3086_s29 + $0x1f0] sm:$0xff]  ;;  %v237_v56 = vld [vmem:[%s3086_s29 + $0x1d8] sm:$0xff] }
  0x61   : > { %1722 = vmatprep.mubr.bf16.mxu1 %v2307_v5  ;;  %v2247_v5 = vcombine.high %v181_v0, %v185_v1  ;;  %v241_v57 = vld [vmem:[%s3086_s29 + $0x1f8] sm:$0xff] }
  0x67   : > { %1562 = vmatmul.mubr.bf16.gmra.mrb[32].mxu0 %v2304_v10  ;;  %v2244_v10 = vcombine.low %v180_v62, %v184_v63  ;;  %v244_v62 = vld [vmem:[%s3086_s29 + $0x210] sm:$0xff] }
  0x68   : > { %1723 = vmatmul.mubr.bf16.gmra.mrb[32].mxu1 %v2306_v11  ;;  %1569 = vmatprep.mubr.bf16.mxu0 %v2313_v12  ;;  %v2246_v11 = vcombine.low %v181_v0, %v185_v1  ;;  %v2253_v12 = vcombine.high %v188_v6, %v192_v7  ;;  %v248_v63 = vld [vmem:[%s3086_s29 + $0x230] sm:$0xff]  ;;  %v245_v0 = vld [vmem:[%s3086_s29 + $0x218] sm:$0xff] }
  0x69   : > { %1730 = vmatprep.mubr.bf16.mxu1 %v2315_v13  ;;  %v2255_v13 = vcombine.high %v189_v8, %v193_v9  ;;  %v249_v1 = vld [vmem:[%s3086_s29 + $0x238] sm:$0xff] }
  0x6f   : > { %1570 = vmatmul.mubr.bf16.gmra.mrb[36].mxu0 %v2312_v18  ;;  %v2252_v18 = vcombine.low %v188_v6, %v192_v7  ;;  %v252_v6 = vld [vmem:[%s3086_s29 + $0x250] sm:$0xff] }
  0x70   : > { %1731 = vmatmul.mubr.bf16.gmra.mrb[36].mxu1 %v2314_v19  ;;  %1577 = vmatprep.mubr.bf16.mxu0 %v2321_v20  ;;  %v2254_v19 = vcombine.low %v189_v8, %v193_v9  ;;  %v2261_v20 = vcombine.high %v196_v14, %v200_v15  ;;  %v256_v7 = vld [vmem:[%s3086_s29 + $0x270] sm:$0xff]  ;;  %v253_v8 = vld [vmem:[%s3086_s29 + $0x258] sm:$0xff] }
  0x71   : > { %1738 = vmatprep.mubr.bf16.mxu1 %v2323_v21  ;;  %v2263_v21 = vcombine.high %v197_v16, %v201_v17  ;;  %v257_v9 = vld [vmem:[%s3086_s29 + $0x278] sm:$0xff] }
  0x77   : > { %1578 = vmatmul.mubr.bf16.gmra.mrb[40].mxu0 %v2320_v26  ;;  %v2260_v26 = vcombine.low %v196_v14, %v200_v15  ;;  %v260_v14 = vld [vmem:[%s3086_s29 + $0x290] sm:$0xff] }
  0x78   : > { %1739 = vmatmul.mubr.bf16.gmra.mrb[40].mxu1 %v2322_v27  ;;  %1585 = vmatprep.mubr.bf16.mxu0 %v2329_v28  ;;  %v2262_v27 = vcombine.low %v197_v16, %v201_v17  ;;  %v2269_v28 = vcombine.high %v204_v22, %v208_v23  ;;  %v264_v15 = vld [vmem:[%s3086_s29 + $0x2b0] sm:$0xff]  ;;  %v261_v16 = vld [vmem:[%s3086_s29 + $0x298] sm:$0xff] }
  0x79   : > { %1746 = vmatprep.mubr.bf16.mxu1 %v2331_v29  ;;  %v2271_v29 = vcombine.high %v205_v24, %v209_v25  ;;  %v265_v17 = vld [vmem:[%s3086_s29 + $0x2b8] sm:$0xff] }
  0x7f   : > { %1586 = vmatmul.mubr.bf16.gmra.mrb[44].mxu0 %v2328_v34  ;;  %v2268_v34 = vcombine.low %v204_v22, %v208_v23  ;;  %v268_v22 = vld [vmem:[%s3086_s29 + $0x2d0] sm:$0xff] }
  0x80   : > { %1747 = vmatmul.mubr.bf16.gmra.mrb[44].mxu1 %v2330_v35  ;;  %1593 = vmatprep.mubr.bf16.mxu0 %v2337_v36  ;;  %v2270_v35 = vcombine.low %v205_v24, %v209_v25  ;;  %v2277_v36 = vcombine.high %v212_v30, %v216_v31  ;;  %v272_v23 = vld [vmem:[%s3086_s29 + $0x2f0] sm:$0xff]  ;;  %v269_v24 = vld [vmem:[%s3086_s29 + $0x2d8] sm:$0xff] }
  0x81   : > { %1754 = vmatprep.mubr.bf16.mxu1 %v2339_v37  ;;  %v2279_v37 = vcombine.high %v213_v32, %v217_v33  ;;  %v273_v25 = vld [vmem:[%s3086_s29 + $0x2f8] sm:$0xff] }
  0x87   : > { %1594 = vmatmul.mubr.bf16.gmra.mrb[48].mxu0 %v2336_v42  ;;  %v2276_v42 = vcombine.low %v212_v30, %v216_v31  ;;  %v276_v30 = vld [vmem:[%s3086_s29 + $0x310] sm:$0xff] }
  0x88   : > { %1755 = vmatmul.mubr.bf16.gmra.mrb[48].mxu1 %v2338_v43  ;;  %1601 = vmatprep.mubr.bf16.mxu0 %v2345_v44  ;;  %v2278_v43 = vcombine.low %v213_v32, %v217_v33  ;;  %v2285_v44 = vcombine.high %v220_v38, %v224_v39  ;;  %v280_v31 = vld [vmem:[%s3086_s29 + $0x330] sm:$0xff]  ;;  %v277_v33 = vld [vmem:[%s3086_s29 + $0x318] sm:$0xff] }
  0x89   : > { %1762 = vmatprep.mubr.bf16.mxu1 %v2347_v45  ;;  %v2287_v45 = vcombine.high %v221_v40, %v225_v41 }
  0x8f   : > { %1602 = vmatmul.mubr.bf16.gmra.mrb[52].mxu0 %v2344_v50  ;;  %v2284_v50 = vcombine.low %v220_v38, %v224_v39  ;;  %v2332_v38 = vcombine.low %v268_v22, %v272_v23 }
  0x90   : > { %1763 = vmatmul.mubr.bf16.gmra.mrb[52].mxu1 %v2346_v51  ;;  %1609 = vmatprep.mubr.bf16.mxu0 %v2353_v52  ;;  %v2286_v51 = vcombine.low %v221_v40, %v225_v41  ;;  %v2293_v52 = vcombine.high %v228_v46, %v232_v47 }
  0x91   : > { %1770 = vmatprep.mubr.bf16.mxu1 %v2355_v53  ;;  %v2295_v53 = vcombine.high %v229_v48, %v233_v49 }
  0x97   : > { %1610 = vmatmul.mubr.bf16.gmra.mrb[56].mxu0 %v2352_v58  ;;  %v2292_v58 = vcombine.low %v228_v46, %v232_v47 }
  0x98   : > { %1771 = vmatmul.mubr.bf16.gmra.mrb[56].mxu1 %v2354_v59  ;;  %1617 = vmatprep.mubr.bf16.mxu0 %v2361_v60  ;;  %v2294_v59 = vcombine.low %v229_v48, %v233_v49  ;;  %v2301_v60 = vcombine.high %v236_v54, %v240_v55 }
  0x99   : > { %1778 = vmatprep.mubr.bf16.mxu1 %v2363_v61  ;;  %v2303_v61 = vcombine.high %v237_v56, %v241_v57 }
  0x9f   : > { %1618 = vmatmul.mubr.bf16.gmra.mrb[60].mxu0 %v2360_v2  ;;  %v2300_v2 = vcombine.low %v236_v54, %v240_v55  ;;  %v284_v54 = vld [vmem:[%s3086_s29 + $0x350] sm:$0xff] }
  0xa0   : > { %1779 = vmatmul.mubr.bf16.gmra.mrb[60].mxu1 %v2362_v3  ;;  %1819 = vmatprep.mubr.bf16.mxu0 %v2245_v4  ;;  %v2302_v3 = vcombine.low %v237_v56, %v241_v57  ;;  %v2309_v4 = vcombine.high %v244_v62, %v248_v63  ;;  %v288_v55 = vld [vmem:[%s3086_s29 + $0x370] sm:$0xff] }
  0xa1   : > { %1980 = vmatprep.mubr.bf16.mxu1 %v2247_v5  ;;  %v2311_v5 = vcombine.high %v245_v0, %v249_v1 }
  0xa7   : > { %1820 = vmatmul.mubr.bf16.vlgmr.msra.gmra.mrb[64].mxu0 %v2244_v10  ;;  %v2308_v10 = vcombine.low %v244_v62, %v248_v63  ;;  %v2340_v62 = vcombine.low %v276_v30, %v280_v31 }
  0xa8   : > { %1981 = vmatmul.mubr.bf16.vlgmr.msra.gmra.mrb[64].mxu1 %v2246_v11  ;;  %1827 = vmatprep.mubr.bf16.mxu0 %v2253_v12  ;;  %v2310_v11 = vcombine.low %v245_v0, %v249_v1  ;;  %v2317_v12 = vcombine.high %v252_v6, %v256_v7 }
  0xa9   : > { %1988 = vmatprep.mubr.bf16.mxu1 %v2255_v13  ;;  %v2319_v13 = vcombine.high %v253_v8, %v257_v9 }
  0xaf   : > { %1828 = vmatmul.mubr.bf16.gmra.mrb[68].mxu0 %v2252_v18  ;;  %v2316_v18 = vcombine.low %v252_v6, %v256_v7 }
  0xb0   : > { %1989 = vmatmul.mubr.bf16.gmra.mrb[68].mxu1 %v2254_v19  ;;  %1835 = vmatprep.mubr.bf16.mxu0 %v2261_v20  ;;  %v2318_v19 = vcombine.low %v253_v8, %v257_v9  ;;  %v2325_v20 = vcombine.high %v260_v14, %v264_v15 }
  0xb1   : > { %1996 = vmatprep.mubr.bf16.mxu1 %v2263_v21  ;;  %v2327_v21 = vcombine.high %v261_v16, %v265_v17 }
  0xb7   : > { %1836 = vmatmul.mubr.bf16.gmra.mrb[72].mxu0 %v2260_v26  ;;  %v2324_v26 = vcombine.low %v260_v14, %v264_v15  ;;  %v292_v14 = vld [vmem:[%s3086_s29 + $0x390] sm:$0xff] }
  0xb8   : > { %1997 = vmatmul.mubr.bf16.gmra.mrb[72].mxu1 %v2262_v27  ;;  %1843 = vmatprep.mubr.bf16.mxu0 %v2269_v28  ;;  %v2326_v27 = vcombine.low %v261_v16, %v265_v17  ;;  %v2333_v28 = vcombine.high %v268_v22, %v272_v23  ;;  %v296_v15 = vld [vmem:[%s3086_s29 + $0x3b0] sm:$0xff]  ;;  %v2348_v22 = vcombine.low %v284_v54, %v288_v55 }
  0xb9   : > { %2004 = vmatprep.mubr.bf16.mxu1 %v2271_v29  ;;  %v2335_v29 = vcombine.high %v269_v24, %v273_v25 }
  0xbf   : > { %1844 = vmatmul.mubr.bf16.gmra.mrb[76].mxu0 %v2268_v34  ;;  %v281_v34 = vld [vmem:[%s3086_s29 + $0x338] sm:$0xff] }
  0xc0   : > { %2005 = vmatmul.mubr.bf16.gmra.mrb[76].mxu1 %v2270_v35  ;;  %1851 = vmatprep.mubr.bf16.mxu0 %v2277_v36  ;;  %v3309_v36 = vld [vmem:[%s3543_s2] ss:$0 sm:$0xff]  ;;  %v2343_v47 = vcombine.high %v277_v33, %v281_v34 }
  0xc1   : > { %2012 = vmatprep.mubr.bf16.mxu1 %v2279_v37 }
  0xc7   : > { %1852 = vmatmul.mubr.bf16.gmra.mrb[80].mxu0 %v2276_v42  ;;  %v2334_v42 = vcombine.low %v269_v24, %v273_v25 }
  0xc8   : > { %2013 = vmatmul.mubr.bf16.gmra.mrb[80].mxu1 %v2278_v43  ;;  %1859 = vmatprep.mubr.bf16.mxu0 %v2285_v44  ;;  %v2341_v43 = vcombine.high %v276_v30, %v280_v31 }
  0xc9   : > { %2020 = vmatprep.mubr.bf16.mxu1 %v2287_v45 }
  0xcf   : > { %1860 = vmatmul.mubr.bf16.gmra.mrb[84].mxu0 %v2284_v50 }
  0xd0   : > { %2021 = vmatmul.mubr.bf16.gmra.mrb[84].mxu1 %v2286_v51  ;;  %1867 = vmatprep.mubr.bf16.mxu0 %v2293_v52 }
  0xd1   : > { %2028 = vmatprep.mubr.bf16.mxu1 %v2295_v53 }
  0xd7   : > { %1868 = vmatmul.mubr.bf16.gmra.mrb[88].mxu0 %v2292_v58  ;;  %v285_v58 = vld [vmem:[%s3086_s29 + $0x358] sm:$0xff] }
  0xd8   : > { %2029 = vmatmul.mubr.bf16.gmra.mrb[88].mxu1 %v2294_v59  ;;  %1875 = vmatprep.mubr.bf16.mxu0 %v2301_v60  ;;  %v289_v59 = vld [vmem:[%s3086_s29 + $0x378] sm:$0xff] }
  0xd9   : > { %2036 = vmatprep.mubr.bf16.mxu1 %v2303_v61  ;;  %v2351_v7 = vcombine.high %v285_v58, %v289_v59 }
  0xdf   : > { %1876 = vmatmul.mubr.bf16.gmra.mrb[92].mxu0 %v2300_v2  ;;  %v2342_v2 = vcombine.low %v277_v33, %v281_v34 }
  0xe0   : > { %2037 = vmatmul.mubr.bf16.gmra.mrb[92].mxu1 %v2302_v3  ;;  %1883 = vmatprep.mubr.bf16.mxu0 %v2309_v4  ;;  %v2349_v3 = vcombine.high %v284_v54, %v288_v55 }
  0xe1   : > { %2044 = vmatprep.mubr.bf16.mxu1 %v2311_v5 }
  0xe7   : > { %1884 = vmatmul.mubr.bf16.gmra.mrb[96].mxu0 %v2308_v10 }
  0xe8   : > { %2045 = vmatmul.mubr.bf16.gmra.mrb[96].mxu1 %v2310_v11  ;;  %1891 = vmatprep.mubr.bf16.mxu0 %v2317_v12 }
  0xe9   : > { %2052 = vmatprep.mubr.bf16.mxu1 %v2319_v13 }
  0xef   : > { %1892 = vmatmul.mubr.bf16.gmra.mrb[100].mxu0 %v2316_v18  ;;  %v293_v18 = vld [vmem:[%s3086_s29 + $0x398] sm:$0xff] }
  0xf0   : > { %2053 = vmatmul.mubr.bf16.gmra.mrb[100].mxu1 %v2318_v19  ;;  %1899 = vmatprep.mubr.bf16.mxu0 %v2325_v20  ;;  %v297_v19 = vld [vmem:[%s3086_s29 + $0x3b8] sm:$0xff] }
  0xf1   : > { %2060 = vmatprep.mubr.bf16.mxu1 %v2327_v21  ;;  %v2359_v31 = vcombine.high %v293_v18, %v297_v19 }
  0xf7   : > { %1900 = vmatmul.mubr.bf16.gmra.mrb[104].mxu0 %v2324_v26  ;;  %v2350_v26 = vcombine.low %v285_v58, %v289_v59 }
  0xf8   : > { %2061 = vmatmul.mubr.bf16.gmra.mrb[104].mxu1 %v2326_v27  ;;  %1907 = vmatprep.mubr.bf16.mxu0 %v2333_v28  ;;  %v2357_v27 = vcombine.high %v292_v14, %v296_v15 }
  0xf9   : > { %2068 = vmatprep.mubr.bf16.mxu1 %v2335_v29 }
  0xfa   : > { %v2451_v32 = vpop.f32.mrb[0].mxu0 }
  0xfb   : > { %v2563_v35 = vpop.f32.mrb[0].mxu1  ;;  %v2452_v37 = vpop.f32.mrb[1].mxu0 }
  0xfc   : > { %v2453_v39 = vadd.f32 %v2452_v37, %v2451_v32  ;;  %v2564_v40 = vpop.f32.mrb[1].mxu1  ;;  %v2454_v41 = vpop.f32.mrb[2].mxu0 }
  0xfd   : > { %v2565_v44 = vadd.f32 %v2564_v40, %v2563_v35  ;;  %v2566_v45 = vpop.f32.mrb[2].mxu1  ;;  %v2455_v46 = vpop.f32.mrb[3].mxu0  ;;  %v304_v40 = vld [vmem:[%s3086_s29 + $0x3f0] sm:$0xff] }
  0xfe   : > { %v1500_v48 = vadd.f32 %v2453_v39, %v3309_v36  ;;  %v2456_v49 = vadd.f32 %v2455_v46, %v2454_v41  ;;  %v2567_v50 = vpop.f32.mrb[3].mxu1  ;;  %v300_v39 = vld [vmem:[%s3086_s29 + $0x3d0] sm:$0xff] }
  0xff   : > { %v2568_v51 = vadd.f32 %v2567_v50, %v2566_v45  ;;  %1908 = vmatmul.mubr.bf16.gmra.mrb[108].mxu0 %v2332_v38 }
 0x100   : > { %v3312_v52 = vadd.f32 %v2565_v44, %v1500_v48  ;;  %v1503_v53 = vadd.f32 %v2456_v49, %v3309_v36  ;;  %2069 = vmatmul.mubr.bf16.gmra.mrb[108].mxu1 %v2334_v42  ;;  %1915 = vmatprep.mubr.bf16.mxu0 %v2341_v43  ;;  %v301_v43 = vld [vmem:[%s3086_s29 + $0x3d8] sm:$0xff] }
 0x101   : > { %2076 = vmatprep.mubr.bf16.mxu1 %v2343_v47  ;;  %v305_v44 = vld [vmem:[%s3086_s29 + $0x3f8] sm:$0xff]  ;;  %v2356_v47 = vcombine.low %v292_v14, %v296_v15  ;;  %s2237_s29 = sshll.u32 %s2229_s13, 3 }
 0x102   : > { %v3317_v56 = vadd.f32 %v2568_v51, %v1503_v53  ;;  %v2457_v57 = vpop.f32.mrb[4].mxu0  ;;  %v2358_v51 = vcombine.low %v293_v18, %v297_v19  ;;  %v2365_v53 = vcombine.high %v300_v39, %v304_v40  ;;  %v2367_v58 = vcombine.high %v301_v43, %v305_v44  ;;  %p172_p4 = scmp.lt.s32.totalorder %s2237_s29, 15 }
 0x103   : > { %v2569_v60 = vpop.f32.mrb[4].mxu1  ;;  %v2458_v61 = vpop.f32.mrb[5].mxu0 }
 0x104   : > { %v2459_v63 = vadd.f32 %v2458_v61, %v2457_v57  ;;  %v2570_v0 = vpop.f32.mrb[5].mxu1  ;;  %v2460_v1 = vpop.f32.mrb[6].mxu0  ;;  %s3548_s29 = smov (!%p172_p4, %s2237_s29), 15 }
 0x105   : > { %v2571_v4 = vadd.f32 %v2570_v0, %v2569_v60  ;;  %v2572_v5 = vpop.f32.mrb[6].mxu1  ;;  %v2461_v6 = vpop.f32.mrb[7].mxu0  ;;  %s2238_s13 = sshll.u32 %s3548_s29, 3 }
 0x106   : > { %v1508_v8 = vadd.f32 %v2459_v63, %v3309_v36  ;;  %v2462_v9 = vadd.f32 %v2461_v6, %v2460_v1  ;;  %v2573_v10 = vpop.f32.mrb[7].mxu1  ;;  %s3508_s21 = scalar_lea.vmem %s3544_s3, %s2238_s13 }
 0x107   : > { %v2574_v11 = vadd.f32 %v2573_v10, %v2572_v5  ;;  %1916 = vmatmul.mubr.bf16.gmra.mrb[112].mxu0 %v2340_v62  ;;  %v2364_v5 = vcombine.low %v300_v39, %v304_v40 }
 0x108   : > { %v3322_v12 = vadd.f32 %v2571_v4, %v1508_v8  ;;  %v1511_v13 = vadd.f32 %v2462_v9, %v3309_v36  ;;  %2077 = vmatmul.mubr.bf16.gmra.mrb[112].mxu1 %v2342_v2  ;;  %1923 = vmatprep.mubr.bf16.mxu0 %v2349_v3  ;;  %v2366_v9 = vcombine.low %v301_v43, %v305_v44 }
 0x109   : > { %2084 = vmatprep.mubr.bf16.mxu1 %v2351_v7 }
 0x10a   : > { %v3327_v16 = vadd.f32 %v2574_v11, %v1511_v13  ;;  %v2463_v17 = vpop.f32.mrb[8].mxu0 }
 0x10b   : > { %v2575_v20 = vpop.f32.mrb[8].mxu1  ;;  %v2464_v21 = vpop.f32.mrb[9].mxu0 }
 0x10c   : > { %v2465_v23 = vadd.f32 %v2464_v21, %v2463_v17  ;;  %v2576_v24 = vpop.f32.mrb[9].mxu1  ;;  %v2466_v25 = vpop.f32.mrb[10].mxu0 }
 0x10d   : > { %v2577_v28 = vadd.f32 %v2576_v24, %v2575_v20  ;;  %v2578_v29 = vpop.f32.mrb[10].mxu1  ;;  %v2467_v30 = vpop.f32.mrb[11].mxu0 }
 0x10e   : > { %v1516_v32 = vadd.f32 %v2465_v23, %v3309_v36  ;;  %v2468_v33 = vadd.f32 %v2467_v30, %v2466_v25  ;;  %v2579_v34 = vpop.f32.mrb[11].mxu1 }
 0x10f   : > { %v2580_v35 = vadd.f32 %v2579_v34, %v2578_v29  ;;  %1924 = vmatmul.mubr.bf16.gmra.mrb[116].mxu0 %v2348_v22 }
 0x110   : > { %v3332_v37 = vadd.f32 %v2577_v28, %v1516_v32  ;;  %v1519_v38 = vadd.f32 %v2468_v33, %v3309_v36  ;;  %2085 = vmatmul.mubr.bf16.gmra.mrb[116].mxu1 %v2350_v26  ;;  %1931 = vmatprep.mubr.bf16.mxu0 %v2357_v27 }
 0x111   : > { %2092 = vmatprep.mubr.bf16.mxu1 %v2359_v31 }
 0x112   : > { %v3337_v41 = vadd.f32 %v2580_v35, %v1519_v38  ;;  %v2469_v42 = vpop.f32.mrb[12].mxu0 }
 0x113   : > { %v2581_v45 = vpop.f32.mrb[12].mxu1  ;;  %v2470_v46 = vpop.f32.mrb[13].mxu0 }
 0x114   : > { %v2471_v48 = vadd.f32 %v2470_v46, %v2469_v42  ;;  %v2582_v49 = vpop.f32.mrb[13].mxu1  ;;  %v2472_v50 = vpop.f32.mrb[14].mxu0 }
 0x115   : > { %v2583_v54 = vadd.f32 %v2582_v49, %v2581_v45  ;;  %v2584_v55 = vpop.f32.mrb[14].mxu1  ;;  %v2473_v57 = vpop.f32.mrb[15].mxu0 }
 0x116   : > { %v1524_v59 = vadd.f32 %v2471_v48, %v3309_v36  ;;  %v2474_v60 = vadd.f32 %v2473_v57, %v2472_v50  ;;  %v2585_v61 = vpop.f32.mrb[15].mxu1 }
 0x117   : > { %v2586_v62 = vadd.f32 %v2585_v61, %v2584_v55  ;;  %1932 = vmatmul.mubr.bf16.gmra.mrb[120].mxu0 %v2356_v47 }
 0x118   : > { %v3342_v63 = vadd.f32 %v2583_v54, %v1524_v59  ;;  %v1527_v0 = vadd.f32 %v2474_v60, %v3309_v36  ;;  %2093 = vmatmul.mubr.bf16.gmra.mrb[120].mxu1 %v2358_v51  ;;  %1939 = vmatprep.mubr.bf16.mxu0 %v2365_v53 }
 0x119   : > { %2100 = vmatprep.mubr.bf16.mxu1 %v2367_v58 }
 0x11a   : > { %v3345_v1 = vadd.f32 %v2586_v62, %v1527_v0  ;;  %v2475_v2 = vpop.f32.mrb[16].mxu0 }
 0x11b   : > { %v2587_v3 = vpop.f32.mrb[16].mxu1  ;;  %v2476_v4 = vpop.f32.mrb[17].mxu0 }
 0x11c   : > { %v2477_v6 = vadd.f32 %v2476_v4, %v2475_v2  ;;  %v2588_v7 = vpop.f32.mrb[17].mxu1  ;;  %v2478_v8 = vpop.f32.mrb[18].mxu0 }
 0x11d   : > { %v2589_v10 = vadd.f32 %v2588_v7, %v2587_v3  ;;  %v2590_v11 = vpop.f32.mrb[18].mxu1  ;;  %v2479_v13 = vpop.f32.mrb[19].mxu0 }
 0x11e   : > { %v1532_v14 = vadd.f32 %v2477_v6, %v3309_v36  ;;  %v2480_v15 = vadd.f32 %v2479_v13, %v2478_v8  ;;  %v2591_v17 = vpop.f32.mrb[19].mxu1 }
 0x11f   : > { %v2592_v18 = vadd.f32 %v2591_v17, %v2590_v11  ;;  %1940 = vmatmul.mubr.bf16.gmra.mrb[124].mxu0 %v2364_v5 }
 0x120   : > { %v3348_v19 = vadd.f32 %v2589_v10, %v1532_v14  ;;  %v1535_v20 = vadd.f32 %v2480_v15, %v3309_v36  ;;  %2101 = vmatmul.mubr.bf16.gmra.mrb[124].mxu1 %v2366_v9 }
 0x122   : > { %v3351_v21 = vadd.f32 %v2592_v18, %v1535_v20  ;;  %v2481_v22 = vpop.f32.mrb[20].mxu0 }
 0x123   : > { %v2593_v23 = vpop.f32.mrb[20].mxu1  ;;  %v2482_v24 = vpop.f32.mrb[21].mxu0 }
 0x124   : > { %v2483_v25 = vadd.f32 %v2482_v24, %v2481_v22  ;;  %v2594_v26 = vpop.f32.mrb[21].mxu1  ;;  %v2484_v27 = vpop.f32.mrb[22].mxu0 }
 0x125   : > { %v2595_v28 = vadd.f32 %v2594_v26, %v2593_v23  ;;  %v2596_v29 = vpop.f32.mrb[22].mxu1  ;;  %v2485_v30 = vpop.f32.mrb[23].mxu0 }
 0x126   : > { %v1540_v31 = vadd.f32 %v2483_v25, %v3309_v36  ;;  %v2486_v32 = vadd.f32 %v2485_v30, %v2484_v27  ;;  %v2597_v33 = vpop.f32.mrb[23].mxu1 }
 0x127   : > { %v2598_v34 = vadd.f32 %v2597_v33, %v2596_v29 }
 0x128   : > { %v3354_v35 = vadd.f32 %v2595_v28, %v1540_v31  ;;  %v1543_v38 = vadd.f32 %v2486_v32, %v3309_v36 }
 0x12a   : > { %v3357_v39 = vadd.f32 %v2598_v34, %v1543_v38  ;;  %v2487_v40 = vpop.f32.mrb[24].mxu0 }
 0x12b   : > { %v2599_v42 = vpop.f32.mrb[24].mxu1  ;;  %v2488_v43 = vpop.f32.mrb[25].mxu0 }
 0x12c   : > { %v2489_v44 = vadd.f32 %v2488_v43, %v2487_v40  ;;  %v2600_v45 = vpop.f32.mrb[25].mxu1  ;;  %v2490_v46 = vpop.f32.mrb[26].mxu0 }
 0x12d   : > { %v2601_v47 = vadd.f32 %v2600_v45, %v2599_v42  ;;  %v2602_v48 = vpop.f32.mrb[26].mxu1  ;;  %v2491_v49 = vpop.f32.mrb[27].mxu0 }
 0x12e   : > { %v1548_v50 = vadd.f32 %v2489_v44, %v3309_v36  ;;  %v2492_v51 = vadd.f32 %v2491_v49, %v2490_v46  ;;  %v2603_v53 = vpop.f32.mrb[27].mxu1 }
 0x12f   : > { %v2604_v54 = vadd.f32 %v2603_v53, %v2602_v48 }
 0x130   : > { %v3360_v55 = vadd.f32 %v2601_v47, %v1548_v50  ;;  %v1551_v57 = vadd.f32 %v2492_v51, %v3309_v36 }
 0x132   : > { %v3363_v58 = vadd.f32 %v2604_v54, %v1551_v57  ;;  %v2493_v59 = vpop.f32.mrb[28].mxu0 }
 0x133   : > { %v2605_v60 = vpop.f32.mrb[28].mxu1  ;;  %v2494_v61 = vpop.f32.mrb[29].mxu0 }
 0x134   : > { %v2495_v62 = vadd.f32 %v2494_v61, %v2493_v59  ;;  %v2606_v0 = vpop.f32.mrb[29].mxu1  ;;  %v2496_v2 = vpop.f32.mrb[30].mxu0 }
 0x135   : > { %v2607_v3 = vadd.f32 %v2606_v0, %v2605_v60  ;;  %v2608_v4 = vpop.f32.mrb[30].mxu1  ;;  %v2497_v5 = vpop.f32.mrb[31].mxu0 }
 0x136   : > { %v1556_v6 = vadd.f32 %v2495_v62, %v3309_v36  ;;  %v2498_v7 = vadd.f32 %v2497_v5, %v2496_v2  ;;  %v2609_v8 = vpop.f32.mrb[31].mxu1 }
 0x137   : > { %v2610_v9 = vadd.f32 %v2609_v8, %v2608_v4 }
 0x138   : > { %v3366_v10 = vadd.f32 %v2607_v3, %v1556_v6  ;;  %v1559_v11 = vadd.f32 %v2498_v7, %v3309_v36 }
 0x13a   : > { %v3369_v13 = vadd.f32 %v2610_v9, %v1559_v11  ;;  %v2499_v14 = vpop.f32.mrb[32].mxu0 }
 0x13b   : > { %v2611_v15 = vpop.f32.mrb[32].mxu1  ;;  %v2500_v17 = vpop.f32.mrb[33].mxu0 }
 0x13c   : > { %v2501_v18 = vadd.f32 %v2500_v17, %v2499_v14  ;;  %v2612_v20 = vpop.f32.mrb[33].mxu1  ;;  %v2502_v22 = vpop.f32.mrb[34].mxu0 }
 0x13d   : > { %v2613_v23 = vadd.f32 %v2612_v20, %v2611_v15  ;;  %v2614_v24 = vpop.f32.mrb[34].mxu1  ;;  %v2503_v25 = vpop.f32.mrb[35].mxu0 }
 0x13e   : > { %v1564_v26 = vadd.f32 %v2501_v18, %v3309_v36  ;;  %v2504_v27 = vadd.f32 %v2503_v25, %v2502_v22  ;;  %v2615_v28 = vpop.f32.mrb[35].mxu1 }
 0x13f   : > { %v2616_v29 = vadd.f32 %v2615_v28, %v2614_v24 }
 0x140   : > { %v3372_v30 = vadd.f32 %v2613_v23, %v1564_v26  ;;  %v1567_v31 = vadd.f32 %v2504_v27, %v3309_v36 }
 0x142   : > { %v3375_v32 = vadd.f32 %v2616_v29, %v1567_v31  ;;  %v2505_v33 = vpop.f32.mrb[36].mxu0 }
 0x143   : > { %v2617_v34 = vpop.f32.mrb[36].mxu1  ;;  %v2506_v38 = vpop.f32.mrb[37].mxu0 }
 0x144   : > { %v2507_v40 = vadd.f32 %v2506_v38, %v2505_v33  ;;  %v2618_v42 = vpop.f32.mrb[37].mxu1  ;;  %v2508_v43 = vpop.f32.mrb[38].mxu0 }
 0x145   : > { %v2619_v44 = vadd.f32 %v2618_v42, %v2617_v34  ;;  %v2620_v45 = vpop.f32.mrb[38].mxu1  ;;  %v2509_v46 = vpop.f32.mrb[39].mxu0 }
 0x146   : > { %v1572_v47 = vadd.f32 %v2507_v40, %v3309_v36  ;;  %v2510_v48 = vadd.f32 %v2509_v46, %v2508_v43  ;;  %v2621_v49 = vpop.f32.mrb[39].mxu1 }
 0x147   : > { %v2622_v50 = vadd.f32 %v2621_v49, %v2620_v45 }
 0x148   : > { %v3378_v51 = vadd.f32 %v2619_v44, %v1572_v47  ;;  %v1575_v53 = vadd.f32 %v2510_v48, %v3309_v36 }
 0x14a   : > { %v3381_v54 = vadd.f32 %v2622_v50, %v1575_v53  ;;  %v2511_v57 = vpop.f32.mrb[40].mxu0 }
 0x14b   : > { %v2623_v59 = vpop.f32.mrb[40].mxu1  ;;  %v2512_v60 = vpop.f32.mrb[41].mxu0 }
 0x14c   : > { %v2513_v61 = vadd.f32 %v2512_v60, %v2511_v57  ;;  %v2624_v62 = vpop.f32.mrb[41].mxu1  ;;  %v2514_v0 = vpop.f32.mrb[42].mxu0 }
 0x14d   : > { %v2625_v2 = vadd.f32 %v2624_v62, %v2623_v59  ;;  %v2626_v3 = vpop.f32.mrb[42].mxu1  ;;  %v2515_v4 = vpop.f32.mrb[43].mxu0 }
 0x14e   : > { %v1580_v5 = vadd.f32 %v2513_v61, %v3309_v36  ;;  %v2516_v6 = vadd.f32 %v2515_v4, %v2514_v0  ;;  %v2627_v7 = vpop.f32.mrb[43].mxu1 }
 0x14f   : > { %v2628_v8 = vadd.f32 %v2627_v7, %v2626_v3 }
 0x150   : > { %v3384_v9 = vadd.f32 %v2625_v2, %v1580_v5  ;;  %v1583_v11 = vadd.f32 %v2516_v6, %v3309_v36 }
 0x152   : > { %v3387_v14 = vadd.f32 %v2628_v8, %v1583_v11  ;;  %v2517_v15 = vpop.f32.mrb[44].mxu0 }
 0x153   : > { %v2629_v17 = vpop.f32.mrb[44].mxu1  ;;  %v2518_v18 = vpop.f32.mrb[45].mxu0 }
 0x154   : > { %v2519_v20 = vadd.f32 %v2518_v18, %v2517_v15  ;;  %v2630_v22 = vpop.f32.mrb[45].mxu1  ;;  %v2520_v23 = vpop.f32.mrb[46].mxu0 }
 0x155   : > { %v2631_v24 = vadd.f32 %v2630_v22, %v2629_v17  ;;  %v2632_v25 = vpop.f32.mrb[46].mxu1  ;;  %v2521_v26 = vpop.f32.mrb[47].mxu0 }
 0x156   : > { %v1588_v27 = vadd.f32 %v2519_v20, %v3309_v36  ;;  %v2522_v28 = vadd.f32 %v2521_v26, %v2520_v23  ;;  %v2633_v29 = vpop.f32.mrb[47].mxu1 }
 0x157   : > { %v2634_v31 = vadd.f32 %v2633_v29, %v2632_v25 }
 0x158   : > { %v3390_v33 = vadd.f32 %v2631_v24, %v1588_v27  ;;  %v1591_v34 = vadd.f32 %v2522_v28, %v3309_v36 }
 0x15a   : > { %v3393_v38 = vadd.f32 %v2634_v31, %v1591_v34  ;;  %v2523_v40 = vpop.f32.mrb[48].mxu0 }
 0x15b   : > { %v2635_v42 = vpop.f32.mrb[48].mxu1  ;;  %v2524_v43 = vpop.f32.mrb[49].mxu0 }
 0x15c   : > { %v2525_v44 = vadd.f32 %v2524_v43, %v2523_v40  ;;  %v2636_v45 = vpop.f32.mrb[49].mxu1  ;;  %v2526_v46 = vpop.f32.mrb[50].mxu0 }
 0x15d   : > { %v2637_v47 = vadd.f32 %v2636_v45, %v2635_v42  ;;  %v2638_v48 = vpop.f32.mrb[50].mxu1  ;;  %v2527_v49 = vpop.f32.mrb[51].mxu0 }
 0x15e   : > { %v1596_v50 = vadd.f32 %v2525_v44, %v3309_v36  ;;  %v2528_v53 = vadd.f32 %v2527_v49, %v2526_v46  ;;  %v2639_v57 = vpop.f32.mrb[51].mxu1 }
 0x15f   : > { %v2640_v59 = vadd.f32 %v2639_v57, %v2638_v48 }
 0x160   : > { %v3396_v60 = vadd.f32 %v2637_v47, %v1596_v50  ;;  %v1599_v61 = vadd.f32 %v2528_v53, %v3309_v36 }
 0x162   : > { %v3399_v62 = vadd.f32 %v2640_v59, %v1599_v61  ;;  %v2529_v0 = vpop.f32.mrb[52].mxu0 }
 0x163   : > { %v2641_v2 = vpop.f32.mrb[52].mxu1  ;;  %v2530_v3 = vpop.f32.mrb[53].mxu0 }
 0x164   : > { %v2531_v4 = vadd.f32 %v2530_v3, %v2529_v0  ;;  %v2642_v5 = vpop.f32.mrb[53].mxu1  ;;  %v2532_v6 = vpop.f32.mrb[54].mxu0 }
 0x165   : > { %v2643_v7 = vadd.f32 %v2642_v5, %v2641_v2  ;;  %v2644_v8 = vpop.f32.mrb[54].mxu1  ;;  %v2533_v11 = vpop.f32.mrb[55].mxu0 }
 0x166   : > { %v1604_v15 = vadd.f32 %v2531_v4, %v3309_v36  ;;  %v2534_v17 = vadd.f32 %v2533_v11, %v2532_v6  ;;  %v2645_v18 = vpop.f32.mrb[55].mxu1 }
 0x167   : > { %v2646_v20 = vadd.f32 %v2645_v18, %v2644_v8 }
 0x168   : > { %v3402_v22 = vadd.f32 %v2643_v7, %v1604_v15  ;;  %v1607_v23 = vadd.f32 %v2534_v17, %v3309_v36 }
 0x16a   : > { %v3405_v24 = vadd.f32 %v2646_v20, %v1607_v23  ;;  %v2535_v25 = vpop.f32.mrb[56].mxu0 }
 0x16b   : > { %v2647_v26 = vpop.f32.mrb[56].mxu1  ;;  %v2536_v27 = vpop.f32.mrb[57].mxu0 }
 0x16c   : > { %v2537_v28 = vadd.f32 %v2536_v27, %v2535_v25  ;;  %v2648_v29 = vpop.f32.mrb[57].mxu1  ;;  %v2538_v31 = vpop.f32.mrb[58].mxu0 }
 0x16d   : > { %v2649_v34 = vadd.f32 %v2648_v29, %v2647_v26  ;;  %v2650_v40 = vpop.f32.mrb[58].mxu1  ;;  %v2539_v42 = vpop.f32.mrb[59].mxu0 }
 0x16e   : > { %v1612_v43 = vadd.f32 %v2537_v28, %v3309_v36  ;;  %v2540_v44 = vadd.f32 %v2539_v42, %v2538_v31  ;;  %v2651_v45 = vpop.f32.mrb[59].mxu1 }
 0x16f   : > { %v2652_v46 = vadd.f32 %v2651_v45, %v2650_v40 }
 0x170   : > { %v3408_v47 = vadd.f32 %v2649_v34, %v1612_v43  ;;  %v1615_v48 = vadd.f32 %v2540_v44, %v3309_v36 }
 0x172   : > { %v3411_v49 = vadd.f32 %v2652_v46, %v1615_v48  ;;  %v2541_v50 = vpop.f32.mrb[60].mxu0 }
 0x173   : > { %v2653_v53 = vpop.f32.mrb[60].mxu1  ;;  %v2542_v57 = vpop.f32.mrb[61].mxu0 }
 0x174   : > { %v2543_v59 = vadd.f32 %v2542_v57, %v2541_v50  ;;  %v2654_v61 = vpop.f32.mrb[61].mxu1  ;;  %v2544_v0 = vpop.f32.mrb[62].mxu0 }
 0x175   : > { %v2655_v2 = vadd.f32 %v2654_v61, %v2653_v53  ;;  %v2656_v3 = vpop.f32.mrb[62].mxu1  ;;  %v2545_v4 = vpop.f32.mrb[63].mxu0 }
 0x176   : > { %v1620_v5 = vadd.f32 %v2543_v59, %v3309_v36  ;;  %v2546_v6 = vadd.f32 %v2545_v4, %v2544_v0  ;;  %v2657_v7 = vpop.f32.mrb[63].mxu1 }
 0x177   : > { %v2658_v8 = vadd.f32 %v2657_v7, %v2656_v3 }
 0x178   : > { %v3414_v11 = vadd.f32 %v2655_v2, %v1620_v5  ;;  %v1623_v15 = vadd.f32 %v2546_v6, %v3309_v36 }
 0x17a   : > { %v3417_v17 = vadd.f32 %v2658_v8, %v1623_v15  ;;  %v2675_v18 = vpop.f32.mrb[64].mxu0 }
 0x17b   : > { %v2787_v20 = vpop.f32.mrb[64].mxu1  ;;  %v2676_v23 = vpop.f32.mrb[65].mxu0 }
 0x17c   : > { %v2677_v25 = vadd.f32 %v2676_v23, %v2675_v18  ;;  %v2788_v26 = vpop.f32.mrb[65].mxu1  ;;  %v2678_v27 = vpop.f32.mrb[66].mxu0 }
 0x17d   : > { %v2789_v28 = vadd.f32 %v2788_v26, %v2787_v20  ;;  %v2790_v29 = vpop.f32.mrb[66].mxu1  ;;  %v2679_v31 = vpop.f32.mrb[67].mxu0 }
 0x17e   : > { %v1822_v34 = vadd.f32 %v2677_v25, %v3312_v52  ;;  %v2680_v40 = vadd.f32 %v2679_v31, %v2678_v27  ;;  %v2791_v42 = vpop.f32.mrb[67].mxu1 }
 0x17f   : > { %v2792_v43 = vadd.f32 %v2791_v42, %v2790_v29 }
 0x180   : > { %v3420_v44 = vadd.f32 %v2789_v28, %v1822_v34  ;;  %v1825_v36 = vadd.f32 %v2680_v40, %v3317_v56 }
 0x182   : > { %v3423_v45 = vadd.f32 %v2792_v43, %v1825_v36  ;;  %v2681_v46 = vpop.f32.mrb[68].mxu0 }
 0x183   : > { %v2793_v48 = vpop.f32.mrb[68].mxu1  ;;  %v2682_v50 = vpop.f32.mrb[69].mxu0 }
 0x184   : > { %v2683_v53 = vadd.f32 %v2682_v50, %v2681_v46  ;;  %v2794_v57 = vpop.f32.mrb[69].mxu1  ;;  %v2684_v59 = vpop.f32.mrb[70].mxu0 }
 0x185   : > { %v2795_v61 = vadd.f32 %v2794_v57, %v2793_v48  ;;  %v2796_v0 = vpop.f32.mrb[70].mxu1  ;;  %v2685_v2 = vpop.f32.mrb[71].mxu0 }
 0x186   : > { %v1830_v52 = vadd.f32 %v2683_v53, %v3322_v12  ;;  %v2686_v3 = vadd.f32 %v2685_v2, %v2684_v59  ;;  %v2797_v4 = vpop.f32.mrb[71].mxu1 }
 0x187   : > { %v2798_v5 = vadd.f32 %v2797_v4, %v2796_v0 }
 0x188   : > { %v3426_v6 = vadd.f32 %v2795_v61, %v1830_v52  ;;  %v1833_v56 = vadd.f32 %v2686_v3, %v3327_v16 }
 0x18a   : > { %v3429_v7 = vadd.f32 %v2798_v5, %v1833_v56  ;;  %v2687_v8 = vpop.f32.mrb[72].mxu0 }
 0x18b   : > { %v2799_v15 = vpop.f32.mrb[72].mxu1  ;;  %v2688_v18 = vpop.f32.mrb[73].mxu0 }
 0x18c   : > { %v2689_v20 = vadd.f32 %v2688_v18, %v2687_v8  ;;  %v2800_v23 = vpop.f32.mrb[73].mxu1  ;;  %v2690_v25 = vpop.f32.mrb[74].mxu0 }
 0x18d   : > { %v2801_v26 = vadd.f32 %v2800_v23, %v2799_v15  ;;  %v2802_v27 = vpop.f32.mrb[74].mxu1  ;;  %v2691_v28 = vpop.f32.mrb[75].mxu0 }
 0x18e   : > { %v1838_v12 = vadd.f32 %v2689_v20, %v3332_v37  ;;  %v2692_v29 = vadd.f32 %v2691_v28, %v2690_v25  ;;  %v2803_v31 = vpop.f32.mrb[75].mxu1 }
 0x18f   : > { %v2804_v34 = vadd.f32 %v2803_v31, %v2802_v27 }
 0x190   : > { %v3432_v40 = vadd.f32 %v2801_v26, %v1838_v12  ;;  %v1841_v16 = vadd.f32 %v2692_v29, %v3337_v41 }
 0x192   : > { %v3435_v42 = vadd.f32 %v2804_v34, %v1841_v16  ;;  %v2693_v43 = vpop.f32.mrb[76].mxu0 }
 0x193   : > { %v2805_v36 = vpop.f32.mrb[76].mxu1  ;;  %v2694_v46 = vpop.f32.mrb[77].mxu0 }
 0x194   : > { %v2695_v48 = vadd.f32 %v2694_v46, %v2693_v43  ;;  %v2806_v50 = vpop.f32.mrb[77].mxu1  ;;  %v2696_v53 = vpop.f32.mrb[78].mxu0 }
 0x195   : > { %v2807_v57 = vadd.f32 %v2806_v50, %v2805_v36  ;;  %v2808_v59 = vpop.f32.mrb[78].mxu1  ;;  %v2697_v61 = vpop.f32.mrb[79].mxu0 }
 0x196   : > { %v1846_v37 = vadd.f32 %v2695_v48, %v3342_v63  ;;  %v2698_v0 = vadd.f32 %v2697_v61, %v2696_v53  ;;  %v2809_v2 = vpop.f32.mrb[79].mxu1  ;;  %v2110_v48 = vmax.f32 %v3423_v45, 0.0  ;;  %v2111_v45 = vmax.f32 %v3426_v6, 0.0 }
 0x197   : > { %v2810_v52 = vadd.f32 %v2809_v2, %v2808_v59 }
 0x198   : > { %v3438_v3 = vadd.f32 %v2807_v57, %v1846_v37  ;;  %v1849_v41 = vadd.f32 %v2698_v0, %v3345_v1  ;;  %v2109_v1 = vmax.f32 %v3420_v44, 0.0 }
 0x19a   : > { %v3441_v4 = vadd.f32 %v2810_v52, %v1849_v41  ;;  %v2699_v5 = vpop.f32.mrb[80].mxu0 }
 0x19b   : > { %v2811_v56 = vpop.f32.mrb[80].mxu1  ;;  %v2700_v8 = vpop.f32.mrb[81].mxu0 }
 0x19c   : > { %v2701_v15 = vadd.f32 %v2700_v8, %v2699_v5  ;;  %v2812_v18 = vpop.f32.mrb[81].mxu1  ;;  %v2702_v20 = vpop.f32.mrb[82].mxu0 }
 0x19d   : > { %v2813_v23 = vadd.f32 %v2812_v18, %v2811_v56  ;;  %v2814_v25 = vpop.f32.mrb[82].mxu1  ;;  %v2703_v26 = vpop.f32.mrb[83].mxu0 }
 0x19e   : > { %v1854_v63 = vadd.f32 %v2701_v15, %v3348_v19  ;;  %v2704_v27 = vadd.f32 %v2703_v26, %v2702_v20  ;;  %v2815_v28 = vpop.f32.mrb[83].mxu1 }
 0x19f   : > { %v2816_v12 = vadd.f32 %v2815_v28, %v2814_v25  ;;  %v2112_v25 = vmax.f32 %v3429_v7, 0.0  ;;  %v2113_v7 = vmax.f32 %v3432_v40, 0.0 }
 0x1a0   : > { %v2015_v29 = vadd.f32 %v2813_v23, %v1854_v63  ;;  %v1857_v31 = vadd.f32 %v2704_v27, %v3351_v21 }
 0x1a2   : > { %v2117_v34 = vmax.f32 %v2015_v29, 0.0  ;;  %v2018_v16 = vadd.f32 %v2816_v12, %v1857_v31  ;;  %v2705_v43 = vpop.f32.mrb[84].mxu0 }
 0x1a3   : > { %v2817_v36 = vpop.f32.mrb[84].mxu1  ;;  %v2706_v46 = vpop.f32.mrb[85].mxu0 }
 0x1a4   : > { %v3447_v50 = vmax.f32 %v2109_v1, %v2117_v34  ;;  %v2118_v53 = vmax.f32 %v2018_v16, 0.0  ;;  %v2707_v57 = vadd.f32 %v2706_v46, %v2705_v43  ;;  %v2818_v19 = vpop.f32.mrb[85].mxu1  ;;  %v2708_v59 = vpop.f32.mrb[86].mxu0 }
 0x1a5   : > { %v2819_v61 = vadd.f32 %v2818_v19, %v2817_v36  ;;  %v2820_v37 = vpop.f32.mrb[86].mxu1  ;;  %v2709_v0 = vpop.f32.mrb[87].mxu0 }
 0x1a6   : > { %v3449_v2 = vmax.f32 %v2110_v48, %v2118_v53  ;;  %v1862_v21 = vadd.f32 %v2707_v57, %v3354_v35  ;;  %v2710_v44 = vadd.f32 %v2709_v0, %v2708_v59  ;;  %v2821_v52 = vpop.f32.mrb[87].mxu1  ;;  %v2114_v59 = vmax.f32 %v3435_v42, 0.0 }
 0x1a7   : > { %v2822_v41 = vadd.f32 %v2821_v52, %v2820_v37  ;;  %v2115_v42 = vmax.f32 %v3438_v3, 0.0 }
 0x1a8   : > { %v2023_v5 = vadd.f32 %v2819_v61, %v1862_v21  ;;  %v1865_v56 = vadd.f32 %v2710_v44, %v3357_v39 }
 0x1aa   : > { %v2119_v8 = vmax.f32 %v2023_v5, 0.0  ;;  %v2026_v15 = vadd.f32 %v2822_v41, %v1865_v56  ;;  %v2711_v18 = vpop.f32.mrb[88].mxu0 }
 0x1ab   : > { %v2823_v20 = vpop.f32.mrb[88].mxu1  ;;  %v2712_v23 = vpop.f32.mrb[89].mxu0 }
 0x1ac   : > { %v3455_v26 = vmax.f32 %v2111_v45, %v2119_v8  ;;  %v2120_v63 = vmax.f32 %v2026_v15, 0.0  ;;  %v2713_v27 = vadd.f32 %v2712_v23, %v2711_v18  ;;  %v2824_v35 = vpop.f32.mrb[89].mxu1  ;;  %v2714_v28 = vpop.f32.mrb[90].mxu0 }
 0x1ad   : > { %v2825_v12 = vadd.f32 %v2824_v35, %v2823_v20  ;;  %v2826_v29 = vpop.f32.mrb[90].mxu1  ;;  %v2715_v31 = vpop.f32.mrb[91].mxu0 }
 0x1ae   : > { %v3457_v1 = vmax.f32 %v2112_v25, %v2120_v63  ;;  %v1870_v39 = vadd.f32 %v2713_v27, %v3360_v55  ;;  %v2716_v6 = vadd.f32 %v2715_v31, %v2714_v28  ;;  %v2827_v34 = vpop.f32.mrb[91].mxu1  ;;  %v2116_v27 = vmax.f32 %v3441_v4, 0.0 }
 0x1af   : > { %v2828_v16 = vadd.f32 %v2827_v34, %v2826_v29 }
 0x1b0   : > { %v2031_v43 = vadd.f32 %v2825_v12, %v1870_v39  ;;  %v1873_v36 = vadd.f32 %v2716_v6, %v3363_v58 }
 0x1b2   : > { %v2121_v46 = vmax.f32 %v2031_v43, 0.0  ;;  %v2034_v48 = vadd.f32 %v2828_v16, %v1873_v36  ;;  %v2717_v53 = vpop.f32.mrb[92].mxu0 }
 0x1b3   : > { %v2829_v57 = vpop.f32.mrb[92].mxu1  ;;  %v2718_v19 = vpop.f32.mrb[93].mxu0 }
 0x1b4   : > { %v3463_v61 = vmax.f32 %v2113_v7, %v2121_v46  ;;  %v2122_v37 = vmax.f32 %v2034_v48, 0.0  ;;  %v2719_v0 = vadd.f32 %v2718_v19, %v2717_v53  ;;  %v2830_v55 = vpop.f32.mrb[93].mxu1  ;;  %v2720_v21 = vpop.f32.mrb[94].mxu0 }
 0x1b5   : > { %v2831_v44 = vadd.f32 %v2830_v55, %v2829_v57  ;;  %v2832_v52 = vpop.f32.mrb[94].mxu1  ;;  %v2721_v41 = vpop.f32.mrb[95].mxu0 }
 0x1b6   : > { %v3465_v5 = vmax.f32 %v2114_v59, %v2122_v37  ;;  %v1878_v58 = vadd.f32 %v2719_v0, %v3366_v10  ;;  %v2722_v40 = vadd.f32 %v2721_v41, %v2720_v21  ;;  %v2833_v56 = vpop.f32.mrb[95].mxu1 }
 0x1b7   : > { %v2834_v45 = vadd.f32 %v2833_v56, %v2832_v52 }
 0x1b8   : > { %v2039_v8 = vadd.f32 %v2831_v44, %v1878_v58  ;;  %v1881_v15 = vadd.f32 %v2722_v40, %v3369_v13 }
 0x1ba   : > { %v2123_v18 = vmax.f32 %v2039_v8, 0.0  ;;  %v2042_v20 = vadd.f32 %v2834_v45, %v1881_v15  ;;  %v2723_v23 = vpop.f32.mrb[96].mxu0 }
 0x1bb   : > { %v2835_v25 = vpop.f32.mrb[96].mxu1  ;;  %v2724_v63 = vpop.f32.mrb[97].mxu0 }
 0x1bc   : > { %v3471_v35 = vmax.f32 %v2115_v42, %v2123_v18  ;;  %v2124_v28 = vmax.f32 %v2042_v20, 0.0  ;;  %v2725_v12 = vadd.f32 %v2724_v63, %v2723_v23  ;;  %v2836_v10 = vpop.f32.mrb[97].mxu1  ;;  %v2726_v29 = vpop.f32.mrb[98].mxu0 }
 0x1bd   : > { %v2837_v31 = vadd.f32 %v2836_v10, %v2835_v25  ;;  %v2838_v39 = vpop.f32.mrb[98].mxu1  ;;  %v2727_v6 = vpop.f32.mrb[99].mxu0 }
 0x1be   : > { %v3473_v34 = vmax.f32 %v2116_v27, %v2124_v28  ;;  %v1886_v13 = vadd.f32 %v2725_v12, %v3372_v30  ;;  %v2728_v3 = vadd.f32 %v2727_v6, %v2726_v29  ;;  %v2839_v16 = vpop.f32.mrb[99].mxu1 }
 0x1bf   : > { %v2840_v43 = vadd.f32 %v2839_v16, %v2838_v39 }
 0x1c0   : > { %v3476_v36 = vadd.f32 %v2837_v31, %v1886_v13  ;;  %v1889_v4 = vadd.f32 %v2728_v3, %v3375_v32 }
 0x1c2   : > { %v3479_v7 = vadd.f32 %v2840_v43, %v1889_v4  ;;  %v2729_v46 = vpop.f32.mrb[100].mxu0 }
 0x1c3   : > { %v2841_v48 = vpop.f32.mrb[100].mxu1  ;;  %v2730_v53 = vpop.f32.mrb[101].mxu0 }
 0x1c4   : > { %v2731_v57 = vadd.f32 %v2730_v53, %v2729_v46  ;;  %v2842_v19 = vpop.f32.mrb[101].mxu1  ;;  %v2732_v59 = vpop.f32.mrb[102].mxu0 }
 0x1c5   : > { %v2843_v37 = vadd.f32 %v2842_v19, %v2841_v48  ;;  %v2844_v0 = vpop.f32.mrb[102].mxu1  ;;  %v2733_v55 = vpop.f32.mrb[103].mxu0 }
 0x1c6   : > { %v1894_v30 = vadd.f32 %v2731_v57, %v3378_v51  ;;  %v2734_v21 = vadd.f32 %v2733_v55, %v2732_v59  ;;  %v2845_v44 = vpop.f32.mrb[103].mxu1 }
 0x1c7   : > { %v2846_v52 = vadd.f32 %v2845_v44, %v2844_v0 }
 0x1c8   : > { %v3482_v41 = vadd.f32 %v2843_v37, %v1894_v30  ;;  %v1897_v32 = vadd.f32 %v2734_v21, %v3381_v54 }
 0x1ca   : > { %v3485_v58 = vadd.f32 %v2846_v52, %v1897_v32  ;;  %v2735_v40 = vpop.f32.mrb[104].mxu0 }
 0x1cb   : > { %v2847_v56 = vpop.f32.mrb[104].mxu1  ;;  %v2736_v45 = vpop.f32.mrb[105].mxu0 }
 0x1cc   : > { %v2737_v8 = vadd.f32 %v2736_v45, %v2735_v40  ;;  %v2848_v15 = vpop.f32.mrb[105].mxu1  ;;  %v2738_v42 = vpop.f32.mrb[106].mxu0 }
 0x1cd   : > { %v2849_v18 = vadd.f32 %v2848_v15, %v2847_v56  ;;  %v2850_v20 = vpop.f32.mrb[106].mxu1  ;;  %v2739_v23 = vpop.f32.mrb[107].mxu0 }
 0x1ce   : > { %v1902_v51 = vadd.f32 %v2737_v8, %v3384_v9  ;;  %v2740_v25 = vadd.f32 %v2739_v23, %v2738_v42  ;;  %v2851_v63 = vpop.f32.mrb[107].mxu1  ;;  %v2125_v8 = vmax.f32 %v3476_v36, 0.0 }
 0x1cf   : > { %v2852_v27 = vadd.f32 %v2851_v63, %v2850_v20 }
 0x1d0   : > { %v3488_v28 = vadd.f32 %v2849_v18, %v1902_v51  ;;  %v1905_v54 = vadd.f32 %v2740_v25, %v3387_v14  ;;  %v2126_v51 = vmax.f32 %v3479_v7, 0.0 }
 0x1d2   : > { %v3491_v12 = vadd.f32 %v2852_v27, %v1905_v54  ;;  %v2741_v10 = vpop.f32.mrb[108].mxu0 }
 0x1d3   : > { %v2853_v29 = vpop.f32.mrb[108].mxu1  ;;  %v2742_v31 = vpop.f32.mrb[109].mxu0 }
 0x1d4   : > { %v2743_v39 = vadd.f32 %v2742_v31, %v2741_v10  ;;  %v2854_v6 = vpop.f32.mrb[109].mxu1  ;;  %v2744_v13 = vpop.f32.mrb[110].mxu0 }
 0x1d5   : > { %v2855_v3 = vadd.f32 %v2854_v6, %v2853_v29  ;;  %v2856_v16 = vpop.f32.mrb[110].mxu1  ;;  %v2745_v43 = vpop.f32.mrb[111].mxu0 }
 0x1d6   : > { %v1910_v9 = vadd.f32 %v2743_v39, %v3390_v33  ;;  %v2746_v4 = vadd.f32 %v2745_v43, %v2744_v13  ;;  %v2857_v46 = vpop.f32.mrb[111].mxu1 }
 0x1d7   : > { %v2858_v48 = vadd.f32 %v2857_v46, %v2856_v16 }
 0x1d8   : > { %v3496_v53 = vadd.f32 %v2855_v3, %v1910_v9  ;;  %v1913_v14 = vadd.f32 %v2746_v4, %v3393_v38  ;;  %v2127_v9 = vmax.f32 %v3482_v41, 0.0 }
 0x1da   : > { %v3499_v57 = vadd.f32 %v2858_v48, %v1913_v14  ;;  %v2747_v19 = vpop.f32.mrb[112].mxu0 }
 0x1db   : > { %v2859_v59 = vpop.f32.mrb[112].mxu1  ;;  %v2748_v37 = vpop.f32.mrb[113].mxu0 }
 0x1dc   : > { %v2749_v0 = vadd.f32 %v2748_v37, %v2747_v19  ;;  %v2860_v55 = vpop.f32.mrb[113].mxu1  ;;  %v2750_v30 = vpop.f32.mrb[114].mxu0 }
 0x1dd   : > { %v2861_v21 = vadd.f32 %v2860_v55, %v2859_v59  ;;  %v2862_v33 = vpop.f32.mrb[114].mxu1  ;;  %v2751_v44 = vpop.f32.mrb[115].mxu0 }
 0x1de   : > { %v1918_v52 = vadd.f32 %v2749_v0, %v3396_v60  ;;  %v2752_v32 = vadd.f32 %v2751_v44, %v2750_v30  ;;  %v2863_v40 = vpop.f32.mrb[115].mxu1 }
 0x1df   : > { %v2864_v56 = vadd.f32 %v2863_v40, %v2862_v33 }
 0x1e0   : > { %v2079_v45 = vadd.f32 %v2861_v21, %v1918_v52  ;;  %v1921_v38 = vadd.f32 %v2752_v32, %v3399_v62 }
 0x1e2   : > { %v2133_v15 = vmax.f32 %v2079_v45, 0.0  ;;  %v2082_v42 = vadd.f32 %v2864_v56, %v1921_v38  ;;  %v2753_v18 = vpop.f32.mrb[116].mxu0  ;;  %v2129_v45 = vmax.f32 %v3488_v28, 0.0 }
 0x1e3   : > { %v2865_v20 = vpop.f32.mrb[116].mxu1  ;;  %v2754_v23 = vpop.f32.mrb[117].mxu0 }
 0x1e4   : > { %v2149_v25 = vmax.f32 %v2125_v8, %v2133_v15  ;;  %v2134_v63 = vmax.f32 %v2082_v42, 0.0  ;;  %v2755_v60 = vadd.f32 %v2754_v23, %v2753_v18  ;;  %v2866_v27 = vpop.f32.mrb[117].mxu1  ;;  %v2756_v54 = vpop.f32.mrb[118].mxu0 }
 0x1e5   : > { %v2867_v62 = vadd.f32 %v2866_v27, %v2865_v20  ;;  %v2868_v36 = vpop.f32.mrb[118].mxu1  ;;  %v2757_v10 = vpop.f32.mrb[119].mxu0 }
 0x1e6   : > { %v2157_v29 = vmax.f32 %v3447_v50, %v2149_v25  ;;  %v2150_v31 = vmax.f32 %v2126_v51, %v2134_v63  ;;  %v1926_v7 = vadd.f32 %v2755_v60, %v3402_v22  ;;  %v2758_v39 = vadd.f32 %v2757_v10, %v2756_v54  ;;  %v2869_v6 = vpop.f32.mrb[119].mxu1 }
 0x1e7   : > { %v2870_v13 = vadd.f32 %v2869_v6, %v2868_v36  ;;  %v2128_v22 = vmax.f32 %v3485_v58, 0.0 }
 0x1e8   : > { %2165 = vst [vmem:[%s3508_s21] sm:$0xff] %v2157_v29  ;;  %v2158_v3 = vmax.f32 %v3449_v2, %v2150_v31  ;;  %v2087_v16 = vadd.f32 %v2867_v62, %v1926_v7  ;;  %v1929_v43 = vadd.f32 %v2758_v39, %v3405_v24  ;;  %v2131_v31 = vmax.f32 %v3496_v53, 0.0 }
 0x1ea   : > { %2166 = vst [vmem:[%s3508_s21 + $0x8] sm:$0xff] %v2158_v3  ;;  %v2135_v4 = vmax.f32 %v2087_v16, 0.0  ;;  %v2090_v46 = vadd.f32 %v2870_v13, %v1929_v43  ;;  %v2759_v48 = vpop.f32.mrb[120].mxu0 }
 0x1eb   : > { %v2871_v14 = vpop.f32.mrb[120].mxu1  ;;  %v2760_v50 = vpop.f32.mrb[121].mxu0 }
 0x1ec   : > { %v2151_v19 = vmax.f32 %v2127_v9, %v2135_v4  ;;  %v2136_v59 = vmax.f32 %v2090_v46, 0.0  ;;  %v2761_v37 = vadd.f32 %v2760_v50, %v2759_v48  ;;  %v2872_v0 = vpop.f32.mrb[121].mxu1  ;;  %v2762_v2 = vpop.f32.mrb[122].mxu0 }
 0x1ed   : > { %v2873_v55 = vadd.f32 %v2872_v0, %v2871_v14  ;;  %v2874_v30 = vpop.f32.mrb[122].mxu1  ;;  %v2763_v24 = vpop.f32.mrb[123].mxu0 }
 0x1ee   : > { %v2159_v41 = vmax.f32 %v3455_v26, %v2151_v19  ;;  %v2152_v21 = vmax.f32 %v2128_v22, %v2136_v59  ;;  %v1934_v33 = vadd.f32 %v2761_v37, %v3408_v47  ;;  %v2764_v44 = vadd.f32 %v2763_v24, %v2762_v2  ;;  %v2875_v52 = vpop.f32.mrb[123].mxu1 }
 0x1ef   : > { %v2876_v32 = vadd.f32 %v2875_v52, %v2874_v30  ;;  %v2130_v47 = vmax.f32 %v3491_v12, 0.0 }
 0x1f0   : > { %2167 = vst [vmem:[%s3508_s21 + $0x10] sm:$0xff] %v2159_v41  ;;  %v2160_v58 = vmax.f32 %v3457_v1, %v2152_v21  ;;  %v2095_v40 = vadd.f32 %v2873_v55, %v1934_v33  ;;  %v1937_v56 = vadd.f32 %v2764_v44, %v3411_v49 }
 0x1f2   : > { %2168 = vst [vmem:[%s3508_s21 + $0x18] sm:$0xff] %v2160_v58  ;;  %v2137_v38 = vmax.f32 %v2095_v40, 0.0  ;;  %v2098_v8 = vadd.f32 %v2876_v32, %v1937_v56  ;;  %v2765_v15 = vpop.f32.mrb[124].mxu0 }
 0x1f3   : > { %v2877_v42 = vpop.f32.mrb[124].mxu1  ;;  %v2766_v26 = vpop.f32.mrb[125].mxu0 }
 0x1f4   : > { %v2153_v18 = vmax.f32 %v2129_v45, %v2137_v38  ;;  %v2138_v20 = vmax.f32 %v2098_v8, 0.0  ;;  %v2767_v23 = vadd.f32 %v2766_v26, %v2765_v15  ;;  %v2878_v51 = vpop.f32.mrb[125].mxu1  ;;  %v2768_v1 = vpop.f32.mrb[126].mxu0 }
 0x1f5   : > { %v2879_v25 = vadd.f32 %v2878_v51, %v2877_v42  ;;  %v2880_v63 = vpop.f32.mrb[126].mxu1  ;;  %v2769_v49 = vpop.f32.mrb[127].mxu0 }
 0x1f6   : > { %v2161_v28 = vmax.f32 %v3463_v61, %v2153_v18  ;;  %v2154_v60 = vmax.f32 %v2130_v47, %v2138_v20  ;;  %v1942_v27 = vadd.f32 %v2767_v23, %v3414_v11  ;;  %v2770_v54 = vadd.f32 %v2769_v49, %v2768_v1  ;;  %v2881_v62 = vpop.f32.mrb[127].mxu1 }
 0x1f7   : > { %v2882_v36 = vadd.f32 %v2881_v62, %v2880_v63  ;;  %v2132_v61 = vmax.f32 %v3499_v57, 0.0 }
 0x1f8   : > { %2169 = vst [vmem:[%s3508_s21 + $0x20] sm:$0xff] %v2161_v28  ;;  %v2162_v12 = vmax.f32 %v3465_v5, %v2154_v60  ;;  %v2103_v10 = vadd.f32 %v2879_v25, %v1942_v27  ;;  %v1945_v29 = vadd.f32 %v2770_v54, %v3417_v17 }
 0x1fa   : > { %2170 = vst [vmem:[%s3508_s21 + $0x28] sm:$0xff] %v2162_v12  ;;  %v2139_v7 = vmax.f32 %v2103_v10, 0.0  ;;  %v2106_v39 = vadd.f32 %v2882_v36, %v1945_v29 }
 0x1fc   : > { %v2155_v6 = vmax.f32 %v2131_v31, %v2139_v7  ;;  %v2140_v11 = vmax.f32 %v2106_v39, 0.0 }
 0x1fe   : > { %v2163_v13 = vmax.f32 %v3471_v35, %v2155_v6  ;;  %v2156_v3 = vmax.f32 %v2132_v61, %v2140_v11 }
 0x200   : > { %2171 = vst [vmem:[%s3508_s21 + $0x30] sm:$0xff] %v2163_v13  ;;  %v2164_v16 = vmax.f32 %v3473_v34, %v2156_v3 }
 0x202   : > { %2172 = vst [vmem:[%s3508_s21 + $0x38] sm:$0xff] %v2164_v16 }
 0x203 PF: > { %s13_s12 = sadd.s32 1, %s2961_s12  }
 0x204   : > { %p10_p5 = scmp.ge.s32.totalorder %s13_s12, 4  }
 0x206   :  { %12 = sbr.rel (!%p10_p5) target bundleno = 1 (0x1), region = 62 }

// kernel: net_forward.5
= control target key start
LH: loop header
LB: loop body
LE: loop exit
PB: predicated region body
PF: predicated region fallthrough
CT: control target
= control target key end

     0   :  { %v1073_v28 = vlaneseq  ;;  %v7850_v36 = vmov 1966171168   ;;  %s9602_s0 = inlined_call_operand.vmem [shape: bf16[2,8192], index: 0, kind: input, shape index: {}]   ;;  %s9603_s1 = inlined_call_operand.vmem [shape: bf16[8192,128], index: 1, kind: input, shape index: {}]   ;;  %s9604_s2 = inlined_call_operand.vmem [shape: f32[1,128], index: 2, kind: input, shape index: {}]   ;;  %s9605_s3 = inlined_call_operand.vmem [shape: bf16[128,128], index: 3, kind: input, shape index: {}]   ;;  %s9606_s4 = inlined_call_operand.vmem [shape: f32[1,128], index: 4, kind: input, shape index: {}]   ;;  %s9607_s5 = inlined_call_operand.hbm [shape: f32[2,128], index: 5, kind: output, shape index: {}]  }
   0x1   :  { %v7290_v0 = vld [vmem:[%s9603_s1 + $0x40] sm:$0xff]   ;;  %v7294_v4 = vld [vmem:[%s9603_s1 + $0x48] sm:$0xff]   ;;  %v7298_v8 = vld [vmem:[%s9603_s1 + $0x50] sm:$0xff]   ;;  %v1071_v37 = vunpack.c.l.s4 %v7850_v36 }
   0x2   :  { %v7291_v1 = vld [vmem:[%s9603_s1 + $0xc0] sm:$0xff]   ;;  %6553 = vmatprep.subr.bf16.mxu0 %v7290_v0  ;;  %v7295_v5 = vld [vmem:[%s9603_s1 + $0xc8] sm:$0xff]   ;;  %v7299_v9 = vld [vmem:[%s9603_s1 + $0xd0] sm:$0xff]   ;;  %v1074_v33 = vshrl.u32 %v1073_v28, 7 }
   0x3   :  { %v7292_v2 = vld [vmem:[%s9603_s1] sm:$0xff]   ;;  %6575 = vmatprep.subr.bf16.mxu1 %v7291_v1  ;;  %v7296_v6 = vld [vmem:[%s9603_s1 + $0x8] sm:$0xff]   ;;  %v7300_v10 = vld [vmem:[%s9603_s1 + $0x10] sm:$0xff]   ;;  %v1072_v40 = vunpack.c.0.s8 %v1071_v37 }
   0x4   :  { %v7293_v3 = vld [vmem:[%s9603_s1 + $0x80] sm:$0xff]   ;;  %6554 = vmatpush3.bf16.msra.mxu0 %v7292_v2  ;;  %v7297_v7 = vld [vmem:[%s9603_s1 + $0x88] sm:$0xff]   ;;  %v7301_v11 = vld [vmem:[%s9603_s1 + $0x90] sm:$0xff]  }
   0x5   :  { %6576 = vmatpush3.bf16.msra.mxu1 %v7293_v3  ;;  %6555 = vmatprep.subr.bf16.mxu0 %v7294_v4  ;;  %v7302_v12 = vld [vmem:[%s9603_s1 + $0x58] sm:$0xff]   ;;  %v7306_v16 = vld [vmem:[%s9603_s1 + $0x60] sm:$0xff]   ;;  %v7310_v20 = vld [vmem:[%s9603_s1 + $0x68] sm:$0xff]   ;;  %v7989_v41 = vsub.s32 %v1072_v40, %v1074_v33 }
   0x6   :  { %6577 = vmatprep.subr.bf16.mxu1 %v7295_v5  ;;  %v7303_v13 = vld [vmem:[%s9603_s1 + $0xd8] sm:$0xff]   ;;  %v7307_v17 = vld [vmem:[%s9603_s1 + $0xe0] sm:$0xff]   ;;  %v7311_v21 = vld [vmem:[%s9603_s1 + $0xe8] sm:$0xff]  }
   0x7   :  { %v7304_v14 = vld [vmem:[%s9603_s1 + $0x18] sm:$0xff]   ;;  %v7308_v18 = vld [vmem:[%s9603_s1 + $0x20] sm:$0xff]   ;;  %v7312_v22 = vld [vmem:[%s9603_s1 + $0x28] sm:$0xff]  }
   0x8   :  { %6556 = vmatpush3.bf16.msra.mxu0 %v7296_v6  ;;  %v7305_v15 = vld [vmem:[%s9603_s1 + $0x98] sm:$0xff]   ;;  %v7309_v19 = vld [vmem:[%s9603_s1 + $0xa0] sm:$0xff]   ;;  %v7313_v23 = vld [vmem:[%s9603_s1 + $0xa8] sm:$0xff]  }
   0x9   :  { %6578 = vmatpush3.bf16.msra.mxu1 %v7297_v7  ;;  %6557 = vmatprep.subr.bf16.mxu0 %v7298_v8  ;;  %v7314_v24 = vld [vmem:[%s9603_s1 + $0x70] sm:$0xff]   ;;  %v7318_v29 = vld [vmem:[%s9603_s1 + $0x78] sm:$0xff]   ;;  %v22_v34 = vld [vmem:[%s9602_s0] sm:$0xff] }
   0xa   :  { %6579 = vmatprep.subr.bf16.mxu1 %v7299_v9  ;;  %v7315_v25 = vld [vmem:[%s9603_s1 + $0xf0] sm:$0xff]   ;;  %v7319_v30 = vld [vmem:[%s9603_s1 + $0xf8] sm:$0xff]   ;;  %v7323_v35 = vld [vmem:[%s9603_s1 + $0x140] sm:$0xff]   ;;  %v1069_v39 = vcombine.high %v22_v34, %v22_v34  ;;  %v1076_v42 = vrot.slane %v22_v34, %v7989_v41 }
   0xb   :  { %v7316_v26 = vld [vmem:[%s9603_s1 + $0x30] sm:$0xff]   ;;  %v7320_v31 = vld [vmem:[%s9603_s1 + $0x38] sm:$0xff]   ;;  %v7324_v38 = vld [vmem:[%s9603_s1 + $0x1c0] sm:$0xff]  }
   0xc   :  { %6558 = vmatpush3.bf16.msra.mxu0 %v7300_v10  ;;  %v7317_v27 = vld [vmem:[%s9603_s1 + $0xb0] sm:$0xff]   ;;  %v7321_v32 = vld [vmem:[%s9603_s1 + $0xb8] sm:$0xff]   ;;  %v7993_v43 = vrot.slane %v1069_v39, %v7989_v41  ;;  %v1084_v44 = vcombine.high %v1076_v42, %v1076_v42  ;;  %v1092_v45 = vrot.slane %v1076_v42, %v7989_v41  ;;  %v7325_v47 = vld [vmem:[%s9603_s1 + $0x100] sm:$0xff]  }
   0xd   :  { %6580 = vmatpush3.bf16.msra.mxu1 %v7301_v11  ;;  %6559 = vmatprep.subr.bf16.mxu0 %v7302_v12  ;;  %v7326_v49 = vld [vmem:[%s9603_s1 + $0x180] sm:$0xff]   ;;  %v7327_v52 = vld [vmem:[%s9603_s1 + $0x148] sm:$0xff]   ;;  %v7331_v58 = vld [vmem:[%s9603_s1 + $0x150] sm:$0xff]  }
   0xe   :  { %6581 = vmatprep.subr.bf16.mxu1 %v7303_v13  ;;  %v1085_v46 = vcombine.high %v7993_v43, %v7993_v43  ;;  %v1106_v48 = vrot.slane %v1084_v44, %v7989_v41  ;;  %v1114_v51 = vcombine.high %v1092_v45, %v1092_v45  ;;  %v7328_v54 = vld [vmem:[%s9603_s1 + $0x1c8] sm:$0xff]   ;;  %v7332_v59 = vld [vmem:[%s9603_s1 + $0x1d0] sm:$0xff]   ;;  %v7335_v62 = vld [vmem:[%s9603_s1 + $0x158] sm:$0xff]  }
   0xf   :  { %v7329_v55 = vld [vmem:[%s9603_s1 + $0x108] sm:$0xff]   ;;  %v7333_v60 = vld [vmem:[%s9603_s1 + $0x110] sm:$0xff]   ;;  %v7336_v63 = vld [vmem:[%s9603_s1 + $0x1d8] sm:$0xff]  }
  0x10   :  { %6560 = vmatpush3.bf16.msra.mxu0 %v7304_v14  ;;  %v1113_v50 = vrot.slane %v1085_v46, %v7989_v41  ;;  %4629 = vmatprep.mubr.bf16.mxu0 %v1106_v48  ;;  %v1116_v53 = vcombine.high %v1106_v48, %v1106_v48  ;;  %v7330_v57 = vld [vmem:[%s9603_s1 + $0x188] sm:$0xff]   ;;  %v7334_v61 = vld [vmem:[%s9603_s1 + $0x190] sm:$0xff]   ;;  %v7337_v0 = vld [vmem:[%s9603_s1 + $0x118] sm:$0xff]  }
  0x11   :  { %6582 = vmatpush3.bf16.msra.mxu1 %v7305_v15  ;;  %6561 = vmatprep.subr.bf16.mxu0 %v7306_v16  ;;  %v7338_v1 = vld [vmem:[%s9603_s1 + $0x198] sm:$0xff]   ;;  %v7339_v2 = vld [vmem:[%s9603_s1 + $0x160] sm:$0xff]   ;;  %v7343_v6 = vld [vmem:[%s9603_s1 + $0x168] sm:$0xff]  }
  0x12   :  { %6583 = vmatprep.subr.bf16.mxu1 %v7307_v17  ;;  %v1117_v56 = vcombine.high %v1113_v50, %v1113_v50  ;;  %4669 = vmatprep.mubr.bf16.mxu1 %v1116_v53  ;;  %v7340_v3 = vld [vmem:[%s9603_s1 + $0x1e0] sm:$0xff]   ;;  %v7344_v7 = vld [vmem:[%s9603_s1 + $0x1e8] sm:$0xff]   ;;  %v7347_v10 = vld [vmem:[%s9603_s1 + $0x170] sm:$0xff]  }
  0x13   :  { %v7341_v4 = vld [vmem:[%s9603_s1 + $0x120] sm:$0xff]   ;;  %v7345_v8 = vld [vmem:[%s9603_s1 + $0x128] sm:$0xff]   ;;  %v7348_v11 = vld [vmem:[%s9603_s1 + $0x1f0] sm:$0xff]  }
  0x14   :  { %6562 = vmatpush3.bf16.msra.mxu0 %v7308_v18  ;;  %v7342_v5 = vld [vmem:[%s9603_s1 + $0x1a0] sm:$0xff]   ;;  %v7346_v9 = vld [vmem:[%s9603_s1 + $0x1a8] sm:$0xff]   ;;  %v7349_v12 = vld [vmem:[%s9603_s1 + $0x130] sm:$0xff]   ;;  %v1099_v18 = vrot.slane %v7993_v43, %v7989_v41 }
  0x15   :  { %6584 = vmatpush3.bf16.msra.mxu1 %v7309_v19  ;;  %6563 = vmatprep.subr.bf16.mxu0 %v7310_v20  ;;  %v7350_v13 = vld [vmem:[%s9603_s1 + $0x1b0] sm:$0xff]   ;;  %v7351_v14 = vld [vmem:[%s9603_s1 + $0x178] sm:$0xff]   ;;  %v7355_v19 = vld [vmem:[%s9603_s1 + $0x240] sm:$0xff]  }
  0x16   :  { %6585 = vmatprep.subr.bf16.mxu1 %v7311_v21  ;;  %v7352_v15 = vld [vmem:[%s9603_s1 + $0x1f8] sm:$0xff]   ;;  %v7356_v20 = vld [vmem:[%s9603_s1 + $0x2c0] sm:$0xff]   ;;  %v7363_v28 = vld [vmem:[%s9603_s1 + $0x250] sm:$0xff]  }
  0x17   :  { %v7353_v16 = vld [vmem:[%s9603_s1 + $0x138] sm:$0xff]   ;;  %v7357_v21 = vld [vmem:[%s9603_s1 + $0x200] sm:$0xff]   ;;  %v7375_v40 = vld [vmem:[%s9603_s1 + $0x268] sm:$0xff]  }
  0x18   :  { %6564 = vmatpush3.bf16.msra.mxu0 %v7312_v22  ;;  %v7354_v17 = vld [vmem:[%s9603_s1 + $0x1b8] sm:$0xff]   ;;  %v7358_v22 = vld [vmem:[%s9603_s1 + $0x280] sm:$0xff]   ;;  %v7376_v42 = vld [vmem:[%s9603_s1 + $0x2e8] sm:$0xff]  }
  0x19   :  { %6586 = vmatpush3.bf16.msra.mxu1 %v7313_v23  ;;  %6565 = vmatprep.subr.bf16.mxu0 %v7314_v24  ;;  %v1115_v23 = vcombine.high %v1099_v18, %v1099_v18  ;;  %v7359_v24 = vld [vmem:[%s9603_s1 + $0x248] sm:$0xff]   ;;  %v7368_v33 = vld [vmem:[%s9603_s1 + $0x2d8] sm:$0xff]   ;;  %v7371_v36 = vld [vmem:[%s9603_s1 + $0x260] sm:$0xff]  }
  0x1a   :  { %6587 = vmatprep.subr.bf16.mxu1 %v7315_v25  ;;  %v7360_v25 = vld [vmem:[%s9603_s1 + $0x2c8] sm:$0xff]   ;;  %v7369_v34 = vld [vmem:[%s9603_s1 + $0x218] sm:$0xff]   ;;  %v7372_v37 = vld [vmem:[%s9603_s1 + $0x2e0] sm:$0xff]  }
  0x1b   :  { %v7374_v39 = vld [vmem:[%s9603_s1 + $0x2a0] sm:$0xff]   ;;  %v7377_v43 = vld [vmem:[%s9603_s1 + $0x228] sm:$0xff]  }
  0x1c   :  { %6566 = vmatpush3.bf16.msra.mxu0 %v7316_v26  ;;  %v7361_v26 = vld [vmem:[%s9603_s1 + $0x208] sm:$0xff]  }
  0x1d   :  { %6588 = vmatpush3.bf16.msra.mxu1 %v7317_v27  ;;  %6567 = vmatprep.subr.bf16.mxu0 %v7318_v29  ;;  %v7362_v27 = vld [vmem:[%s9603_s1 + $0x288] sm:$0xff]   ;;  %v7364_v29 = vld [vmem:[%s9603_s1 + $0x2d0] sm:$0xff]  }
  0x1e   :  { %6589 = vmatprep.subr.bf16.mxu1 %v7319_v30  ;;  %v7365_v30 = vld [vmem:[%s9603_s1 + $0x210] sm:$0xff]   ;;  %v7378_v44 = vld [vmem:[%s9603_s1 + $0x2a8] sm:$0xff]  }
  0x1f   :  { %v23_v46 = vld [vmem:[%s9602_s0 + $0x8] sm:$0xff] }
  0x20   :  { %6568 = vmatpush3.bf16.msra.mxu0 %v7320_v31  ;;  %v7366_v31 = vld [vmem:[%s9603_s1 + $0x290] sm:$0xff]   ;;  %v1125_v48 = vrot.slane %v23_v46, %v7989_v41 }
  0x21   :  { %6590 = vmatpush3.bf16.msra.mxu1 %v7321_v32  ;;  %6597 = vmatprep.subr.bf16.mxu0 %v7323_v35  ;;  %v7367_v32 = vld [vmem:[%s9603_s1 + $0x258] sm:$0xff]  }
  0x22   :  { %6619 = vmatprep.subr.bf16.mxu1 %v7324_v38  ;;  %v7370_v35 = vld [vmem:[%s9603_s1 + $0x298] sm:$0xff]   ;;  %v7373_v38 = vld [vmem:[%s9603_s1 + $0x220] sm:$0xff]  }
  0x23   :  { %4630 = vmatmul.mubr.bf16.vlgmr.msra.gmra.mrb[0].mxu0 %v1092_v45  ;;  %v7379_v45 = vld [vmem:[%s9603_s1 + $0x270] sm:$0xff]  }
  0x24   :  { %6598 = vmatpush3.bf16.msra.mxu0 %v7325_v47  ;;  %4670 = vmatmul.mubr.bf16.vlgmr.msra.gmra.mrb[0].mxu1 %v1114_v51  ;;  %v7380_v47 = vld [vmem:[%s9603_s1 + $0x2f0] sm:$0xff]  }
  0x25   :  { %6599 = vmatprep.subr.bf16.mxu0 %v7327_v52  ;;  %6620 = vmatpush3.bf16.msra.mxu1 %v7326_v49  ;;  %v1118_v49 = vcombine.high %v23_v46, %v23_v46  ;;  %v7382_v51 = vld [vmem:[%s9603_s1 + $0x2b0] sm:$0xff]   ;;  %v1133_v52 = vcombine.high %v1125_v48, %v1125_v48 }
  0x26   :  { %4709 = vmatprep.mubr.bf16.mxu0 %v1113_v50  ;;  %6621 = vmatprep.subr.bf16.mxu1 %v7328_v54  ;;  %v7381_v50 = vld [vmem:[%s9603_s1 + $0x230] sm:$0xff]   ;;  %v7383_v54 = vld [vmem:[%s9603_s1 + $0x278] sm:$0xff]  }
  0x27   :  { %4749 = vmatprep.mubr.bf16.mxu1 %v1117_v56  ;;  %v8181_v53 = vrot.slane %v1118_v49, %v7989_v41  ;;  %v1155_v56 = vrot.slane %v1133_v52, %v7989_v41  ;;  %v7430_v46 = vld [vmem:[%s9603_s1 + $0x410] sm:$0xff]   ;;  %v7433_v49 = vld [vmem:[%s9603_s1 + $0x4d8] sm:$0xff]   ;;  %v7436_v52 = vld [vmem:[%s9603_s1 + $0x460] sm:$0xff]  }
  0x28   :  { %6600 = vmatpush3.bf16.msra.mxu0 %v7329_v55  ;;  %v7384_v55 = vld [vmem:[%s9603_s1 + $0x2f8] sm:$0xff]  }
  0x29   :  { %6601 = vmatprep.subr.bf16.mxu0 %v7331_v58  ;;  %6622 = vmatpush3.bf16.msra.mxu1 %v7330_v57  ;;  %v1134_v57 = vcombine.high %v8181_v53, %v8181_v53  ;;  %v7385_v58 = vld [vmem:[%s9603_s1 + $0x238] sm:$0xff]  }
  0x2a   :  { %6623 = vmatprep.subr.bf16.mxu1 %v7332_v59  ;;  %v7386_v59 = vld [vmem:[%s9603_s1 + $0x2b8] sm:$0xff]  }
  0x2c   :  { %6602 = vmatpush3.bf16.msra.mxu0 %v7333_v60  ;;  %v1165_v60 = vcombine.high %v1155_v56, %v1155_v56 }
  0x2d   :  { %6603 = vmatprep.subr.bf16.mxu0 %v7335_v62  ;;  %6624 = vmatpush3.bf16.msra.mxu1 %v7334_v61  ;;  %v1141_v61 = vrot.slane %v1125_v48, %v7989_v41  ;;  %v7387_v62 = vld [vmem:[%s9603_s1 + $0x340] sm:$0xff]   ;;  %v7432_v48 = vld [vmem:[%s9603_s1 + $0x458] sm:$0xff]  }
  0x2e   :  { %6625 = vmatprep.subr.bf16.mxu1 %v7336_v63  ;;  %v7388_v63 = vld [vmem:[%s9603_s1 + $0x3c0] sm:$0xff]  }
  0x30   :  { %6604 = vmatpush3.bf16.msra.mxu0 %v7337_v0  ;;  %v1162_v0 = vrot.slane %v1134_v57, %v7989_v41  ;;  %v7441_v57 = vld [vmem:[%s9603_s1 + $0x4e8] sm:$0xff]  }
  0x31   :  { %6605 = vmatprep.subr.bf16.mxu0 %v7339_v2  ;;  %6626 = vmatpush3.bf16.msra.mxu1 %v7338_v1  ;;  %v7389_v1 = vld [vmem:[%s9603_s1 + $0x300] sm:$0xff]  }
  0x32   :  { %6627 = vmatprep.subr.bf16.mxu1 %v7340_v3  ;;  %v7390_v2 = vld [vmem:[%s9603_s1 + $0x380] sm:$0xff]   ;;  %v1163_v3 = vcombine.high %v1141_v61, %v1141_v61 }
  0x34   :  { %6606 = vmatpush3.bf16.msra.mxu0 %v7341_v4  ;;  %v7391_v4 = vld [vmem:[%s9603_s1 + $0x348] sm:$0xff]  }
  0x35   :  { %6607 = vmatprep.subr.bf16.mxu0 %v7343_v6  ;;  %6628 = vmatpush3.bf16.msra.mxu1 %v7342_v5  ;;  %v7392_v5 = vld [vmem:[%s9603_s1 + $0x3c8] sm:$0xff]   ;;  %v1166_v6 = vcombine.high %v1162_v0, %v1162_v0 }
  0x36   :  { %6629 = vmatprep.subr.bf16.mxu1 %v7344_v7  ;;  %v7393_v7 = vld [vmem:[%s9603_s1 + $0x308] sm:$0xff]  }
  0x38   :  { %6608 = vmatpush3.bf16.msra.mxu0 %v7345_v8  ;;  %v7394_v8 = vld [vmem:[%s9603_s1 + $0x388] sm:$0xff]  }
  0x39   :  { %6609 = vmatprep.subr.bf16.mxu0 %v7347_v10  ;;  %6630 = vmatpush3.bf16.msra.mxu1 %v7346_v9  ;;  %v7395_v9 = vld [vmem:[%s9603_s1 + $0x350] sm:$0xff]  }
  0x3a   :  { %6631 = vmatprep.subr.bf16.mxu1 %v7348_v11  ;;  %v7396_v10 = vld [vmem:[%s9603_s1 + $0x3d0] sm:$0xff]  }
  0x3b   :  { %v7397_v11 = vld [vmem:[%s9603_s1 + $0x310] sm:$0xff]  }
  0x3c   :  { %6610 = vmatpush3.bf16.msra.mxu0 %v7349_v12  ;;  %v7398_v12 = vld [vmem:[%s9603_s1 + $0x390] sm:$0xff]  }
  0x3d   :  { %6611 = vmatprep.subr.bf16.mxu0 %v7351_v14  ;;  %6632 = vmatpush3.bf16.msra.mxu1 %v7350_v13  ;;  %v7399_v13 = vld [vmem:[%s9603_s1 + $0x358] sm:$0xff]  }
  0x3e   :  { %6633 = vmatprep.subr.bf16.mxu1 %v7352_v15  ;;  %v7400_v14 = vld [vmem:[%s9603_s1 + $0x3d8] sm:$0xff]  }
  0x3f   :  { %v7401_v15 = vld [vmem:[%s9603_s1 + $0x318] sm:$0xff]  }
  0x40   :  { %6612 = vmatpush3.bf16.msra.mxu0 %v7353_v16  ;;  %v7402_v16 = vld [vmem:[%s9603_s1 + $0x398] sm:$0xff]  }
  0x41   :  { %6641 = vmatprep.subr.bf16.mxu0 %v7355_v19  ;;  %6634 = vmatpush3.bf16.msra.mxu1 %v7354_v17  ;;  %v7403_v17 = vld [vmem:[%s9603_s1 + $0x360] sm:$0xff]  }
  0x42   :  { %6663 = vmatprep.subr.bf16.mxu1 %v7356_v20  ;;  %v7405_v19 = vld [vmem:[%s9603_s1 + $0x320] sm:$0xff]  }
  0x43   :  { %4710 = vmatmul.mubr.bf16.vlgmr.msra.gmra.mrb[4].mxu0 %v1099_v18  ;;  %v7404_v18 = vld [vmem:[%s9603_s1 + $0x3e0] sm:$0xff]  }
  0x44   :  { %6642 = vmatpush3.bf16.msra.mxu0 %v7357_v21  ;;  %4750 = vmatmul.mubr.bf16.vlgmr.msra.gmra.mrb[4].mxu1 %v1115_v23  ;;  %v7406_v20 = vld [vmem:[%s9603_s1 + $0x3a0] sm:$0xff]   ;;  %v7407_v21 = vld [vmem:[%s9603_s1 + $0x368] sm:$0xff]  }
  0x45   :  { %6643 = vmatprep.subr.bf16.mxu0 %v7359_v24  ;;  %6664 = vmatpush3.bf16.msra.mxu1 %v7358_v22  ;;  %v7408_v22 = vld [vmem:[%s9603_s1 + $0x3e8] sm:$0xff]  }
  0x46   :  { %6665 = vmatprep.subr.bf16.mxu1 %v7360_v25  ;;  %4789 = vmatprep.mubr.bf16.mxu0 %v1155_v56  ;;  %v7409_v23 = vld [vmem:[%s9603_s1 + $0x328] sm:$0xff]   ;;  %v7411_v25 = vld [vmem:[%s9603_s1 + $0x370] sm:$0xff]  }
  0x47   :  { %4829 = vmatprep.mubr.bf16.mxu1 %v1165_v60  ;;  %v7410_v24 = vld [vmem:[%s9603_s1 + $0x3a8] sm:$0xff]   ;;  %v7444_v60 = vld [vmem:[%s9603_s1 + $0x470] sm:$0xff]  }
  0x48   :  { %6644 = vmatpush3.bf16.msra.mxu0 %v7361_v26  ;;  %v7412_v26 = vld [vmem:[%s9603_s1 + $0x3f0] sm:$0xff]   ;;  %v7440_v56 = vld [vmem:[%s9603_s1 + $0x468] sm:$0xff]  }
  0x49   :  { %6645 = vmatprep.subr.bf16.mxu0 %v7363_v28  ;;  %6666 = vmatpush3.bf16.msra.mxu1 %v7362_v27  ;;  %v7413_v27 = vld [vmem:[%s9603_s1 + $0x330] sm:$0xff]  }
  0x4a   :  { %6667 = vmatprep.subr.bf16.mxu1 %v7364_v29  ;;  %v7414_v28 = vld [vmem:[%s9603_s1 + $0x3b0] sm:$0xff]   ;;  %v7415_v29 = vld [vmem:[%s9603_s1 + $0x378] sm:$0xff]  }
  0x4c   :  { %6646 = vmatpush3.bf16.msra.mxu0 %v7365_v30  ;;  %v7416_v30 = vld [vmem:[%s9603_s1 + $0x3f8] sm:$0xff]  }
  0x4d   :  { %6647 = vmatprep.subr.bf16.mxu0 %v7367_v32  ;;  %6668 = vmatpush3.bf16.msra.mxu1 %v7366_v31  ;;  %v7417_v31 = vld [vmem:[%s9603_s1 + $0x338] sm:$0xff]  }
  0x4e   :  { %6669 = vmatprep.subr.bf16.mxu1 %v7368_v33  ;;  %v7418_v32 = vld [vmem:[%s9603_s1 + $0x3b8] sm:$0xff]   ;;  %v1148_v33 = vrot.slane %v8181_v53, %v7989_v41  ;;  %v7437_v53 = vld [vmem:[%s9603_s1 + $0x4e0] sm:$0xff]  }
  0x50   :  { %6648 = vmatpush3.bf16.msra.mxu0 %v7369_v34  ;;  %v7420_v34 = vld [vmem:[%s9603_s1 + $0x440] sm:$0xff]  }
  0x51   :  { %6649 = vmatprep.subr.bf16.mxu0 %v7371_v36  ;;  %6670 = vmatpush3.bf16.msra.mxu1 %v7370_v35  ;;  %v7421_v35 = vld [vmem:[%s9603_s1 + $0x4c0] sm:$0xff]  }
  0x52   :  { %6671 = vmatprep.subr.bf16.mxu1 %v7372_v37  ;;  %v7422_v36 = vld [vmem:[%s9603_s1 + $0x400] sm:$0xff]  }
  0x53   :  { %v7423_v37 = vld [vmem:[%s9603_s1 + $0x480] sm:$0xff]  }
  0x54   :  { %6650 = vmatpush3.bf16.msra.mxu0 %v7373_v38  ;;  %v1164_v38 = vcombine.high %v1148_v33, %v1148_v33 }
  0x55   :  { %6651 = vmatprep.subr.bf16.mxu0 %v7375_v40  ;;  %6672 = vmatpush3.bf16.msra.mxu1 %v7374_v39  ;;  %v7424_v39 = vld [vmem:[%s9603_s1 + $0x448] sm:$0xff]  }
  0x56   :  { %6673 = vmatprep.subr.bf16.mxu1 %v7376_v42  ;;  %v7425_v40 = vld [vmem:[%s9603_s1 + $0x4c8] sm:$0xff]  }
  0x57   :  { %v7426_v42 = vld [vmem:[%s9603_s1 + $0x408] sm:$0xff]  }
  0x58   :  { %6652 = vmatpush3.bf16.msra.mxu0 %v7377_v43  ;;  %v7427_v43 = vld [vmem:[%s9603_s1 + $0x488] sm:$0xff]  }
  0x59   :  { %6653 = vmatprep.subr.bf16.mxu0 %v7379_v45  ;;  %6674 = vmatpush3.bf16.msra.mxu1 %v7378_v44  ;;  %v7428_v44 = vld [vmem:[%s9603_s1 + $0x450] sm:$0xff]  }
  0x5a   :  { %6675 = vmatprep.subr.bf16.mxu1 %v7380_v47  ;;  %v7429_v45 = vld [vmem:[%s9603_s1 + $0x4d0] sm:$0xff]  }
  0x5b   :  { %v7431_v47 = vld [vmem:[%s9603_s1 + $0x490] sm:$0xff]  }
  0x5c   :  { %6654 = vmatpush3.bf16.msra.mxu0 %v7381_v50  ;;  %v7434_v50 = vld [vmem:[%s9603_s1 + $0x418] sm:$0xff]  }
  0x5d   :  { %6655 = vmatprep.subr.bf16.mxu0 %v7383_v54  ;;  %6676 = vmatpush3.bf16.msra.mxu1 %v7382_v51  ;;  %v7435_v51 = vld [vmem:[%s9603_s1 + $0x498] sm:$0xff]   ;;  %v7438_v54 = vld [vmem:[%s9603_s1 + $0x420] sm:$0xff]  }
  0x5e   :  { %6677 = vmatprep.subr.bf16.mxu1 %v7384_v55  ;;  %v7439_v55 = vld [vmem:[%s9603_s1 + $0x4a0] sm:$0xff]  }
  0x60   :  { %6656 = vmatpush3.bf16.msra.mxu0 %v7385_v58  ;;  %v7442_v58 = vld [vmem:[%s9603_s1 + $0x428] sm:$0xff]  }
  0x61   :  { %6685 = vmatprep.subr.bf16.mxu0 %v7387_v62  ;;  %6678 = vmatpush3.bf16.msra.mxu1 %v7386_v59  ;;  %v7443_v59 = vld [vmem:[%s9603_s1 + $0x4a8] sm:$0xff]   ;;  %v7445_v62 = vld [vmem:[%s9603_s1 + $0x4f0] sm:$0xff]  }
  0x62   :  { %6707 = vmatprep.subr.bf16.mxu1 %v7388_v63 }
  0x63   :  { %4790 = vmatmul.mubr.bf16.vlgmr.msra.gmra.mrb[8].mxu0 %v1141_v61  ;;  %v24_v61 = vld [vmem:[%s9602_s0 + $0x10] sm:$0xff] }
  0x64   :  { %6686 = vmatpush3.bf16.msra.mxu0 %v7389_v1  ;;  %4869 = vmatprep.mubr.bf16.mxu0 %v1162_v0  ;;  %v1174_v63 = vrot.slane %v24_v61, %v7989_v41  ;;  %v1167_v0 = vcombine.high %v24_v61, %v24_v61  ;;  %v7446_v1 = vld [vmem:[%s9603_s1 + $0x430] sm:$0xff]  }
  0x65   :  { %4830 = vmatmul.mubr.bf16.vlgmr.msra.gmra.mrb[8].mxu1 %v1163_v3  ;;  %6687 = vmatprep.subr.bf16.mxu0 %v7391_v4  ;;  %v7495_v61 = vld [vmem:[%s9603_s1 + $0x610] sm:$0xff]  }
  0x66   :  { %6708 = vmatpush3.bf16.msra.mxu1 %v7390_v2  ;;  %4909 = vmatprep.mubr.bf16.mxu1 %v1166_v6  ;;  %v7447_v2 = vld [vmem:[%s9603_s1 + $0x4b0] sm:$0xff]   ;;  %v1182_v3 = vcombine.high %v1174_v63, %v1174_v63  ;;  %v8387_v4 = vrot.slane %v1167_v0, %v7989_v41  ;;  %v7449_v6 = vld [vmem:[%s9603_s1 + $0x4f8] sm:$0xff]  }
  0x67   :  { %6709 = vmatprep.subr.bf16.mxu1 %v7392_v5  ;;  %v7448_v5 = vld [vmem:[%s9603_s1 + $0x478] sm:$0xff]  }
  0x68   :  { %6688 = vmatpush3.bf16.msra.mxu0 %v7393_v7  ;;  %v1204_v7 = vrot.slane %v1182_v3, %v7989_v41  ;;  %v7498_v0 = vld [vmem:[%s9603_s1 + $0x6d8] sm:$0xff]   ;;  %v7501_v3 = vld [vmem:[%s9603_s1 + $0x660] sm:$0xff]  }
  0x69   :  { %6689 = vmatprep.subr.bf16.mxu0 %v7395_v9  ;;  %v7450_v9 = vld [vmem:[%s9603_s1 + $0x438] sm:$0xff]  }
  0x6a   :  { %6710 = vmatpush3.bf16.msra.mxu1 %v7394_v8  ;;  %v1183_v8 = vcombine.high %v8387_v4, %v8387_v4 }
  0x6b   :  { %6711 = vmatprep.subr.bf16.mxu1 %v7396_v10  ;;  %v7451_v10 = vld [vmem:[%s9603_s1 + $0x4b8] sm:$0xff]  }
  0x6c   :  { %6690 = vmatpush3.bf16.msra.mxu0 %v7397_v11  ;;  %v1214_v11 = vcombine.high %v1204_v7, %v1204_v7 }
  0x6d   :  { %6691 = vmatprep.subr.bf16.mxu0 %v7399_v13  ;;  %v7452_v13 = vld [vmem:[%s9603_s1 + $0x540] sm:$0xff]  }
  0x6e   :  { %6712 = vmatpush3.bf16.msra.mxu1 %v7398_v12  ;;  %v1190_v12 = vrot.slane %v1174_v63, %v7989_v41  ;;  %v7497_v63 = vld [vmem:[%s9603_s1 + $0x658] sm:$0xff]  }
  0x6f   :  { %6713 = vmatprep.subr.bf16.mxu1 %v7400_v14  ;;  %v7453_v14 = vld [vmem:[%s9603_s1 + $0x5c0] sm:$0xff]  }
  0x70   :  { %6692 = vmatpush3.bf16.msra.mxu0 %v7401_v15  ;;  %v1211_v15 = vrot.slane %v1183_v8, %v7989_v41  ;;  %v7506_v8 = vld [vmem:[%s9603_s1 + $0x6e8] sm:$0xff]  }
  0x71   :  { %6693 = vmatprep.subr.bf16.mxu0 %v7403_v17  ;;  %v7455_v17 = vld [vmem:[%s9603_s1 + $0x580] sm:$0xff]  }
  0x72   :  { %6714 = vmatpush3.bf16.msra.mxu1 %v7402_v16  ;;  %v7454_v16 = vld [vmem:[%s9603_s1 + $0x500] sm:$0xff]  }
  0x73   :  { %6715 = vmatprep.subr.bf16.mxu1 %v7404_v18  ;;  %v1212_v18 = vcombine.high %v1190_v12, %v1190_v12 }
  0x74   :  { %6694 = vmatpush3.bf16.msra.mxu0 %v7405_v19  ;;  %v7456_v19 = vld [vmem:[%s9603_s1 + $0x548] sm:$0xff]  }
  0x75   :  { %6695 = vmatprep.subr.bf16.mxu0 %v7407_v21  ;;  %v1215_v21 = vcombine.high %v1211_v15, %v1211_v15 }
  0x76   :  { %6716 = vmatpush3.bf16.msra.mxu1 %v7406_v20  ;;  %v7457_v20 = vld [vmem:[%s9603_s1 + $0x5c8] sm:$0xff]  }
  0x77   :  { %6717 = vmatprep.subr.bf16.mxu1 %v7408_v22  ;;  %v7458_v22 = vld [vmem:[%s9603_s1 + $0x508] sm:$0xff]  }
  0x78   :  { %6696 = vmatpush3.bf16.msra.mxu0 %v7409_v23  ;;  %v7459_v23 = vld [vmem:[%s9603_s1 + $0x588] sm:$0xff]  }
  0x79   :  { %6697 = vmatprep.subr.bf16.mxu0 %v7411_v25  ;;  %v7461_v25 = vld [vmem:[%s9603_s1 + $0x5d0] sm:$0xff]  }
  0x7a   :  { %6718 = vmatpush3.bf16.msra.mxu1 %v7410_v24  ;;  %v7460_v24 = vld [vmem:[%s9603_s1 + $0x550] sm:$0xff]  }
  0x7b   :  { %6719 = vmatprep.subr.bf16.mxu1 %v7412_v26  ;;  %v7462_v26 = vld [vmem:[%s9603_s1 + $0x510] sm:$0xff]  }
  0x7c   :  { %6698 = vmatpush3.bf16.msra.mxu0 %v7413_v27  ;;  %v7463_v27 = vld [vmem:[%s9603_s1 + $0x590] sm:$0xff]  }
  0x7d   :  { %6699 = vmatprep.subr.bf16.mxu0 %v7415_v29  ;;  %v7465_v29 = vld [vmem:[%s9603_s1 + $0x5d8] sm:$0xff]  }
  0x7e   :  { %6720 = vmatpush3.bf16.msra.mxu1 %v7414_v28  ;;  %v7464_v28 = vld [vmem:[%s9603_s1 + $0x558] sm:$0xff]  }
  0x7f   :  { %6721 = vmatprep.subr.bf16.mxu1 %v7416_v30  ;;  %v7466_v30 = vld [vmem:[%s9603_s1 + $0x518] sm:$0xff]  }
  0x80   :  { %6700 = vmatpush3.bf16.msra.mxu0 %v7417_v31  ;;  %v7467_v31 = vld [vmem:[%s9603_s1 + $0x598] sm:$0xff]  }
  0x81   :  { %6729 = vmatprep.subr.bf16.mxu0 %v7420_v34  ;;  %v7470_v34 = vld [vmem:[%s9603_s1 + $0x520] sm:$0xff]  }
  0x82   :  { %6722 = vmatpush3.bf16.msra.mxu1 %v7418_v32  ;;  %v7468_v32 = vld [vmem:[%s9603_s1 + $0x560] sm:$0xff]  }
  0x83   :  { %4870 = vmatmul.mubr.bf16.vlgmr.msra.gmra.mrb[12].mxu0 %v1148_v33  ;;  %6751 = vmatprep.subr.bf16.mxu1 %v7421_v35  ;;  %v7469_v33 = vld [vmem:[%s9603_s1 + $0x5e0] sm:$0xff]  }
  0x84   :  { %6730 = vmatpush3.bf16.msra.mxu0 %v7422_v36  ;;  %4949 = vmatprep.mubr.bf16.mxu0 %v1204_v7  ;;  %v7471_v35 = vld [vmem:[%s9603_s1 + $0x5a0] sm:$0xff]   ;;  %v7472_v36 = vld [vmem:[%s9603_s1 + $0x568] sm:$0xff]  }
  0x85   :  { %4910 = vmatmul.mubr.bf16.vlgmr.msra.gmra.mrb[12].mxu1 %v1164_v38  ;;  %6731 = vmatprep.subr.bf16.mxu0 %v7424_v39  ;;  %v7474_v38 = vld [vmem:[%s9603_s1 + $0x528] sm:$0xff]  }
  0x86   :  { %6752 = vmatpush3.bf16.msra.mxu1 %v7423_v37  ;;  %4989 = vmatprep.mubr.bf16.mxu1 %v1214_v11  ;;  %v7473_v37 = vld [vmem:[%s9603_s1 + $0x5e8] sm:$0xff]   ;;  %v7509_v11 = vld [vmem:[%s9603_s1 + $0x670] sm:$0xff]  }
  0x87   :  { %6753 = vmatprep.subr.bf16.mxu1 %v7425_v40  ;;  %v7475_v39 = vld [vmem:[%s9603_s1 + $0x5a8] sm:$0xff]   ;;  %v7476_v40 = vld [vmem:[%s9603_s1 + $0x570] sm:$0xff]  }
  0x88   :  { %6732 = vmatpush3.bf16.msra.mxu0 %v7426_v42  ;;  %v7477_v42 = vld [vmem:[%s9603_s1 + $0x5f0] sm:$0xff]   ;;  %v7505_v7 = vld [vmem:[%s9603_s1 + $0x668] sm:$0xff]  }
  0x89   :  { %6733 = vmatprep.subr.bf16.mxu0 %v7428_v44  ;;  %v7479_v44 = vld [vmem:[%s9603_s1 + $0x5b0] sm:$0xff]  }
  0x8a   :  { %6754 = vmatpush3.bf16.msra.mxu1 %v7427_v43  ;;  %v7478_v43 = vld [vmem:[%s9603_s1 + $0x530] sm:$0xff]  }
  0x8b   :  { %6755 = vmatprep.subr.bf16.mxu1 %v7429_v45  ;;  %v7480_v45 = vld [vmem:[%s9603_s1 + $0x578] sm:$0xff]  }
  0x8c   :  { %6734 = vmatpush3.bf16.msra.mxu0 %v7430_v46  ;;  %v7481_v46 = vld [vmem:[%s9603_s1 + $0x5f8] sm:$0xff]  }
  0x8d   :  { %6735 = vmatprep.subr.bf16.mxu0 %v7432_v48  ;;  %v7483_v48 = vld [vmem:[%s9603_s1 + $0x5b8] sm:$0xff]  }
  0x8e   :  { %6756 = vmatpush3.bf16.msra.mxu1 %v7431_v47  ;;  %v7482_v47 = vld [vmem:[%s9603_s1 + $0x538] sm:$0xff]  }
  0x8f   :  { %6757 = vmatprep.subr.bf16.mxu1 %v7433_v49  ;;  %v1197_v49 = vrot.slane %v8387_v4, %v7989_v41  ;;  %v7502_v4 = vld [vmem:[%s9603_s1 + $0x6e0] sm:$0xff]  }
  0x90   :  { %6736 = vmatpush3.bf16.msra.mxu0 %v7434_v50  ;;  %v7485_v50 = vld [vmem:[%s9603_s1 + $0x640] sm:$0xff]  }
  0x91   :  { %6737 = vmatprep.subr.bf16.mxu0 %v7436_v52  ;;  %v7487_v52 = vld [vmem:[%s9603_s1 + $0x600] sm:$0xff]  }
  0x92   :  { %6758 = vmatpush3.bf16.msra.mxu1 %v7435_v51  ;;  %v7486_v51 = vld [vmem:[%s9603_s1 + $0x6c0] sm:$0xff]  }
  0x93   :  { %6759 = vmatprep.subr.bf16.mxu1 %v7437_v53  ;;  %v7488_v53 = vld [vmem:[%s9603_s1 + $0x680] sm:$0xff]  }
  0x94   :  { %6738 = vmatpush3.bf16.msra.mxu0 %v7438_v54  ;;  %v1213_v54 = vcombine.high %v1197_v49, %v1197_v49 }
  0x95   :  { %6739 = vmatprep.subr.bf16.mxu0 %v7440_v56  ;;  %v7490_v56 = vld [vmem:[%s9603_s1 + $0x6c8] sm:$0xff]  }
  0x96   :  { %6760 = vmatpush3.bf16.msra.mxu1 %v7439_v55  ;;  %v7489_v55 = vld [vmem:[%s9603_s1 + $0x648] sm:$0xff]  }
  0x97   :  { %6761 = vmatprep.subr.bf16.mxu1 %v7441_v57  ;;  %v7491_v57 = vld [vmem:[%s9603_s1 + $0x608] sm:$0xff]  }
  0x98   :  { %6740 = vmatpush3.bf16.msra.mxu0 %v7442_v58  ;;  %v7492_v58 = vld [vmem:[%s9603_s1 + $0x688] sm:$0xff]  }
  0x99   :  { %6741 = vmatprep.subr.bf16.mxu0 %v7444_v60  ;;  %v7494_v60 = vld [vmem:[%s9603_s1 + $0x6d0] sm:$0xff]  }
  0x9a   :  { %6762 = vmatpush3.bf16.msra.mxu1 %v7443_v59  ;;  %v7493_v59 = vld [vmem:[%s9603_s1 + $0x650] sm:$0xff]  }
  0x9b   :  { %6763 = vmatprep.subr.bf16.mxu1 %v7445_v62  ;;  %v7496_v62 = vld [vmem:[%s9603_s1 + $0x690] sm:$0xff]  }
  0x9c   :  { %6742 = vmatpush3.bf16.msra.mxu0 %v7446_v1  ;;  %v7499_v1 = vld [vmem:[%s9603_s1 + $0x618] sm:$0xff]  }
  0x9d   :  { %6743 = vmatprep.subr.bf16.mxu0 %v7448_v5  ;;  %v7503_v5 = vld [vmem:[%s9603_s1 + $0x620] sm:$0xff]  }
  0x9e   :  { %6764 = vmatpush3.bf16.msra.mxu1 %v7447_v2  ;;  %v7500_v2 = vld [vmem:[%s9603_s1 + $0x698] sm:$0xff]  }
  0x9f   :  { %6765 = vmatprep.subr.bf16.mxu1 %v7449_v6  ;;  %v7504_v6 = vld [vmem:[%s9603_s1 + $0x6a0] sm:$0xff]  }
  0xa0   :  { %6744 = vmatpush3.bf16.msra.mxu0 %v7450_v9  ;;  %v7507_v9 = vld [vmem:[%s9603_s1 + $0x628] sm:$0xff]  }
  0xa1   :  { %6773 = vmatprep.subr.bf16.mxu0 %v7452_v13  ;;  %v7510_v13 = vld [vmem:[%s9603_s1 + $0x6f0] sm:$0xff]  }
  0xa2   :  { %6766 = vmatpush3.bf16.msra.mxu1 %v7451_v10  ;;  %v7508_v10 = vld [vmem:[%s9603_s1 + $0x6a8] sm:$0xff]  }
  0xa3   :  { %4950 = vmatmul.mubr.bf16.vlgmr.msra.gmra.mrb[16].mxu0 %v1190_v12  ;;  %6795 = vmatprep.subr.bf16.mxu1 %v7453_v14  ;;  %v25_v12 = vld [vmem:[%s9602_s0 + $0x18] sm:$0xff] }
  0xa4   :  { %6774 = vmatpush3.bf16.msra.mxu0 %v7454_v16  ;;  %5029 = vmatprep.mubr.bf16.mxu0 %v1211_v15  ;;  %v1223_v14 = vrot.slane %v25_v12, %v7989_v41  ;;  %v1216_v15 = vcombine.high %v25_v12, %v25_v12  ;;  %v7511_v16 = vld [vmem:[%s9603_s1 + $0x630] sm:$0xff]   ;;  %v7548_v12 = vld [vmem:[%s9603_s1 + $0x7b8] sm:$0xff]  }
  0xa5   :  { %4990 = vmatmul.mubr.bf16.vlgmr.msra.gmra.mrb[16].mxu1 %v1212_v18  ;;  %6775 = vmatprep.subr.bf16.mxu0 %v7456_v19 }
  0xa6   :  { %6796 = vmatpush3.bf16.msra.mxu1 %v7455_v17  ;;  %5069 = vmatprep.mubr.bf16.mxu1 %v1215_v21  ;;  %v7513_v17 = vld [vmem:[%s9603_s1 + $0x678] sm:$0xff]   ;;  %v1231_v18 = vcombine.high %v1223_v14, %v1223_v14  ;;  %v8593_v19 = vrot.slane %v1216_v15, %v7989_v41  ;;  %v7551_v15 = vld [vmem:[%s9603_s1 + $0x8c0] sm:$0xff]  }
  0xa7   :  { %6797 = vmatprep.subr.bf16.mxu1 %v7457_v20  ;;  %v7512_v20 = vld [vmem:[%s9603_s1 + $0x6b0] sm:$0xff]   ;;  %v7514_v21 = vld [vmem:[%s9603_s1 + $0x6f8] sm:$0xff]  }
  0xa8   :  { %6776 = vmatpush3.bf16.msra.mxu0 %v7458_v22  ;;  %v1253_v22 = vrot.slane %v1231_v18, %v7989_v41 }
  0xa9   :  { %6777 = vmatprep.subr.bf16.mxu0 %v7460_v24  ;;  %v7515_v24 = vld [vmem:[%s9603_s1 + $0x638] sm:$0xff]  }
  0xaa   :  { %6798 = vmatpush3.bf16.msra.mxu1 %v7459_v23  ;;  %v1232_v23 = vcombine.high %v8593_v19, %v8593_v19 }
  0xab   :  { %6799 = vmatprep.subr.bf16.mxu1 %v7461_v25  ;;  %v1263_v25 = vcombine.high %v1253_v22, %v1253_v22 }
  0xac   :  { %6778 = vmatpush3.bf16.msra.mxu0 %v7462_v26  ;;  %v1239_v26 = vrot.slane %v1223_v14, %v7989_v41  ;;  %v7550_v14 = vld [vmem:[%s9603_s1 + $0x840] sm:$0xff]  }
  0xad   :  { %6779 = vmatprep.subr.bf16.mxu0 %v7464_v28  ;;  %v7516_v28 = vld [vmem:[%s9603_s1 + $0x6b8] sm:$0xff]  }
  0xae   :  { %6800 = vmatpush3.bf16.msra.mxu1 %v7463_v27  ;;  %v7517_v27 = vld [vmem:[%s9603_s1 + $0x740] sm:$0xff]  }
  0xaf   :  { %6801 = vmatprep.subr.bf16.mxu1 %v7465_v29  ;;  %v1260_v29 = vrot.slane %v1232_v23, %v7989_v41  ;;  %v7558_v23 = vld [vmem:[%s9603_s1 + $0x850] sm:$0xff]  }
  0xb0   :  { %6780 = vmatpush3.bf16.msra.mxu0 %v7466_v30  ;;  %v7518_v30 = vld [vmem:[%s9603_s1 + $0x7c0] sm:$0xff]  }
  0xb1   :  { %6781 = vmatprep.subr.bf16.mxu0 %v7468_v32  ;;  %v1261_v32 = vcombine.high %v1239_v26, %v1239_v26 }
  0xb2   :  { %6802 = vmatpush3.bf16.msra.mxu1 %v7467_v31  ;;  %v7519_v31 = vld [vmem:[%s9603_s1 + $0x700] sm:$0xff]  }
  0xb3   :  { %6803 = vmatprep.subr.bf16.mxu1 %v7469_v33  ;;  %v7521_v33 = vld [vmem:[%s9603_s1 + $0x748] sm:$0xff]  }
  0xb4   :  { %6782 = vmatpush3.bf16.msra.mxu0 %v7470_v34  ;;  %v7520_v34 = vld [vmem:[%s9603_s1 + $0x780] sm:$0xff]  }
  0xb5   :  { %6783 = vmatprep.subr.bf16.mxu0 %v7472_v36  ;;  %v7522_v36 = vld [vmem:[%s9603_s1 + $0x7c8] sm:$0xff]  }
  0xb6   :  { %6804 = vmatpush3.bf16.msra.mxu1 %v7471_v35  ;;  %v1264_v35 = vcombine.high %v1260_v29, %v1260_v29 }
  0xb7   :  { %6805 = vmatprep.subr.bf16.mxu1 %v7473_v37  ;;  %v7523_v37 = vld [vmem:[%s9603_s1 + $0x708] sm:$0xff]  }
  0xb8   :  { %6784 = vmatpush3.bf16.msra.mxu0 %v7474_v38  ;;  %v7525_v38 = vld [vmem:[%s9603_s1 + $0x750] sm:$0xff]  }
  0xb9   :  { %6785 = vmatprep.subr.bf16.mxu0 %v7476_v40  ;;  %v7526_v40 = vld [vmem:[%s9603_s1 + $0x7d0] sm:$0xff]  }
  0xba   :  { %6806 = vmatpush3.bf16.msra.mxu1 %v7475_v39  ;;  %v7524_v39 = vld [vmem:[%s9603_s1 + $0x788] sm:$0xff]  }
  0xbb   :  { %6807 = vmatprep.subr.bf16.mxu1 %v7477_v42  ;;  %v7527_v42 = vld [vmem:[%s9603_s1 + $0x710] sm:$0xff]  }
  0xbc   :  { %6786 = vmatpush3.bf16.msra.mxu0 %v7478_v43  ;;  %v7529_v43 = vld [vmem:[%s9603_s1 + $0x758] sm:$0xff]  }
  0xbd   :  { %6787 = vmatprep.subr.bf16.mxu0 %v7480_v45  ;;  %v7530_v45 = vld [vmem:[%s9603_s1 + $0x7d8] sm:$0xff]  }
  0xbe   :  { %6808 = vmatpush3.bf16.msra.mxu1 %v7479_v44  ;;  %v7528_v44 = vld [vmem:[%s9603_s1 + $0x790] sm:$0xff]  }
  0xbf   :  { %6809 = vmatprep.subr.bf16.mxu1 %v7481_v46  ;;  %v7531_v46 = vld [vmem:[%s9603_s1 + $0x718] sm:$0xff]  }
  0xc0   :  { %6788 = vmatpush3.bf16.msra.mxu0 %v7482_v47  ;;  %v7532_v47 = vld [vmem:[%s9603_s1 + $0x798] sm:$0xff]  }
  0xc1   :  { %6817 = vmatprep.subr.bf16.mxu0 %v7485_v50  ;;  %v7535_v50 = vld [vmem:[%s9603_s1 + $0x720] sm:$0xff]  }
  0xc2   :  { %6810 = vmatpush3.bf16.msra.mxu1 %v7483_v48  ;;  %v7533_v48 = vld [vmem:[%s9603_s1 + $0x760] sm:$0xff]  }
  0xc3   :  { %5030 = vmatmul.mubr.bf16.vlgmr.msra.gmra.mrb[20].mxu0 %v1197_v49  ;;  %6839 = vmatprep.subr.bf16.mxu1 %v7486_v51  ;;  %v7534_v49 = vld [vmem:[%s9603_s1 + $0x7e0] sm:$0xff]  }
  0xc4   :  { %6818 = vmatpush3.bf16.msra.mxu0 %v7487_v52  ;;  %5109 = vmatprep.mubr.bf16.mxu0 %v1253_v22  ;;  %v7536_v51 = vld [vmem:[%s9603_s1 + $0x7a0] sm:$0xff]   ;;  %v7537_v52 = vld [vmem:[%s9603_s1 + $0x768] sm:$0xff]  }
  0xc5   :  { %5070 = vmatmul.mubr.bf16.vlgmr.msra.gmra.mrb[20].mxu1 %v1213_v54  ;;  %6819 = vmatprep.subr.bf16.mxu0 %v7489_v55  ;;  %v7539_v54 = vld [vmem:[%s9603_s1 + $0x728] sm:$0xff]  }
  0xc6   :  { %6840 = vmatpush3.bf16.msra.mxu1 %v7488_v53  ;;  %5149 = vmatprep.mubr.bf16.mxu1 %v1263_v25  ;;  %v7538_v53 = vld [vmem:[%s9603_s1 + $0x7e8] sm:$0xff]   ;;  %v7560_v25 = vld [vmem:[%s9603_s1 + $0x810] sm:$0xff]  }
  0xc7   :  { %6841 = vmatprep.subr.bf16.mxu1 %v7490_v56  ;;  %v7540_v55 = vld [vmem:[%s9603_s1 + $0x7a8] sm:$0xff]   ;;  %v6031_v56 = vld [vmem:[%s9604_s2] ss:$0 sm:$0xff] }
  0xc8   :  { %6820 = vmatpush3.bf16.msra.mxu0 %v7491_v57  ;;  %v7541_v57 = vld [vmem:[%s9603_s1 + $0x770] sm:$0xff]   ;;  %v7557_v22 = vld [vmem:[%s9603_s1 + $0x888] sm:$0xff]  }
  0xc9   :  { %6821 = vmatprep.subr.bf16.mxu0 %v7493_v59  ;;  %v7542_v59 = vld [vmem:[%s9603_s1 + $0x7f0] sm:$0xff]  }
  0xca   :  { %6842 = vmatpush3.bf16.msra.mxu1 %v7492_v58 }
  0xcb   :  { %6843 = vmatprep.subr.bf16.mxu1 %v7494_v60 }
  0xcc   :  { %6822 = vmatpush3.bf16.msra.mxu0 %v7495_v61  ;;  %v7543_v61 = vld [vmem:[%s9603_s1 + $0x730] sm:$0xff]  }
  0xcd   :  { %6823 = vmatprep.subr.bf16.mxu0 %v7497_v63 }
  0xce   :  { %6844 = vmatpush3.bf16.msra.mxu1 %v7496_v62 }
  0xcf   :  { %6845 = vmatprep.subr.bf16.mxu1 %v7498_v0 }
  0xd0   :  { %6824 = vmatpush3.bf16.msra.mxu0 %v7499_v1  ;;  %v7544_v1 = vld [vmem:[%s9603_s1 + $0x7b0] sm:$0xff]  }
  0xd1   :  { %6825 = vmatprep.subr.bf16.mxu0 %v7501_v3 }
  0xd2   :  { %6846 = vmatpush3.bf16.msra.mxu1 %v7500_v2  ;;  %v7545_v2 = vld [vmem:[%s9603_s1 + $0x778] sm:$0xff]  }
  0xd3   :  { %6847 = vmatprep.subr.bf16.mxu1 %v7502_v4 }
  0xd4   :  { %6826 = vmatpush3.bf16.msra.mxu0 %v7503_v5 }
  0xd5   :  { %6827 = vmatprep.subr.bf16.mxu0 %v7505_v7 }
  0xd6   :  { %6848 = vmatpush3.bf16.msra.mxu1 %v7504_v6 }
  0xd7   :  { %6849 = vmatprep.subr.bf16.mxu1 %v7506_v8  ;;  %v7546_v8 = vld [vmem:[%s9603_s1 + $0x7f8] sm:$0xff]  }
  0xd8   :  { %6828 = vmatpush3.bf16.msra.mxu0 %v7507_v9 }
  0xd9   :  { %6829 = vmatprep.subr.bf16.mxu0 %v7509_v11 }
  0xda   :  { %6850 = vmatpush3.bf16.msra.mxu1 %v7508_v10  ;;  %v7547_v10 = vld [vmem:[%s9603_s1 + $0x738] sm:$0xff]  }
  0xdb   :  { %6851 = vmatprep.subr.bf16.mxu1 %v7510_v13  ;;  %v1246_v13 = vrot.slane %v8593_v19, %v7989_v41  ;;  %v7554_v19 = vld [vmem:[%s9603_s1 + $0x848] sm:$0xff]  }
  0xdc   :  { %6830 = vmatpush3.bf16.msra.mxu0 %v7511_v16  ;;  %v7552_v16 = vld [vmem:[%s9603_s1 + $0x800] sm:$0xff]  }
  0xdd   :  { %6831 = vmatprep.subr.bf16.mxu0 %v7513_v17  ;;  %v7553_v17 = vld [vmem:[%s9603_s1 + $0x880] sm:$0xff]   ;;  %v1262_v18 = vcombine.high %v1246_v13, %v1246_v13 }
  0xde   :  { %6852 = vmatpush3.bf16.msra.mxu1 %v7512_v20  ;;  %v7555_v20 = vld [vmem:[%s9603_s1 + $0x8c8] sm:$0xff]  }
  0xdf   :  { %6853 = vmatprep.subr.bf16.mxu1 %v7514_v21  ;;  %v7556_v21 = vld [vmem:[%s9603_s1 + $0x808] sm:$0xff]  }
  0xe0   :  { %6832 = vmatpush3.bf16.msra.mxu0 %v7515_v24  ;;  %v7559_v24 = vld [vmem:[%s9603_s1 + $0x8d0] sm:$0xff]  }
  0xe1   :  { %6861 = vmatprep.subr.bf16.mxu0 %v7517_v27  ;;  %v7562_v27 = vld [vmem:[%s9603_s1 + $0x858] sm:$0xff]  }
  0xe2   :  { %6854 = vmatpush3.bf16.msra.mxu1 %v7516_v28  ;;  %v7563_v28 = vld [vmem:[%s9603_s1 + $0x8d8] sm:$0xff]  }
  0xe3   :  { %5110 = vmatmul.mubr.bf16.vlgmr.msra.gmra.mrb[24].mxu0 %v1239_v26  ;;  %6883 = vmatprep.subr.bf16.mxu1 %v7518_v30  ;;  %v7561_v26 = vld [vmem:[%s9603_s1 + $0x890] sm:$0xff]   ;;  %v7565_v30 = vld [vmem:[%s9603_s1 + $0x898] sm:$0xff]  }
  0xe4   :  { %6862 = vmatpush3.bf16.msra.mxu0 %v7519_v31  ;;  %5189 = vmatprep.mubr.bf16.mxu0 %v1260_v29  ;;  %v7564_v29 = vld [vmem:[%s9603_s1 + $0x818] sm:$0xff]   ;;  %v7566_v31 = vld [vmem:[%s9603_s1 + $0x860] sm:$0xff]  }
  0xe5   :  { %5150 = vmatmul.mubr.bf16.vlgmr.msra.gmra.mrb[24].mxu1 %v1261_v32  ;;  %6863 = vmatprep.subr.bf16.mxu0 %v7521_v33  ;;  %v7567_v32 = vld [vmem:[%s9603_s1 + $0x8e0] sm:$0xff]  }
  0xe6   :  { %6884 = vmatpush3.bf16.msra.mxu1 %v7520_v34  ;;  %5229 = vmatprep.mubr.bf16.mxu1 %v1264_v35  ;;  %v7568_v33 = vld [vmem:[%s9603_s1 + $0x820] sm:$0xff]   ;;  %v7570_v35 = vld [vmem:[%s9603_s1 + $0x868] sm:$0xff]  }
  0xe7   :  { %6885 = vmatprep.subr.bf16.mxu1 %v7522_v36  ;;  %v7569_v34 = vld [vmem:[%s9603_s1 + $0x8a0] sm:$0xff]   ;;  %v7571_v36 = vld [vmem:[%s9603_s1 + $0x8e8] sm:$0xff]  }
  0xe8   :  { %6864 = vmatpush3.bf16.msra.mxu0 %v7523_v37  ;;  %v7572_v37 = vld [vmem:[%s9603_s1 + $0x828] sm:$0xff]  }
  0xe9   :  { %6865 = vmatprep.subr.bf16.mxu0 %v7525_v38  ;;  %v7573_v38 = vld [vmem:[%s9603_s1 + $0x8a8] sm:$0xff]  }
  0xea   :  { %6886 = vmatpush3.bf16.msra.mxu1 %v7524_v39  ;;  %v7574_v39 = vld [vmem:[%s9603_s1 + $0x870] sm:$0xff]  }
  0xeb   :  { %6887 = vmatprep.subr.bf16.mxu1 %v7526_v40  ;;  %v7575_v40 = vld [vmem:[%s9603_s1 + $0x8f0] sm:$0xff]  }
  0xec   :  { %6866 = vmatpush3.bf16.msra.mxu0 %v7527_v42 }
  0xed   :  { %6867 = vmatprep.subr.bf16.mxu0 %v7529_v43  ;;  %v7576_v43 = vld [vmem:[%s9603_s1 + $0x830] sm:$0xff]  }
  0xee   :  { %6888 = vmatpush3.bf16.msra.mxu1 %v7528_v44 }
  0xef   :  { %6889 = vmatprep.subr.bf16.mxu1 %v7530_v45  ;;  %v26_v45 = vld [vmem:[%s9602_s0 + $0x20] sm:$0xff] }
  0xf0   :  { %6868 = vmatpush3.bf16.msra.mxu0 %v7531_v46 }
  0xf1   :  { %6869 = vmatprep.subr.bf16.mxu0 %v7533_v48 }
  0xf2   :  { %6890 = vmatpush3.bf16.msra.mxu1 %v7532_v47 }
  0xf3   :  { %6891 = vmatprep.subr.bf16.mxu1 %v7534_v49  ;;  %v7577_v49 = vld [vmem:[%s9603_s1 + $0x8b0] sm:$0xff]  }
  0xf4   :  { %6870 = vmatpush3.bf16.msra.mxu0 %v7535_v50  ;;  %v7578_v50 = vld [vmem:[%s9603_s1 + $0x878] sm:$0xff]  }
  0xf5   :  { %6871 = vmatprep.subr.bf16.mxu0 %v7537_v52  ;;  %v1265_v52 = vcombine.high %v26_v45, %v26_v45 }
  0xf6   :  { %6892 = vmatpush3.bf16.msra.mxu1 %v7536_v51  ;;  %v6569_v58 = vpop.f32.mrb[0].mxu0  ;;  %v1272_v51 = vrot.slane %v26_v45, %v7989_v41 }
  0xf7   :  { %v6570_v60 = vpop.f32.mrb[1].mxu0  ;;  %6893 = vmatprep.subr.bf16.mxu1 %v7538_v53  ;;  %v6591_v62 = vpop.f32.mrb[0].mxu1 }
  0xf8   :  { %v6571_v63 = vadd.f32 %v6570_v60, %v6569_v58  ;;  %v6572_v0 = vpop.f32.mrb[2].mxu0  ;;  %6872 = vmatpush3.bf16.msra.mxu0 %v7539_v54  ;;  %v6592_v3 = vpop.f32.mrb[1].mxu1  ;;  %v7579_v58 = vld [vmem:[%s9603_s1 + $0x8f8] sm:$0xff]  }
  0xf9   :  { %v6573_v4 = vpop.f32.mrb[3].mxu0  ;;  %6873 = vmatprep.subr.bf16.mxu0 %v7541_v57  ;;  %v6593_v6 = vadd.f32 %v6592_v3, %v6591_v62  ;;  %v6594_v7 = vpop.f32.mrb[2].mxu1  ;;  %v8814_v62 = vrot.slane %v1265_v52, %v7989_v41  ;;  %v7581_v0 = vld [vmem:[%s9603_s1 + $0x8b8] sm:$0xff]   ;;  %v7582_v3 = vld [vmem:[%s9603_s1 + $0x940] sm:$0xff]  }
  0xfa   :  { %v4632_v5 = vadd.f32 %v6571_v63, %v6031_v56  ;;  %6894 = vmatpush3.bf16.msra.mxu1 %v7540_v55  ;;  %v6595_v9 = vpop.f32.mrb[3].mxu1  ;;  %v7584_v7 = vld [vmem:[%s9603_s1 + $0x900] sm:$0xff]   ;;  %v7613_v52 = vld [vmem:[%s9603_s1 + $0x9b8] sm:$0xff]  }
  0xfb   :  { %6895 = vmatprep.subr.bf16.mxu1 %v7542_v59  ;;  %v1280_v59 = vcombine.high %v1272_v51, %v1272_v51  ;;  %v1281_v4 = vcombine.high %v8814_v62, %v8814_v62  ;;  %v7585_v9 = vld [vmem:[%s9603_s1 + $0x980] sm:$0xff]  }
  0xfc   :  { %v8708_v11 = vadd.f32 %v6593_v6, %v4632_v5  ;;  %6874 = vmatpush3.bf16.msra.mxu0 %v7543_v61  ;;  %v7580_v61 = vld [vmem:[%s9603_s1 + $0x838] sm:$0xff]   ;;  %v7583_v6 = vld [vmem:[%s9603_s1 + $0x9c0] sm:$0xff]  }
  0xfd   :  { %6875 = vmatprep.subr.bf16.mxu0 %v7545_v2  ;;  %v1288_v2 = vrot.slane %v1272_v51, %v7989_v41 }
  0xfe   :  { %6896 = vmatpush3.bf16.msra.mxu1 %v7544_v1  ;;  %v1302_v1 = vrot.slane %v1280_v59, %v7989_v41  ;;  %v7619_v59 = vld [vmem:[%s9603_s1 + $0xa48] sm:$0xff]  }
  0xff   :  { %6897 = vmatprep.subr.bf16.mxu1 %v7546_v8  ;;  %v1309_v8 = vrot.slane %v1281_v4, %v7989_v41  ;;  %v7628_v4 = vld [vmem:[%s9603_s1 + $0xad8] sm:$0xff]  }
 0x100   :  { %6876 = vmatpush3.bf16.msra.mxu0 %v7547_v10  ;;  %v1312_v5 = vcombine.high %v1302_v1, %v1302_v1  ;;  %v1310_v10 = vcombine.high %v1288_v2, %v1288_v2 }
 0x101   :  { %6905 = vmatprep.subr.bf16.mxu0 %v7550_v14  ;;  %v7588_v14 = vld [vmem:[%s9603_s1 + $0x908] sm:$0xff]  }
 0x102   :  { %6898 = vmatpush3.bf16.msra.mxu1 %v7548_v12  ;;  %v7587_v12 = vld [vmem:[%s9603_s1 + $0x9c8] sm:$0xff]  }
 0x103   :  { %5190 = vmatmul.mubr.bf16.vlgmr.msra.gmra.mrb[28].mxu0 %v1246_v13  ;;  %6927 = vmatprep.subr.bf16.mxu1 %v7551_v15  ;;  %v1313_v13 = vcombine.high %v1309_v8, %v1309_v8  ;;  %v7589_v15 = vld [vmem:[%s9603_s1 + $0x988] sm:$0xff]  }
 0x104   :  { %6906 = vmatpush3.bf16.msra.mxu0 %v7552_v16  ;;  %5269 = vmatprep.mubr.bf16.mxu0 %v1302_v1  ;;  %v7590_v16 = vld [vmem:[%s9603_s1 + $0x950] sm:$0xff]  }
 0x105   :  { %5230 = vmatmul.mubr.bf16.vlgmr.msra.gmra.mrb[28].mxu1 %v1262_v18  ;;  %6907 = vmatprep.subr.bf16.mxu0 %v7554_v19  ;;  %v7592_v18 = vld [vmem:[%s9603_s1 + $0x910] sm:$0xff]  }
 0x106   :  { %6928 = vmatpush3.bf16.msra.mxu1 %v7553_v17  ;;  %5309 = vmatprep.mubr.bf16.mxu1 %v1312_v5  ;;  %v7591_v17 = vld [vmem:[%s9603_s1 + $0x9d0] sm:$0xff]   ;;  %v7629_v5 = vld [vmem:[%s9603_s1 + $0xa18] sm:$0xff]  }
 0x107   :  { %6929 = vmatprep.subr.bf16.mxu1 %v7555_v20  ;;  %v7593_v19 = vld [vmem:[%s9603_s1 + $0x990] sm:$0xff]   ;;  %v7594_v20 = vld [vmem:[%s9603_s1 + $0x958] sm:$0xff]  }
 0x108   :  { %6908 = vmatpush3.bf16.msra.mxu0 %v7556_v21  ;;  %v7595_v21 = vld [vmem:[%s9603_s1 + $0x9d8] sm:$0xff]   ;;  %v7625_v1 = vld [vmem:[%s9603_s1 + $0xa10] sm:$0xff]  }
 0x109   :  { %6909 = vmatprep.subr.bf16.mxu0 %v7558_v23  ;;  %v7597_v23 = vld [vmem:[%s9603_s1 + $0x998] sm:$0xff]  }
 0x10a   :  { %6930 = vmatpush3.bf16.msra.mxu1 %v7557_v22  ;;  %v7596_v22 = vld [vmem:[%s9603_s1 + $0x918] sm:$0xff]  }
 0x10b   :  { %6931 = vmatprep.subr.bf16.mxu1 %v7559_v24  ;;  %v7598_v24 = vld [vmem:[%s9603_s1 + $0x960] sm:$0xff]  }
 0x10c   :  { %6910 = vmatpush3.bf16.msra.mxu0 %v7560_v25  ;;  %v7599_v25 = vld [vmem:[%s9603_s1 + $0x9e0] sm:$0xff]  }
 0x10d   :  { %6911 = vmatprep.subr.bf16.mxu0 %v7562_v27  ;;  %v7601_v27 = vld [vmem:[%s9603_s1 + $0x9a0] sm:$0xff]  }
 0x10e   :  { %6932 = vmatpush3.bf16.msra.mxu1 %v7561_v26  ;;  %v7600_v26 = vld [vmem:[%s9603_s1 + $0x920] sm:$0xff]  }
 0x10f   :  { %6933 = vmatprep.subr.bf16.mxu1 %v7563_v28  ;;  %v7602_v28 = vld [vmem:[%s9603_s1 + $0x968] sm:$0xff]  }
 0x110   :  { %6912 = vmatpush3.bf16.msra.mxu0 %v7564_v29  ;;  %v7603_v29 = vld [vmem:[%s9603_s1 + $0x9e8] sm:$0xff]  }
 0x111   :  { %6913 = vmatprep.subr.bf16.mxu0 %v7566_v31  ;;  %v7605_v31 = vld [vmem:[%s9603_s1 + $0x9a8] sm:$0xff]  }
 0x112   :  { %6934 = vmatpush3.bf16.msra.mxu1 %v7565_v30  ;;  %v7604_v30 = vld [vmem:[%s9603_s1 + $0x928] sm:$0xff]  }
 0x113   :  { %6935 = vmatprep.subr.bf16.mxu1 %v7567_v32  ;;  %v7606_v32 = vld [vmem:[%s9603_s1 + $0x970] sm:$0xff]  }
 0x114   :  { %6914 = vmatpush3.bf16.msra.mxu0 %v7568_v33 }
 0x115   :  { %6915 = vmatprep.subr.bf16.mxu0 %v7570_v35 }
 0x116   :  { %6936 = vmatpush3.bf16.msra.mxu1 %v7569_v34  ;;  %v6613_v42 = vpop.f32.mrb[4].mxu0  ;;  %v7607_v34 = vld [vmem:[%s9603_s1 + $0x9f0] sm:$0xff]  }
 0x117   :  { %v6614_v44 = vpop.f32.mrb[5].mxu0  ;;  %6937 = vmatprep.subr.bf16.mxu1 %v7571_v36  ;;  %v6635_v46 = vpop.f32.mrb[4].mxu1  ;;  %v7608_v36 = vld [vmem:[%s9603_s1 + $0x930] sm:$0xff]  }
 0x118   :  { %v6615_v47 = vadd.f32 %v6614_v44, %v6613_v42  ;;  %v6616_v48 = vpop.f32.mrb[6].mxu0  ;;  %6916 = vmatpush3.bf16.msra.mxu0 %v7572_v37  ;;  %v6636_v53 = vpop.f32.mrb[5].mxu1  ;;  %v7610_v42 = vld [vmem:[%s9603_s1 + $0x978] sm:$0xff]  }
 0x119   :  { %v6617_v54 = vpop.f32.mrb[7].mxu0  ;;  %6917 = vmatprep.subr.bf16.mxu0 %v7574_v39  ;;  %v6637_v56 = vadd.f32 %v6636_v53, %v6635_v46  ;;  %v6638_v57 = vpop.f32.mrb[6].mxu1  ;;  %v7611_v48 = vld [vmem:[%s9603_s1 + $0x9f8] sm:$0xff]   ;;  %v1295_v53 = vrot.slane %v8814_v62, %v7989_v41  ;;  %v7622_v62 = vld [vmem:[%s9603_s1 + $0xa88] sm:$0xff]  }
 0x11a   :  { %v4712_v55 = vadd.f32 %v6615_v47, %v8708_v11  ;;  %6938 = vmatpush3.bf16.msra.mxu1 %v7573_v38  ;;  %v6639_v60 = vpop.f32.mrb[7].mxu1  ;;  %v7586_v11 = vld [vmem:[%s9603_s1 + $0x948] sm:$0xff]   ;;  %v7615_v54 = vld [vmem:[%s9603_s1 + $0xa40] sm:$0xff]  }
 0x11b   :  { %6939 = vmatprep.subr.bf16.mxu1 %v7575_v40  ;;  %v7609_v40 = vld [vmem:[%s9603_s1 + $0x9b0] sm:$0xff]   ;;  %v7618_v57 = vld [vmem:[%s9603_s1 + $0xa80] sm:$0xff]   ;;  %v7620_v60 = vld [vmem:[%s9603_s1 + $0xac8] sm:$0xff]  }
 0x11c   :  { %v8816_v63 = vadd.f32 %v6637_v56, %v4712_v55  ;;  %6918 = vmatpush3.bf16.msra.mxu0 %v7576_v43  ;;  %v7616_v55 = vld [vmem:[%s9603_s1 + $0xac0] sm:$0xff]  }
 0x11d   :  { %6919 = vmatprep.subr.bf16.mxu0 %v7578_v50  ;;  %v7612_v50 = vld [vmem:[%s9603_s1 + $0x938] sm:$0xff]   ;;  %v7617_v56 = vld [vmem:[%s9603_s1 + $0xa00] sm:$0xff]  }
 0x11e   :  { %6940 = vmatpush3.bf16.msra.mxu1 %v7577_v49 }
 0x11f   :  { %6941 = vmatprep.subr.bf16.mxu1 %v7579_v58  ;;  %v1311_v58 = vcombine.high %v1295_v53, %v1295_v53 }
 0x120   :  { %6920 = vmatpush3.bf16.msra.mxu0 %v7580_v61  ;;  %v7621_v61 = vld [vmem:[%s9603_s1 + $0xa08] sm:$0xff]  }
 0x121   :  { %6949 = vmatprep.subr.bf16.mxu0 %v7582_v3  ;;  %v7627_v3 = vld [vmem:[%s9603_s1 + $0xa58] sm:$0xff]  }
 0x122   :  { %6942 = vmatpush3.bf16.msra.mxu1 %v7581_v0  ;;  %v7624_v0 = vld [vmem:[%s9603_s1 + $0xad0] sm:$0xff]  }
 0x123   :  { %5270 = vmatmul.mubr.bf16.vlgmr.msra.gmra.mrb[32].mxu0 %v1288_v2  ;;  %6971 = vmatprep.subr.bf16.mxu1 %v7583_v6  ;;  %v7626_v2 = vld [vmem:[%s9603_s1 + $0xa90] sm:$0xff]   ;;  %v7630_v6 = vld [vmem:[%s9603_s1 + $0xa98] sm:$0xff]  }
 0x124   :  { %6950 = vmatpush3.bf16.msra.mxu0 %v7584_v7  ;;  %5349 = vmatprep.mubr.bf16.mxu0 %v1309_v8  ;;  %v7631_v7 = vld [vmem:[%s9603_s1 + $0xa60] sm:$0xff]  }
 0x125   :  { %5310 = vmatmul.mubr.bf16.vlgmr.msra.gmra.mrb[32].mxu1 %v1310_v10  ;;  %6951 = vmatprep.subr.bf16.mxu0 %v7586_v11  ;;  %v7632_v8 = vld [vmem:[%s9603_s1 + $0xae0] sm:$0xff]   ;;  %v7635_v11 = vld [vmem:[%s9603_s1 + $0xa68] sm:$0xff]  }
 0x126   :  { %6972 = vmatpush3.bf16.msra.mxu1 %v7585_v9  ;;  %5389 = vmatprep.mubr.bf16.mxu1 %v1313_v13  ;;  %v7633_v9 = vld [vmem:[%s9603_s1 + $0xa20] sm:$0xff]   ;;  %v7637_v13 = vld [vmem:[%s9603_s1 + $0xa28] sm:$0xff]  }
 0x127   :  { %6973 = vmatprep.subr.bf16.mxu1 %v7587_v12  ;;  %v7634_v10 = vld [vmem:[%s9603_s1 + $0xaa0] sm:$0xff]   ;;  %v7636_v12 = vld [vmem:[%s9603_s1 + $0xae8] sm:$0xff]  }
 0x128   :  { %6952 = vmatpush3.bf16.msra.mxu0 %v7588_v14  ;;  %v7638_v14 = vld [vmem:[%s9603_s1 + $0xaa8] sm:$0xff]  }
 0x129   :  { %6953 = vmatprep.subr.bf16.mxu0 %v7590_v16 }
 0x12a   :  { %6974 = vmatpush3.bf16.msra.mxu1 %v7589_v15  ;;  %v7639_v15 = vld [vmem:[%s9603_s1 + $0xa70] sm:$0xff]  }
 0x12b   :  { %6975 = vmatprep.subr.bf16.mxu1 %v7591_v17  ;;  %v7640_v17 = vld [vmem:[%s9603_s1 + $0xaf0] sm:$0xff]  }
 0x12c   :  { %6954 = vmatpush3.bf16.msra.mxu0 %v7592_v18 }
 0x12d   :  { %6955 = vmatprep.subr.bf16.mxu0 %v7594_v20 }
 0x12e   :  { %6976 = vmatpush3.bf16.msra.mxu1 %v7593_v19  ;;  %v7641_v19 = vld [vmem:[%s9603_s1 + $0xa30] sm:$0xff]  }
 0x12f   :  { %6977 = vmatprep.subr.bf16.mxu1 %v7595_v21 }
 0x130   :  { %6956 = vmatpush3.bf16.msra.mxu0 %v7596_v22 }
 0x131   :  { %6957 = vmatprep.subr.bf16.mxu0 %v7598_v24  ;;  %v7643_v24 = vld [vmem:[%s9603_s1 + $0xa78] sm:$0xff]  }
 0x132   :  { %6978 = vmatpush3.bf16.msra.mxu1 %v7597_v23  ;;  %v7642_v23 = vld [vmem:[%s9603_s1 + $0xab0] sm:$0xff]  }
 0x133   :  { %6979 = vmatprep.subr.bf16.mxu1 %v7599_v25  ;;  %v27_v25 = vld [vmem:[%s9602_s0 + $0x28] sm:$0xff] }
 0x134   :  { %6958 = vmatpush3.bf16.msra.mxu0 %v7600_v26 }
 0x135   :  { %6959 = vmatprep.subr.bf16.mxu0 %v7602_v28  ;;  %v1321_v28 = vrot.slane %v27_v25, %v7989_v41 }
 0x136   :  { %6980 = vmatpush3.bf16.msra.mxu1 %v7601_v27  ;;  %v6657_v33 = vpop.f32.mrb[8].mxu0 }
 0x137   :  { %v6658_v35 = vpop.f32.mrb[9].mxu0  ;;  %6981 = vmatprep.subr.bf16.mxu1 %v7603_v29  ;;  %v1314_v29 = vcombine.high %v27_v25, %v27_v25  ;;  %v7677_v25 = vld [vmem:[%s9603_s1 + $0xb38] sm:$0xff]  }
 0x138   :  { %v6679_v37 = vpop.f32.mrb[8].mxu1  ;;  %v6659_v38 = vadd.f32 %v6658_v35, %v6657_v33  ;;  %v6660_v39 = vpop.f32.mrb[10].mxu0  ;;  %6960 = vmatpush3.bf16.msra.mxu0 %v7604_v30  ;;  %v7644_v33 = vld [vmem:[%s9603_s1 + $0xaf8] sm:$0xff]  }
 0x139   :  { %v6680_v43 = vpop.f32.mrb[9].mxu1  ;;  %v6661_v44 = vpop.f32.mrb[11].mxu0  ;;  %6961 = vmatprep.subr.bf16.mxu0 %v7606_v32  ;;  %v7645_v35 = vld [vmem:[%s9603_s1 + $0xa38] sm:$0xff]  }
 0x13a   :  { %v4792_v45 = vadd.f32 %v6659_v38, %v8816_v63  ;;  %v6681_v46 = vadd.f32 %v6680_v43, %v6679_v37  ;;  %v6682_v47 = vpop.f32.mrb[10].mxu1  ;;  %6982 = vmatpush3.bf16.msra.mxu1 %v7605_v31  ;;  %v7623_v63 = vld [vmem:[%s9603_s1 + $0xa50] sm:$0xff]   ;;  %v9026_v37 = vrot.slane %v1314_v29, %v7989_v41  ;;  %v7646_v39 = vld [vmem:[%s9603_s1 + $0xab8] sm:$0xff]   ;;  %v7647_v43 = vld [vmem:[%s9603_s1 + $0xb40] sm:$0xff]  }
 0x13b   :  { %v6683_v49 = vpop.f32.mrb[11].mxu1  ;;  %6983 = vmatprep.subr.bf16.mxu1 %v7607_v34  ;;  %v7649_v47 = vld [vmem:[%s9603_s1 + $0xb00] sm:$0xff]  }
 0x13c   :  { %v8920_v51 = vadd.f32 %v6681_v46, %v4792_v45  ;;  %6962 = vmatpush3.bf16.msra.mxu0 %v7608_v36  ;;  %v1329_v36 = vcombine.high %v1321_v28, %v1321_v28  ;;  %v1330_v44 = vcombine.high %v9026_v37, %v9026_v37  ;;  %v7648_v45 = vld [vmem:[%s9603_s1 + $0xbc0] sm:$0xff]  }
 0x13d   :  { %6963 = vmatprep.subr.bf16.mxu0 %v7610_v42  ;;  %v1337_v42 = vrot.slane %v1321_v28, %v7989_v41  ;;  %v7650_v49 = vld [vmem:[%s9603_s1 + $0xb80] sm:$0xff]   ;;  %v1344_v28 = vrot.slane %v9026_v37, %v7989_v41  ;;  %v7687_v37 = vld [vmem:[%s9603_s1 + $0xc88] sm:$0xff]  }
 0x13e   :  { %6984 = vmatpush3.bf16.msra.mxu1 %v7609_v40  ;;  %v1351_v40 = vrot.slane %v1329_v36, %v7989_v41  ;;  %v7680_v29 = vld [vmem:[%s9603_s1 + $0xc40] sm:$0xff]   ;;  %v7686_v36 = vld [vmem:[%s9603_s1 + $0xc08] sm:$0xff]  }
 0x13f   :  { %6985 = vmatprep.subr.bf16.mxu1 %v7611_v48  ;;  %v1358_v48 = vrot.slane %v1330_v44, %v7989_v41  ;;  %v7693_v44 = vld [vmem:[%s9603_s1 + $0xcd8] sm:$0xff]  }
 0x140   :  { %6964 = vmatpush3.bf16.msra.mxu0 %v7612_v50  ;;  %v1361_v46 = vcombine.high %v1351_v40, %v1351_v40  ;;  %v1359_v50 = vcombine.high %v1337_v42, %v1337_v42 }
 0x141   :  { %6993 = vmatprep.subr.bf16.mxu0 %v7615_v54  ;;  %v7653_v54 = vld [vmem:[%s9603_s1 + $0xb08] sm:$0xff]  }
 0x142   :  { %6986 = vmatpush3.bf16.msra.mxu1 %v7613_v52  ;;  %v7652_v52 = vld [vmem:[%s9603_s1 + $0xbc8] sm:$0xff]  }
 0x143   :  { %5350 = vmatmul.mubr.bf16.vlgmr.msra.gmra.mrb[36].mxu0 %v1295_v53  ;;  %7015 = vmatprep.subr.bf16.mxu1 %v7616_v55  ;;  %v1362_v53 = vcombine.high %v1358_v48, %v1358_v48  ;;  %v7654_v55 = vld [vmem:[%s9603_s1 + $0xb88] sm:$0xff]  }
 0x144   :  { %6994 = vmatpush3.bf16.msra.mxu0 %v7617_v56  ;;  %5429 = vmatprep.mubr.bf16.mxu0 %v1351_v40  ;;  %v7655_v56 = vld [vmem:[%s9603_s1 + $0xb50] sm:$0xff]  }
 0x145   :  { %5390 = vmatmul.mubr.bf16.vlgmr.msra.gmra.mrb[36].mxu1 %v1311_v58  ;;  %6995 = vmatprep.subr.bf16.mxu0 %v7619_v59  ;;  %v7657_v58 = vld [vmem:[%s9603_s1 + $0xb10] sm:$0xff]  }
 0x146   :  { %7016 = vmatpush3.bf16.msra.mxu1 %v7618_v57  ;;  %5469 = vmatprep.mubr.bf16.mxu1 %v1361_v46  ;;  %v7656_v57 = vld [vmem:[%s9603_s1 + $0xbd0] sm:$0xff]   ;;  %v7695_v46 = vld [vmem:[%s9603_s1 + $0xc98] sm:$0xff]  }
 0x147   :  { %7017 = vmatprep.subr.bf16.mxu1 %v7620_v60  ;;  %v7658_v59 = vld [vmem:[%s9603_s1 + $0xb90] sm:$0xff]   ;;  %v7659_v60 = vld [vmem:[%s9603_s1 + $0xb58] sm:$0xff]  }
 0x148   :  { %6996 = vmatpush3.bf16.msra.mxu0 %v7621_v61  ;;  %v7660_v61 = vld [vmem:[%s9603_s1 + $0xbd8] sm:$0xff]   ;;  %v7690_v40 = vld [vmem:[%s9603_s1 + $0xc10] sm:$0xff]  }
 0x149   :  { %6997 = vmatprep.subr.bf16.mxu0 %v7623_v63  ;;  %v7662_v63 = vld [vmem:[%s9603_s1 + $0xb98] sm:$0xff]  }
 0x14a   :  { %7018 = vmatpush3.bf16.msra.mxu1 %v7622_v62  ;;  %v7661_v62 = vld [vmem:[%s9603_s1 + $0xb18] sm:$0xff]  }
 0x14b   :  { %7019 = vmatprep.subr.bf16.mxu1 %v7624_v0  ;;  %v7663_v0 = vld [vmem:[%s9603_s1 + $0xb60] sm:$0xff]  }
 0x14c   :  { %6998 = vmatpush3.bf16.msra.mxu0 %v7625_v1  ;;  %v7664_v1 = vld [vmem:[%s9603_s1 + $0xbe0] sm:$0xff]  }
 0x14d   :  { %6999 = vmatprep.subr.bf16.mxu0 %v7627_v3  ;;  %v7666_v3 = vld [vmem:[%s9603_s1 + $0xba0] sm:$0xff]  }
 0x14e   :  { %7020 = vmatpush3.bf16.msra.mxu1 %v7626_v2  ;;  %v7665_v2 = vld [vmem:[%s9603_s1 + $0xb20] sm:$0xff]  }
 0x14f   :  { %7021 = vmatprep.subr.bf16.mxu1 %v7628_v4  ;;  %v7667_v4 = vld [vmem:[%s9603_s1 + $0xb68] sm:$0xff]  }
 0x150   :  { %7000 = vmatpush3.bf16.msra.mxu0 %v7629_v5  ;;  %v7668_v5 = vld [vmem:[%s9603_s1 + $0xbe8] sm:$0xff]  }
 0x151   :  { %7001 = vmatprep.subr.bf16.mxu0 %v7631_v7  ;;  %v7670_v7 = vld [vmem:[%s9603_s1 + $0xba8] sm:$0xff]  }
 0x152   :  { %7022 = vmatpush3.bf16.msra.mxu1 %v7630_v6  ;;  %v7669_v6 = vld [vmem:[%s9603_s1 + $0xb28] sm:$0xff]  }
 0x153   :  { %7023 = vmatprep.subr.bf16.mxu1 %v7632_v8  ;;  %v7671_v8 = vld [vmem:[%s9603_s1 + $0xb70] sm:$0xff]  }
 0x154   :  { %7002 = vmatpush3.bf16.msra.mxu0 %v7633_v9 }
 0x155   :  { %7003 = vmatprep.subr.bf16.mxu0 %v7635_v11 }
 0x156   :  { %7024 = vmatpush3.bf16.msra.mxu1 %v7634_v10  ;;  %v6701_v16 = vpop.f32.mrb[12].mxu0  ;;  %v7672_v10 = vld [vmem:[%s9603_s1 + $0xbf0] sm:$0xff]  }
 0x157   :  { %v6702_v18 = vpop.f32.mrb[13].mxu0  ;;  %7025 = vmatprep.subr.bf16.mxu1 %v7636_v12  ;;  %v7673_v12 = vld [vmem:[%s9603_s1 + $0xb30] sm:$0xff]  }
 0x158   :  { %v6723_v20 = vpop.f32.mrb[12].mxu1  ;;  %v6703_v21 = vadd.f32 %v6702_v18, %v6701_v16  ;;  %v6704_v22 = vpop.f32.mrb[14].mxu0  ;;  %7004 = vmatpush3.bf16.msra.mxu0 %v7637_v13  ;;  %v7674_v16 = vld [vmem:[%s9603_s1 + $0xbb0] sm:$0xff]  }
 0x159   :  { %v6724_v26 = vpop.f32.mrb[13].mxu1  ;;  %v6705_v27 = vpop.f32.mrb[15].mxu0  ;;  %7005 = vmatprep.subr.bf16.mxu0 %v7639_v15 }
 0x15a   :  { %v4872_v30 = vadd.f32 %v6703_v21, %v8920_v51  ;;  %v6725_v31 = vadd.f32 %v6724_v26, %v6723_v20  ;;  %v6726_v32 = vpop.f32.mrb[14].mxu1  ;;  %7026 = vmatpush3.bf16.msra.mxu1 %v7638_v14  ;;  %v7651_v51 = vld [vmem:[%s9603_s1 + $0xb48] sm:$0xff]   ;;  %v7678_v27 = vld [vmem:[%s9603_s1 + $0xbb8] sm:$0xff]  }
 0x15b   :  { %v6727_v34 = vpop.f32.mrb[15].mxu1  ;;  %7027 = vmatprep.subr.bf16.mxu1 %v7640_v17  ;;  %v7675_v17 = vld [vmem:[%s9603_s1 + $0xb78] sm:$0xff]   ;;  %v7683_v32 = vld [vmem:[%s9603_s1 + $0xc80] sm:$0xff]  }
 0x15c   :  { %v9028_v38 = vadd.f32 %v6725_v31, %v4872_v30  ;;  %7006 = vmatpush3.bf16.msra.mxu0 %v7641_v19  ;;  %v7681_v30 = vld [vmem:[%s9603_s1 + $0xcc0] sm:$0xff]   ;;  %v7684_v34 = vld [vmem:[%s9603_s1 + $0xc48] sm:$0xff]  }
 0x15d   :  { %7007 = vmatprep.subr.bf16.mxu0 %v7643_v24  ;;  %v7682_v31 = vld [vmem:[%s9603_s1 + $0xc00] sm:$0xff]  }
 0x15e   :  { %7028 = vmatpush3.bf16.msra.mxu1 %v7642_v23  ;;  %v7676_v23 = vld [vmem:[%s9603_s1 + $0xbf8] sm:$0xff]  }
 0x15f   :  { %7029 = vmatprep.subr.bf16.mxu1 %v7644_v33  ;;  %v1360_v33 = vcombine.high %v1344_v28, %v1344_v28 }
 0x160   :  { %7008 = vmatpush3.bf16.msra.mxu0 %v7645_v35  ;;  %v7685_v35 = vld [vmem:[%s9603_s1 + $0xcc8] sm:$0xff]  }
 0x161   :  { %7037 = vmatprep.subr.bf16.mxu0 %v7647_v43  ;;  %v7692_v43 = vld [vmem:[%s9603_s1 + $0xc58] sm:$0xff]  }
 0x162   :  { %7030 = vmatpush3.bf16.msra.mxu1 %v7646_v39  ;;  %v7689_v39 = vld [vmem:[%s9603_s1 + $0xcd0] sm:$0xff]  }
 0x163   :  { %5430 = vmatmul.mubr.bf16.vlgmr.msra.gmra.mrb[40].mxu0 %v1337_v42  ;;  %7059 = vmatprep.subr.bf16.mxu1 %v7648_v45  ;;  %v7691_v42 = vld [vmem:[%s9603_s1 + $0xc90] sm:$0xff]   ;;  %v7694_v45 = vld [vmem:[%s9603_s1 + $0xc18] sm:$0xff]  }
 0x164   :  { %7038 = vmatpush3.bf16.msra.mxu0 %v7649_v47  ;;  %5509 = vmatprep.mubr.bf16.mxu0 %v1358_v48  ;;  %v7696_v47 = vld [vmem:[%s9603_s1 + $0xc60] sm:$0xff]  }
 0x165   :  { %5470 = vmatmul.mubr.bf16.vlgmr.msra.gmra.mrb[40].mxu1 %v1359_v50  ;;  %7039 = vmatprep.subr.bf16.mxu0 %v7651_v51  ;;  %v7697_v48 = vld [vmem:[%s9603_s1 + $0xce0] sm:$0xff]   ;;  %v7700_v51 = vld [vmem:[%s9603_s1 + $0xc68] sm:$0xff]  }
 0x166   :  { %7060 = vmatpush3.bf16.msra.mxu1 %v7650_v49  ;;  %5549 = vmatprep.mubr.bf16.mxu1 %v1362_v53  ;;  %v7698_v49 = vld [vmem:[%s9603_s1 + $0xc20] sm:$0xff]   ;;  %v7702_v53 = vld [vmem:[%s9603_s1 + $0xc28] sm:$0xff]  }
 0x167   :  { %7061 = vmatprep.subr.bf16.mxu1 %v7652_v52  ;;  %v7699_v50 = vld [vmem:[%s9603_s1 + $0xca0] sm:$0xff]   ;;  %v7701_v52 = vld [vmem:[%s9603_s1 + $0xce8] sm:$0xff]  }
 0x168   :  { %7040 = vmatpush3.bf16.msra.mxu0 %v7653_v54  ;;  %v7703_v54 = vld [vmem:[%s9603_s1 + $0xca8] sm:$0xff]  }
 0x169   :  { %7041 = vmatprep.subr.bf16.mxu0 %v7655_v56 }
 0x16a   :  { %7062 = vmatpush3.bf16.msra.mxu1 %v7654_v55  ;;  %v7704_v55 = vld [vmem:[%s9603_s1 + $0xc70] sm:$0xff]  }
 0x16b   :  { %7063 = vmatprep.subr.bf16.mxu1 %v7656_v57  ;;  %v7705_v57 = vld [vmem:[%s9603_s1 + $0xcf0] sm:$0xff]  }
 0x16c   :  { %7042 = vmatpush3.bf16.msra.mxu0 %v7657_v58 }
 0x16d   :  { %7043 = vmatprep.subr.bf16.mxu0 %v7659_v60 }
 0x16e   :  { %7064 = vmatpush3.bf16.msra.mxu1 %v7658_v59  ;;  %v7706_v59 = vld [vmem:[%s9603_s1 + $0xc30] sm:$0xff]  }
 0x16f   :  { %7065 = vmatprep.subr.bf16.mxu1 %v7660_v61 }
 0x170   :  { %7044 = vmatpush3.bf16.msra.mxu0 %v7661_v62 }
 0x171   :  { %7045 = vmatprep.subr.bf16.mxu0 %v7663_v0 }
 0x172   :  { %7066 = vmatpush3.bf16.msra.mxu1 %v7662_v63  ;;  %v7707_v63 = vld [vmem:[%s9603_s1 + $0xcb0] sm:$0xff]  }
 0x173   :  { %7067 = vmatprep.subr.bf16.mxu1 %v7664_v1 }
 0x174   :  { %7046 = vmatpush3.bf16.msra.mxu0 %v7665_v2  ;;  %v7708_v2 = vld [vmem:[%s9603_s1 + $0xc78] sm:$0xff]  }
 0x175   :  { %7047 = vmatprep.subr.bf16.mxu0 %v7667_v4 }
 0x176   :  { %7068 = vmatpush3.bf16.msra.mxu1 %v7666_v3  ;;  %v6745_v9 = vpop.f32.mrb[16].mxu0  ;;  %v28_v3 = vld [vmem:[%s9602_s0 + $0x30] sm:$0xff] }
 0x177   :  { %v6746_v11 = vpop.f32.mrb[17].mxu0  ;;  %7069 = vmatprep.subr.bf16.mxu1 %v7668_v5 }
 0x178   :  { %v6767_v13 = vpop.f32.mrb[16].mxu1  ;;  %v6747_v14 = vadd.f32 %v6746_v11, %v6745_v9  ;;  %v6748_v15 = vpop.f32.mrb[18].mxu0  ;;  %7048 = vmatpush3.bf16.msra.mxu0 %v7669_v6  ;;  %v1363_v9 = vcombine.high %v28_v3, %v28_v3  ;;  %v7710_v11 = vld [vmem:[%s9603_s1 + $0xc38] sm:$0xff]  }
 0x179   :  { %v6768_v18 = vpop.f32.mrb[17].mxu1  ;;  %v6749_v19 = vpop.f32.mrb[19].mxu0  ;;  %7049 = vmatprep.subr.bf16.mxu0 %v7671_v8  ;;  %v1370_v8 = vrot.slane %v28_v3, %v7989_v41  ;;  %v7743_v3 = vld [vmem:[%s9603_s1 + $0xdb8] sm:$0xff]  }
 0x17a   :  { %v4952_v20 = vadd.f32 %v6747_v14, %v9028_v38  ;;  %v6769_v21 = vadd.f32 %v6768_v18, %v6767_v13  ;;  %v6770_v22 = vpop.f32.mrb[18].mxu1  ;;  %7070 = vmatpush3.bf16.msra.mxu1 %v7670_v7  ;;  %v7688_v38 = vld [vmem:[%s9603_s1 + $0xc50] sm:$0xff]   ;;  %v7709_v7 = vld [vmem:[%s9603_s1 + $0xcf8] sm:$0xff]   ;;  %v9243_v15 = vrot.slane %v1363_v9, %v7989_v41  ;;  %v7713_v19 = vld [vmem:[%s9603_s1 + $0xdc0] sm:$0xff]  }
 0x17b   :  { %v6771_v24 = vpop.f32.mrb[19].mxu1  ;;  %7071 = vmatprep.subr.bf16.mxu1 %v7672_v10  ;;  %v7711_v13 = vld [vmem:[%s9603_s1 + $0xcb8] sm:$0xff]   ;;  %v1378_v14 = vcombine.high %v1370_v8, %v1370_v8 }
 0x17c   :  { %v9132_v26 = vadd.f32 %v6769_v21, %v4952_v20  ;;  %7050 = vmatpush3.bf16.msra.mxu0 %v7673_v12  ;;  %v1379_v20 = vcombine.high %v9243_v15, %v9243_v15  ;;  %v7714_v21 = vld [vmem:[%s9603_s1 + $0xd00] sm:$0xff]  }
 0x17d   :  { %7051 = vmatprep.subr.bf16.mxu0 %v7675_v17  ;;  %v7712_v17 = vld [vmem:[%s9603_s1 + $0xd40] sm:$0xff]   ;;  %v1400_v18 = vrot.slane %v1378_v14, %v7989_v41  ;;  %v7753_v14 = vld [vmem:[%s9603_s1 + $0xe50] sm:$0xff]  }
 0x17e   :  { %7072 = vmatpush3.bf16.msra.mxu1 %v7674_v16  ;;  %v1386_v16 = vrot.slane %v1370_v8, %v7989_v41  ;;  %v1407_v24 = vrot.slane %v1379_v20, %v7989_v41  ;;  %v7748_v8 = vld [vmem:[%s9603_s1 + $0xe80] sm:$0xff]   ;;  %v7759_v20 = vld [vmem:[%s9603_s1 + $0xe18] sm:$0xff]  }
 0x17f   :  { %7073 = vmatprep.subr.bf16.mxu1 %v7676_v23  ;;  %v1410_v22 = vcombine.high %v1400_v18, %v1400_v18  ;;  %v7715_v23 = vld [vmem:[%s9603_s1 + $0xd80] sm:$0xff]  }
 0x180   :  { %7052 = vmatpush3.bf16.msra.mxu0 %v7677_v25  ;;  %v1408_v25 = vcombine.high %v1386_v16, %v1386_v16 }
 0x181   :  { %7081 = vmatprep.subr.bf16.mxu0 %v7680_v29  ;;  %v7718_v29 = vld [vmem:[%s9603_s1 + $0xd08] sm:$0xff]  }
 0x182   :  { %7074 = vmatpush3.bf16.msra.mxu1 %v7678_v27  ;;  %v7717_v27 = vld [vmem:[%s9603_s1 + $0xdc8] sm:$0xff]  }
 0x183   :  { %5510 = vmatmul.mubr.bf16.vlgmr.msra.gmra.mrb[44].mxu0 %v1344_v28  ;;  %7103 = vmatprep.subr.bf16.mxu1 %v7681_v30  ;;  %v1411_v28 = vcombine.high %v1407_v24, %v1407_v24  ;;  %v7719_v30 = vld [vmem:[%s9603_s1 + $0xd88] sm:$0xff]  }
 0x184   :  { %7082 = vmatpush3.bf16.msra.mxu0 %v7682_v31  ;;  %5589 = vmatprep.mubr.bf16.mxu0 %v1400_v18  ;;  %v7720_v31 = vld [vmem:[%s9603_s1 + $0xd50] sm:$0xff]   ;;  %v7757_v18 = vld [vmem:[%s9603_s1 + $0xe58] sm:$0xff]  }
 0x185   :  { %5550 = vmatmul.mubr.bf16.vlgmr.msra.gmra.mrb[44].mxu1 %v1360_v33  ;;  %7083 = vmatprep.subr.bf16.mxu0 %v7684_v34  ;;  %v7722_v33 = vld [vmem:[%s9603_s1 + $0xd10] sm:$0xff]  }
 0x186   :  { %7104 = vmatpush3.bf16.msra.mxu1 %v7683_v32  ;;  %5629 = vmatprep.mubr.bf16.mxu1 %v1410_v22  ;;  %v7721_v32 = vld [vmem:[%s9603_s1 + $0xdd0] sm:$0xff]   ;;  %v7761_v22 = vld [vmem:[%s9603_s1 + $0xe60] sm:$0xff]  }
 0x187   :  { %7105 = vmatprep.subr.bf16.mxu1 %v7685_v35  ;;  %v7723_v34 = vld [vmem:[%s9603_s1 + $0xd90] sm:$0xff]   ;;  %v7724_v35 = vld [vmem:[%s9603_s1 + $0xd58] sm:$0xff]  }
 0x188   :  { %7084 = vmatpush3.bf16.msra.mxu0 %v7686_v36  ;;  %v7725_v36 = vld [vmem:[%s9603_s1 + $0xdd8] sm:$0xff]  }
 0x189   :  { %7085 = vmatprep.subr.bf16.mxu0 %v7688_v38  ;;  %v7727_v38 = vld [vmem:[%s9603_s1 + $0xd98] sm:$0xff]  }
 0x18a   :  { %7106 = vmatpush3.bf16.msra.mxu1 %v7687_v37  ;;  %v7726_v37 = vld [vmem:[%s9603_s1 + $0xd18] sm:$0xff]  }
 0x18b   :  { %7107 = vmatprep.subr.bf16.mxu1 %v7689_v39  ;;  %v7728_v39 = vld [vmem:[%s9603_s1 + $0xd60] sm:$0xff]  }
 0x18c   :  { %7086 = vmatpush3.bf16.msra.mxu0 %v7690_v40  ;;  %v7729_v40 = vld [vmem:[%s9603_s1 + $0xde0] sm:$0xff]  }
 0x18d   :  { %7087 = vmatprep.subr.bf16.mxu0 %v7692_v43  ;;  %v7731_v43 = vld [vmem:[%s9603_s1 + $0xda0] sm:$0xff]  }
 0x18e   :  { %7108 = vmatpush3.bf16.msra.mxu1 %v7691_v42  ;;  %v7730_v42 = vld [vmem:[%s9603_s1 + $0xd20] sm:$0xff]  }
 0x18f   :  { %7109 = vmatprep.subr.bf16.mxu1 %v7693_v44  ;;  %v7732_v44 = vld [vmem:[%s9603_s1 + $0xd68] sm:$0xff]  }
 0x190   :  { %7088 = vmatpush3.bf16.msra.mxu0 %v7694_v45  ;;  %v7733_v45 = vld [vmem:[%s9603_s1 + $0xde8] sm:$0xff]  }
 0x191   :  { %7089 = vmatprep.subr.bf16.mxu0 %v7696_v47  ;;  %v7735_v47 = vld [vmem:[%s9603_s1 + $0xda8] sm:$0xff]  }
 0x192   :  { %7110 = vmatpush3.bf16.msra.mxu1 %v7695_v46  ;;  %v7734_v46 = vld [vmem:[%s9603_s1 + $0xd28] sm:$0xff]  }
 0x193   :  { %7111 = vmatprep.subr.bf16.mxu1 %v7697_v48  ;;  %v7736_v48 = vld [vmem:[%s9603_s1 + $0xd70] sm:$0xff]  }
 0x194   :  { %7090 = vmatpush3.bf16.msra.mxu0 %v7698_v49 }
 0x195   :  { %7091 = vmatprep.subr.bf16.mxu0 %v7700_v51 }
 0x196   :  { %7112 = vmatpush3.bf16.msra.mxu1 %v7699_v50  ;;  %v6789_v56 = vpop.f32.mrb[20].mxu0  ;;  %v7737_v50 = vld [vmem:[%s9603_s1 + $0xdf0] sm:$0xff]  }
 0x197   :  { %v6790_v58 = vpop.f32.mrb[21].mxu0  ;;  %7113 = vmatprep.subr.bf16.mxu1 %v7701_v52  ;;  %v7738_v52 = vld [vmem:[%s9603_s1 + $0xd30] sm:$0xff]  }
 0x198   :  { %v6811_v60 = vpop.f32.mrb[20].mxu1  ;;  %v6791_v61 = vadd.f32 %v6790_v58, %v6789_v56  ;;  %v6792_v62 = vpop.f32.mrb[22].mxu0  ;;  %7092 = vmatpush3.bf16.msra.mxu0 %v7702_v53  ;;  %v7739_v56 = vld [vmem:[%s9603_s1 + $0xdb0] sm:$0xff]  }
 0x199   :  { %v6812_v0 = vpop.f32.mrb[21].mxu1  ;;  %v6793_v1 = vpop.f32.mrb[23].mxu0  ;;  %7093 = vmatprep.subr.bf16.mxu0 %v7704_v55 }
 0x19a   :  { %v5032_v4 = vadd.f32 %v6791_v61, %v9132_v26  ;;  %v6813_v5 = vadd.f32 %v6812_v0, %v6811_v60  ;;  %v6814_v6 = vpop.f32.mrb[22].mxu1  ;;  %7114 = vmatpush3.bf16.msra.mxu1 %v7703_v54  ;;  %v7716_v26 = vld [vmem:[%s9603_s1 + $0xd48] sm:$0xff]   ;;  %v7742_v1 = vld [vmem:[%s9603_s1 + $0xd38] sm:$0xff]  }
 0x19b   :  { %v6815_v10 = vpop.f32.mrb[23].mxu1  ;;  %7115 = vmatprep.subr.bf16.mxu1 %v7705_v57  ;;  %v7740_v57 = vld [vmem:[%s9603_s1 + $0xd78] sm:$0xff]   ;;  %v7746_v6 = vld [vmem:[%s9603_s1 + $0xec0] sm:$0xff]  }
 0x19c   :  { %v9237_v12 = vadd.f32 %v6813_v5, %v5032_v4  ;;  %7094 = vmatpush3.bf16.msra.mxu0 %v7706_v59  ;;  %v1393_v4 = vrot.slane %v9243_v15, %v7989_v41  ;;  %v7745_v5 = vld [vmem:[%s9603_s1 + $0xe40] sm:$0xff]   ;;  %v7749_v10 = vld [vmem:[%s9603_s1 + $0xe48] sm:$0xff]   ;;  %v7754_v15 = vld [vmem:[%s9603_s1 + $0xed0] sm:$0xff]  }
 0x19d   :  { %7095 = vmatprep.subr.bf16.mxu0 %v7708_v2 }
 0x19e   :  { %7116 = vmatpush3.bf16.msra.mxu1 %v7707_v63  ;;  %v7741_v63 = vld [vmem:[%s9603_s1 + $0xdf8] sm:$0xff]   ;;  %v1409_v9 = vcombine.high %v1393_v4, %v1393_v4 }
 0x19f   :  { %7117 = vmatprep.subr.bf16.mxu1 %v7709_v7  ;;  %v7747_v7 = vld [vmem:[%s9603_s1 + $0xe00] sm:$0xff]  }
 0x1a0   :  { %7096 = vmatpush3.bf16.msra.mxu0 %v7710_v11  ;;  %v7750_v11 = vld [vmem:[%s9603_s1 + $0xec8] sm:$0xff]  }
 0x1a1   :  { %7125 = vmatprep.subr.bf16.mxu0 %v7712_v17  ;;  %v7756_v17 = vld [vmem:[%s9603_s1 + $0xe90] sm:$0xff]  }
 0x1a2   :  { %7118 = vmatpush3.bf16.msra.mxu1 %v7711_v13  ;;  %v7752_v13 = vld [vmem:[%s9603_s1 + $0xe88] sm:$0xff]  }
 0x1a3   :  { %5590 = vmatmul.mubr.bf16.vlgmr.msra.gmra.mrb[48].mxu0 %v1386_v16  ;;  %7147 = vmatprep.subr.bf16.mxu1 %v7713_v19  ;;  %v7755_v16 = vld [vmem:[%s9603_s1 + $0xe10] sm:$0xff]   ;;  %v7758_v19 = vld [vmem:[%s9603_s1 + $0xed8] sm:$0xff]  }
 0x1a4   :  { %7126 = vmatpush3.bf16.msra.mxu0 %v7714_v21  ;;  %5669 = vmatprep.mubr.bf16.mxu0 %v1407_v24  ;;  %v7760_v21 = vld [vmem:[%s9603_s1 + $0xe98] sm:$0xff]   ;;  %v7763_v24 = vld [vmem:[%s9603_s1 + $0xe20] sm:$0xff]  }
 0x1a5   :  { %5630 = vmatmul.mubr.bf16.vlgmr.msra.gmra.mrb[48].mxu1 %v1408_v25  ;;  %7127 = vmatprep.subr.bf16.mxu0 %v7716_v26  ;;  %v7764_v25 = vld [vmem:[%s9603_s1 + $0xea0] sm:$0xff]   ;;  %v7765_v26 = vld [vmem:[%s9603_s1 + $0xe68] sm:$0xff]  }
 0x1a6   :  { %7148 = vmatpush3.bf16.msra.mxu1 %v7715_v23  ;;  %5709 = vmatprep.mubr.bf16.mxu1 %v1411_v28  ;;  %v7762_v23 = vld [vmem:[%s9603_s1 + $0xee0] sm:$0xff]   ;;  %v7767_v28 = vld [vmem:[%s9603_s1 + $0xe28] sm:$0xff]  }
 0x1a7   :  { %7149 = vmatprep.subr.bf16.mxu1 %v7717_v27  ;;  %v7766_v27 = vld [vmem:[%s9603_s1 + $0xee8] sm:$0xff]  }
 0x1a8   :  { %7128 = vmatpush3.bf16.msra.mxu0 %v7718_v29  ;;  %v7768_v29 = vld [vmem:[%s9603_s1 + $0xea8] sm:$0xff]  }
 0x1a9   :  { %7129 = vmatprep.subr.bf16.mxu0 %v7720_v31 }
 0x1aa   :  { %7150 = vmatpush3.bf16.msra.mxu1 %v7719_v30  ;;  %v7769_v30 = vld [vmem:[%s9603_s1 + $0xe70] sm:$0xff]  }
 0x1ab   :  { %7151 = vmatprep.subr.bf16.mxu1 %v7721_v32  ;;  %v7770_v32 = vld [vmem:[%s9603_s1 + $0xef0] sm:$0xff]  }
 0x1ac   :  { %7130 = vmatpush3.bf16.msra.mxu0 %v7722_v33 }
 0x1ad   :  { %7131 = vmatprep.subr.bf16.mxu0 %v7724_v35 }
 0x1ae   :  { %7152 = vmatpush3.bf16.msra.mxu1 %v7723_v34  ;;  %v7771_v34 = vld [vmem:[%s9603_s1 + $0xe30] sm:$0xff]  }
 0x1af   :  { %7153 = vmatprep.subr.bf16.mxu1 %v7725_v36 }
 0x1b0   :  { %7132 = vmatpush3.bf16.msra.mxu0 %v7726_v37 }
 0x1b1   :  { %7133 = vmatprep.subr.bf16.mxu0 %v7728_v39 }
 0x1b2   :  { %7154 = vmatpush3.bf16.msra.mxu1 %v7727_v38  ;;  %v7772_v38 = vld [vmem:[%s9603_s1 + $0xeb0] sm:$0xff]  }
 0x1b3   :  { %7155 = vmatprep.subr.bf16.mxu1 %v7729_v40 }
 0x1b4   :  { %7134 = vmatpush3.bf16.msra.mxu0 %v7730_v42  ;;  %v7773_v42 = vld [vmem:[%s9603_s1 + $0xe78] sm:$0xff]  }
 0x1b5   :  { %7135 = vmatprep.subr.bf16.mxu0 %v7732_v44 }
 0x1b6   :  { %7156 = vmatpush3.bf16.msra.mxu1 %v7731_v43  ;;  %v6833_v49 = vpop.f32.mrb[24].mxu0  ;;  %v7774_v43 = vld [vmem:[%s9603_s1 + $0xef8] sm:$0xff]  }
 0x1b7   :  { %v6834_v51 = vpop.f32.mrb[25].mxu0  ;;  %7157 = vmatprep.subr.bf16.mxu1 %v7733_v45 }
 0x1b8   :  { %v6855_v53 = vpop.f32.mrb[24].mxu1  ;;  %v6835_v54 = vadd.f32 %v6834_v51, %v6833_v49  ;;  %v6836_v55 = vpop.f32.mrb[26].mxu0  ;;  %7136 = vmatpush3.bf16.msra.mxu0 %v7734_v46  ;;  %v7775_v49 = vld [vmem:[%s9603_s1 + $0xe38] sm:$0xff]  }
 0x1b9   :  { %v6856_v58 = vpop.f32.mrb[25].mxu1  ;;  %v6837_v59 = vpop.f32.mrb[27].mxu0  ;;  %7137 = vmatprep.subr.bf16.mxu0 %v7736_v48 }
 0x1ba   :  { %v5112_v60 = vadd.f32 %v6835_v54, %v9237_v12  ;;  %v6857_v61 = vadd.f32 %v6856_v58, %v6855_v53  ;;  %v6858_v62 = vpop.f32.mrb[26].mxu1  ;;  %7158 = vmatpush3.bf16.msra.mxu1 %v7735_v47  ;;  %v7751_v12 = vld [vmem:[%s9603_s1 + $0xe08] sm:$0xff]   ;;  %v29_v47 = vld [vmem:[%s9602_s0 + $0x38] sm:$0xff]  ;;  %v7778_v58 = vld [vmem:[%s9603_s1 + $0xfc0] sm:$0xff]  }
 0x1bb   :  { %v6859_v0 = vpop.f32.mrb[27].mxu1  ;;  %7159 = vmatprep.subr.bf16.mxu1 %v7737_v50  ;;  %v1419_v50 = vrot.slane %v29_v47, %v7989_v41  ;;  %v1412_v51 = vcombine.high %v29_v47, %v29_v47  ;;  %v7776_v53 = vld [vmem:[%s9603_s1 + $0xeb8] sm:$0xff]   ;;  %v7780_v62 = vld [vmem:[%s9603_s1 + $0xf80] sm:$0xff]  }
 0x1bc   :  { %v9344_v2 = vadd.f32 %v6857_v61, %v5112_v60  ;;  %7138 = vmatpush3.bf16.msra.mxu0 %v7738_v52  ;;  %v7779_v60 = vld [vmem:[%s9603_s1 + $0xf00] sm:$0xff]  }
 0x1bd   :  { %7139 = vmatprep.subr.bf16.mxu0 %v7740_v57  ;;  %v1427_v54 = vcombine.high %v1419_v50, %v1419_v50  ;;  %v1435_v55 = vrot.slane %v1419_v50, %v7989_v41  ;;  %v9459_v57 = vrot.slane %v1412_v51, %v7989_v41 }
 0x1be   :  { %7160 = vmatpush3.bf16.msra.mxu1 %v7739_v56  ;;  %v7777_v56 = vld [vmem:[%s9603_s1 + $0xf40] sm:$0xff]  }
 0x1bf   :  { %7161 = vmatprep.subr.bf16.mxu1 %v7741_v63  ;;  %v1449_v59 = vrot.slane %v1427_v54, %v7989_v41  ;;  %v1428_v61 = vcombine.high %v9459_v57, %v9459_v57  ;;  %v1457_v0 = vcombine.high %v1435_v55, %v1435_v55 }
 0x1c0   :  { %7140 = vmatpush3.bf16.msra.mxu0 %v7742_v1  ;;  %v7781_v1 = vld [vmem:[%s9603_s1 + $0xf48] sm:$0xff]  }
 0x1c1   :  { %7169 = vmatprep.subr.bf16.mxu0 %v7745_v5  ;;  %v1459_v63 = vcombine.high %v1449_v59, %v1449_v59 }
 0x1c2   :  { %7162 = vmatpush3.bf16.msra.mxu1 %v7743_v3  ;;  %v7782_v3 = vld [vmem:[%s9603_s1 + $0xfc8] sm:$0xff]  }
 0x1c3   :  { %5670 = vmatmul.mubr.bf16.vlgmr.msra.gmra.mrb[52].mxu0 %v1393_v4  ;;  %7191 = vmatprep.subr.bf16.mxu1 %v7746_v6  ;;  %v7783_v4 = vld [vmem:[%s9603_s1 + $0xf08] sm:$0xff]  }
 0x1c4   :  { %7170 = vmatpush3.bf16.msra.mxu0 %v7747_v7  ;;  %5749 = vmatprep.mubr.bf16.mxu0 %v1449_v59  ;;  %v7784_v6 = vld [vmem:[%s9603_s1 + $0xf88] sm:$0xff]   ;;  %v7785_v7 = vld [vmem:[%s9603_s1 + $0xf50] sm:$0xff]  }
 0x1c5   :  { %5710 = vmatmul.mubr.bf16.vlgmr.msra.gmra.mrb[52].mxu1 %v1409_v9  ;;  %7171 = vmatprep.subr.bf16.mxu0 %v7749_v10  ;;  %v7787_v9 = vld [vmem:[%s9603_s1 + $0xf10] sm:$0xff]  }
 0x1c6   :  { %7192 = vmatpush3.bf16.msra.mxu1 %v7748_v8  ;;  %5789 = vmatprep.mubr.bf16.mxu1 %v1459_v63  ;;  %v7786_v8 = vld [vmem:[%s9603_s1 + $0xfd0] sm:$0xff]  }
 0x1c7   :  { %7193 = vmatprep.subr.bf16.mxu1 %v7750_v11  ;;  %v7788_v10 = vld [vmem:[%s9603_s1 + $0xf90] sm:$0xff]   ;;  %v7789_v11 = vld [vmem:[%s9603_s1 + $0xf58] sm:$0xff]  }
 0x1c8   :  { %7172 = vmatpush3.bf16.msra.mxu0 %v7751_v12  ;;  %v7790_v12 = vld [vmem:[%s9603_s1 + $0xfd8] sm:$0xff]  }
 0x1c9   :  { %7173 = vmatprep.subr.bf16.mxu0 %v7753_v14  ;;  %v7792_v14 = vld [vmem:[%s9603_s1 + $0xf98] sm:$0xff]  }
 0x1ca   :  { %7194 = vmatpush3.bf16.msra.mxu1 %v7752_v13  ;;  %v7791_v13 = vld [vmem:[%s9603_s1 + $0xf18] sm:$0xff]  }
 0x1cb   :  { %7195 = vmatprep.subr.bf16.mxu1 %v7754_v15  ;;  %v7793_v15 = vld [vmem:[%s9603_s1 + $0xf60] sm:$0xff]  }
 0x1cc   :  { %7174 = vmatpush3.bf16.msra.mxu0 %v7755_v16  ;;  %v7794_v16 = vld [vmem:[%s9603_s1 + $0xfe0] sm:$0xff]  }
 0x1cd   :  { %7175 = vmatprep.subr.bf16.mxu0 %v7757_v18  ;;  %v7796_v18 = vld [vmem:[%s9603_s1 + $0xfa0] sm:$0xff]  }
 0x1ce   :  { %7196 = vmatpush3.bf16.msra.mxu1 %v7756_v17  ;;  %v7795_v17 = vld [vmem:[%s9603_s1 + $0xf20] sm:$0xff]  }
 0x1cf   :  { %7197 = vmatprep.subr.bf16.mxu1 %v7758_v19  ;;  %v7797_v19 = vld [vmem:[%s9603_s1 + $0xf68] sm:$0xff]  }
 0x1d0   :  { %7176 = vmatpush3.bf16.msra.mxu0 %v7759_v20  ;;  %v7798_v20 = vld [vmem:[%s9603_s1 + $0xfe8] sm:$0xff]  }
 0x1d1   :  { %7177 = vmatprep.subr.bf16.mxu0 %v7761_v22  ;;  %v7800_v22 = vld [vmem:[%s9603_s1 + $0xfa8] sm:$0xff]  }
 0x1d2   :  { %7198 = vmatpush3.bf16.msra.mxu1 %v7760_v21  ;;  %v7799_v21 = vld [vmem:[%s9603_s1 + $0xf28] sm:$0xff]  }
 0x1d3   :  { %7199 = vmatprep.subr.bf16.mxu1 %v7762_v23  ;;  %v7801_v23 = vld [vmem:[%s9603_s1 + $0xf70] sm:$0xff]  }
 0x1d4   :  { %7178 = vmatpush3.bf16.msra.mxu0 %v7763_v24 }
 0x1d5   :  { %7179 = vmatprep.subr.bf16.mxu0 %v7765_v26 }
 0x1d6   :  { %7200 = vmatpush3.bf16.msra.mxu1 %v7764_v25  ;;  %v6877_v31 = vpop.f32.mrb[28].mxu0  ;;  %v7802_v25 = vld [vmem:[%s9603_s1 + $0xff0] sm:$0xff]  }
 0x1d7   :  { %v6878_v33 = vpop.f32.mrb[29].mxu0  ;;  %7201 = vmatprep.subr.bf16.mxu1 %v7766_v27  ;;  %v7803_v27 = vld [vmem:[%s9603_s1 + $0xf30] sm:$0xff]  }
 0x1d8   :  { %v6899_v35 = vpop.f32.mrb[28].mxu1  ;;  %v6879_v36 = vadd.f32 %v6878_v33, %v6877_v31  ;;  %v6880_v37 = vpop.f32.mrb[30].mxu0  ;;  %7180 = vmatpush3.bf16.msra.mxu0 %v7767_v28  ;;  %v7804_v31 = vld [vmem:[%s9603_s1 + $0xfb0] sm:$0xff]  }
 0x1d9   :  { %v6900_v39 = vpop.f32.mrb[29].mxu1  ;;  %v6881_v40 = vpop.f32.mrb[31].mxu0  ;;  %7181 = vmatprep.subr.bf16.mxu0 %v7769_v30 }
 0x1da   :  { %v5192_v44 = vadd.f32 %v6879_v36, %v9344_v2  ;;  %v6901_v45 = vadd.f32 %v6900_v39, %v6899_v35  ;;  %v6902_v46 = vpop.f32.mrb[30].mxu1  ;;  %7202 = vmatpush3.bf16.msra.mxu1 %v7768_v29  ;;  %v1456_v2 = vrot.slane %v1428_v61, %v7989_v41  ;;  %v7807_v40 = vld [vmem:[%s9603_s1 + $0xf38] sm:$0xff]  }
 0x1db   :  { %v6903_v48 = vpop.f32.mrb[31].mxu1  ;;  %7203 = vmatprep.subr.bf16.mxu1 %v7770_v32  ;;  %v7805_v32 = vld [vmem:[%s9603_s1 + $0xf78] sm:$0xff]  }
 0x1dc   :  { %v9449_v52 = vadd.f32 %v6901_v45, %v5192_v44  ;;  %7182 = vmatpush3.bf16.msra.mxu0 %v7771_v34  ;;  %v1460_v5 = vcombine.high %v1456_v2, %v1456_v2  ;;  %v1442_v44 = vrot.slane %v9459_v57, %v7989_v41 }
 0x1dd   :  { %7183 = vmatprep.subr.bf16.mxu0 %v7773_v42 }
 0x1de   :  { %7204 = vmatpush3.bf16.msra.mxu1 %v7772_v38  ;;  %v7806_v38 = vld [vmem:[%s9603_s1 + $0xff8] sm:$0xff]  }
 0x1df   :  { %7205 = vmatprep.subr.bf16.mxu1 %v7774_v43  ;;  %v7808_v43 = vld [vmem:[%s9603_s1 + $0xfb8] sm:$0xff]  }
 0x1e0   :  { %7184 = vmatpush3.bf16.msra.mxu0 %v7775_v49 }
 0x1e1   :  { %7213 = vmatprep.subr.bf16.mxu0 %v7777_v56 }
 0x1e2   :  { %7206 = vmatpush3.bf16.msra.mxu1 %v7776_v53 }
 0x1e3   :  { %5750 = vmatmul.mubr.bf16.vlgmr.msra.gmra.mrb[56].mxu0 %v1435_v55  ;;  %7235 = vmatprep.subr.bf16.mxu1 %v7778_v58 }
 0x1e4   :  { %7214 = vmatpush3.bf16.msra.mxu0 %v7779_v60  ;;  %5829 = vmatprep.mubr.bf16.mxu0 %v1456_v2 }
 0x1e5   :  { %5790 = vmatmul.mubr.bf16.vlgmr.msra.gmra.mrb[56].mxu1 %v1457_v0  ;;  %7215 = vmatprep.subr.bf16.mxu0 %v7781_v1 }
 0x1e6   :  { %7236 = vmatpush3.bf16.msra.mxu1 %v7780_v62  ;;  %5869 = vmatprep.mubr.bf16.mxu1 %v1460_v5 }
 0x1e7   :  { %7237 = vmatprep.subr.bf16.mxu1 %v7782_v3 }
 0x1e8   :  { %7216 = vmatpush3.bf16.msra.mxu0 %v7783_v4 }
 0x1e9   :  { %7217 = vmatprep.subr.bf16.mxu0 %v7785_v7 }
 0x1ea   :  { %7238 = vmatpush3.bf16.msra.mxu1 %v7784_v6 }
 0x1eb   :  { %7239 = vmatprep.subr.bf16.mxu1 %v7786_v8 }
 0x1ec   :  { %7218 = vmatpush3.bf16.msra.mxu0 %v7787_v9 }
 0x1ed   :  { %7219 = vmatprep.subr.bf16.mxu0 %v7789_v11 }
 0x1ee   :  { %7240 = vmatpush3.bf16.msra.mxu1 %v7788_v10 }
 0x1ef   :  { %7241 = vmatprep.subr.bf16.mxu1 %v7790_v12 }
 0x1f0   :  { %7220 = vmatpush3.bf16.msra.mxu0 %v7791_v13 }
 0x1f1   :  { %7221 = vmatprep.subr.bf16.mxu0 %v7793_v15 }
 0x1f2   :  { %7242 = vmatpush3.bf16.msra.mxu1 %v7792_v14 }
 0x1f3   :  { %7243 = vmatprep.subr.bf16.mxu1 %v7794_v16 }
 0x1f4   :  { %7222 = vmatpush3.bf16.msra.mxu0 %v7795_v17 }
 0x1f5   :  { %7223 = vmatprep.subr.bf16.mxu0 %v7797_v19 }
 0x1f6   :  { %7244 = vmatpush3.bf16.msra.mxu1 %v7796_v18  ;;  %v6921_v24 = vpop.f32.mrb[32].mxu0 }
 0x1f7   :  { %v6922_v26 = vpop.f32.mrb[33].mxu0  ;;  %7245 = vmatprep.subr.bf16.mxu1 %v7798_v20 }
 0x1f8   :  { %v6943_v28 = vpop.f32.mrb[32].mxu1  ;;  %v6923_v29 = vadd.f32 %v6922_v26, %v6921_v24  ;;  %v6924_v30 = vpop.f32.mrb[34].mxu0  ;;  %7224 = vmatpush3.bf16.msra.mxu0 %v7799_v21 }
 0x1f9   :  { %v6944_v33 = vpop.f32.mrb[33].mxu1  ;;  %v6925_v34 = vpop.f32.mrb[35].mxu0  ;;  %7225 = vmatprep.subr.bf16.mxu0 %v7801_v23 }
 0x1fa   :  { %v5272_v35 = vadd.f32 %v6923_v29, %v9449_v52  ;;  %v6945_v36 = vadd.f32 %v6944_v33, %v6943_v28  ;;  %v6946_v37 = vpop.f32.mrb[34].mxu1  ;;  %7246 = vmatpush3.bf16.msra.mxu1 %v7800_v22 }
 0x1fb   :  { %v6947_v39 = vpop.f32.mrb[35].mxu1  ;;  %7247 = vmatprep.subr.bf16.mxu1 %v7802_v25 }
 0x1fc   :  { %v5312_v42 = vadd.f32 %v6945_v36, %v5272_v35  ;;  %7226 = vmatpush3.bf16.msra.mxu0 %v7803_v27 }
 0x1fd   :  { %7227 = vmatprep.subr.bf16.mxu0 %v7805_v32 }
 0x1fe   :  { %7248 = vmatpush3.bf16.msra.mxu1 %v7804_v31 }
 0x1ff   :  { %7249 = vmatprep.subr.bf16.mxu1 %v7806_v38 }
 0x200   :  { %7228 = vmatpush3.bf16.msra.mxu0 %v7807_v40 }
 0x201   :  { %10 = vsyncpa [#allocation3], 0  ;;  %v1458_v45 = vcombine.high %v1442_v44, %v1442_v44  ;;  %v7810_v17 = vld [vmem:[%s9605_s3] sm:$0xff]   ;;  %v7851_v18 = vmov 0.0   ;;  %v7811_v19 = vld [vmem:[%s9605_s3 + $0x8] sm:$0xff]   ;;  %vm7852_vm0 = vmmov 0  }
 0x202   :  { %7250 = vmatpush3.bf16.msra.mxu1 %v7808_v43  ;;  %7266 = vmatprep.subr.bf16.mxu0 %v7851_v18  ;;  %v7812_v20 = vld [vmem:[%s9605_s3 + $0x10] sm:$0xff]   ;;  %v7813_v21 = vld [vmem:[%s9605_s3 + $0x18] sm:$0xff]   ;;  %v7814_v22 = vld [vmem:[%s9605_s3 + $0x20] sm:$0xff]   ;;  %vm5994_vm1 = vcmask 1041408  }
 0x203   :  { %5830 = vmatmul.mubr.bf16.vlgmr.msra.gmra.mrb[60].mxu0 %v1442_v44  ;;  %v7815_v23 = vld [vmem:[%s9605_s3 + $0x28] sm:$0xff]   ;;  %v7816_v24 = vld [vmem:[%s9605_s3 + $0x30] sm:$0xff]   ;;  %v7817_v27 = vld [vmem:[%s9605_s3 + $0x38] sm:$0xff]  }
 0x204   :  { %7267 = vmatpush3.bf16.msra.mxu0 %v7810_v17  ;;  %7282 = vmatprep.mubr.msk.bf16.mxu0 %vm7852_vm0, %v7851_v18 }
 0x205   :  { %5870 = vmatmul.mubr.bf16.vlgmr.msra.gmra.mrb[60].mxu1 %v1458_v45  ;;  %7268 = vmatprep.subr.bf16.mxu0 %v7851_v18 }
 0x208   :  { %7269 = vmatpush3.bf16.msra.mxu0 %v7811_v19 }
 0x209   :  { %7270 = vmatprep.subr.bf16.mxu0 %v7851_v18 }
 0x20c   :  { %7271 = vmatpush3.bf16.msra.mxu0 %v7812_v20 }
 0x20d   :  { %7272 = vmatprep.subr.bf16.mxu0 %v7851_v18 }
 0x210   :  { %7273 = vmatpush3.bf16.msra.mxu0 %v7813_v21 }
 0x211   :  { %7274 = vmatprep.subr.bf16.mxu0 %v7851_v18 }
 0x214   :  { %7275 = vmatpush3.bf16.msra.mxu0 %v7814_v22 }
 0x215   :  { %7276 = vmatprep.subr.bf16.mxu0 %v7851_v18 }
 0x216   :  { %v6965_v46 = vpop.f32.mrb[36].mxu0 }
 0x217   :  { %v6966_v47 = vpop.f32.mrb[37].mxu0 }
 0x218   :  { %v6987_v48 = vpop.f32.mrb[36].mxu1  ;;  %v6967_v49 = vadd.f32 %v6966_v47, %v6965_v46  ;;  %v6968_v50 = vpop.f32.mrb[38].mxu0  ;;  %7277 = vmatpush3.bf16.msra.mxu0 %v7815_v23 }
 0x219   :  { %v6988_v51 = vpop.f32.mrb[37].mxu1  ;;  %v6969_v52 = vpop.f32.mrb[39].mxu0  ;;  %7278 = vmatprep.subr.bf16.mxu0 %v7851_v18 }
 0x21a   :  { %v5352_v53 = vadd.f32 %v6967_v49, %v5312_v42  ;;  %v6989_v54 = vadd.f32 %v6988_v51, %v6987_v48  ;;  %v6990_v55 = vpop.f32.mrb[38].mxu1 }
 0x21b   :  { %v6991_v56 = vpop.f32.mrb[39].mxu1 }
 0x21c   :  { %v5392_v41 = vadd.f32 %v6989_v54, %v5352_v53  ;;  %7279 = vmatpush3.bf16.msra.mxu0 %v7816_v24 }
 0x21d   :  { %7280 = vmatprep.subr.bf16.mxu0 %v7851_v18 }
 0x220   :  { %7281 = vmatpush3.bf16.msra.mxu0 %v7817_v27 }
 0x236   :  { %v7009_v57 = vpop.f32.mrb[40].mxu0 }
 0x237   :  { %v7010_v58 = vpop.f32.mrb[41].mxu0 }
 0x238   :  { %v7031_v59 = vpop.f32.mrb[40].mxu1  ;;  %v7011_v60 = vadd.f32 %v7010_v58, %v7009_v57  ;;  %v7012_v61 = vpop.f32.mrb[42].mxu0 }
 0x239   :  { %v7032_v62 = vpop.f32.mrb[41].mxu1  ;;  %v7013_v63 = vpop.f32.mrb[43].mxu0 }
 0x23a   :  { %v5432_v0 = vadd.f32 %v7011_v60, %v5392_v41  ;;  %v7033_v1 = vadd.f32 %v7032_v62, %v7031_v59  ;;  %v7034_v2 = vpop.f32.mrb[42].mxu1 }
 0x23b   :  { %v7035_v3 = vpop.f32.mrb[43].mxu1 }
 0x23c   :  { %v5472_v4 = vadd.f32 %v7033_v1, %v5432_v0 }
 0x256   :  { %v7053_v5 = vpop.f32.mrb[44].mxu0 }
 0x257   :  { %v7054_v6 = vpop.f32.mrb[45].mxu0 }
 0x258   :  { %v7075_v7 = vpop.f32.mrb[44].mxu1  ;;  %v7055_v8 = vadd.f32 %v7054_v6, %v7053_v5  ;;  %v7056_v9 = vpop.f32.mrb[46].mxu0 }
 0x259   :  { %v7076_v10 = vpop.f32.mrb[45].mxu1  ;;  %v7057_v11 = vpop.f32.mrb[47].mxu0 }
 0x25a   :  { %v5512_v12 = vadd.f32 %v7055_v8, %v5472_v4  ;;  %v7077_v13 = vadd.f32 %v7076_v10, %v7075_v7  ;;  %v7078_v14 = vpop.f32.mrb[46].mxu1 }
 0x25b   :  { %v7079_v15 = vpop.f32.mrb[47].mxu1 }
 0x25c   :  { %v5552_v16 = vadd.f32 %v7077_v13, %v5512_v12 }
 0x276   :  { %v7097_v25 = vpop.f32.mrb[48].mxu0 }
 0x277   :  { %v7098_v26 = vpop.f32.mrb[49].mxu0 }
 0x278   :  { %v7119_v28 = vpop.f32.mrb[48].mxu1  ;;  %v7099_v29 = vadd.f32 %v7098_v26, %v7097_v25  ;;  %v7100_v30 = vpop.f32.mrb[50].mxu0 }
 0x279   :  { %v7120_v31 = vpop.f32.mrb[49].mxu1  ;;  %v7101_v32 = vpop.f32.mrb[51].mxu0 }
 0x27a   :  { %v5592_v33 = vadd.f32 %v7099_v29, %v5552_v16  ;;  %v7121_v34 = vadd.f32 %v7120_v31, %v7119_v28  ;;  %v7122_v35 = vpop.f32.mrb[50].mxu1  ;;  %v6544_v16 = vld [vmem:[%s9606_s4] ss:$0 sm:$0xff]  ;;  %s7853_s4 = smov [#allocation2]  }
 0x27b   :  { %v7123_v36 = vpop.f32.mrb[51].mxu1  ;;  %s6023_s27 = sshll.u32 %s7853_s4, 4  ;;  %s6024_s27 = int_to_ptr.vmem [resolvable:$true] %s6023_s27 }
 0x27c   :  { %v5632_v37 = vadd.f32 %v7121_v34, %v5592_v33  ;;  %s7826_s0 = scalar_lea.vmem %s6024_s27, 32  ;;  %p7831_p1 = scmp.lt.s32.totalorder %s6024_s27, %s6024_s27 }
 0x27d   :  { %p7827_p0 = scmp.ne.s32.totalorder %s6024_s27, %s7826_s0  ;;  %p7832_p2 = scmp.lt.s32.totalorder %s7826_s0, %s7826_s0 }
 0x27f   :  { %p7833_p3 = por %p7832_p2, %p7831_p1 }
 0x281   :  { %p7834_p4 = pnand %p7833_p3, %p7827_p0 }
 0x296   :  { %v7141_v38 = vpop.f32.mrb[52].mxu0 }
 0x297   :  { %v7142_v39 = vpop.f32.mrb[53].mxu0 }
 0x298   :  { %v7163_v40 = vpop.f32.mrb[52].mxu1  ;;  %v7143_v42 = vadd.f32 %v7142_v39, %v7141_v38  ;;  %v7144_v43 = vpop.f32.mrb[54].mxu0 }
 0x299   :  { %v7164_v44 = vpop.f32.mrb[53].mxu1  ;;  %v7145_v45 = vpop.f32.mrb[55].mxu0 }
 0x29a   :  { %v5672_v46 = vadd.f32 %v7143_v42, %v5632_v37  ;;  %v7165_v47 = vadd.f32 %v7164_v44, %v7163_v40  ;;  %v7166_v48 = vpop.f32.mrb[54].mxu1 }
 0x29b   :  { %v7167_v49 = vpop.f32.mrb[55].mxu1 }
 0x29c   :  { %v5712_v50 = vadd.f32 %v7165_v47, %v5672_v46 }
 0x2b6   :  { %v7185_v51 = vpop.f32.mrb[56].mxu0 }
 0x2b7   :  { %v7186_v52 = vpop.f32.mrb[57].mxu0 }
 0x2b8   :  { %v7207_v53 = vpop.f32.mrb[56].mxu1  ;;  %v7187_v54 = vadd.f32 %v7186_v52, %v7185_v51  ;;  %v7188_v55 = vpop.f32.mrb[58].mxu0 }
 0x2b9   :  { %v7208_v56 = vpop.f32.mrb[57].mxu1  ;;  %v7189_v41 = vpop.f32.mrb[59].mxu0 }
 0x2ba   :  { %v5752_v57 = vadd.f32 %v7187_v54, %v5712_v50  ;;  %v7209_v58 = vadd.f32 %v7208_v56, %v7207_v53  ;;  %v7210_v59 = vpop.f32.mrb[58].mxu1 }
 0x2bb   :  { %v7211_v60 = vpop.f32.mrb[59].mxu1 }
 0x2bc   :  { %v5792_v61 = vadd.f32 %v7209_v58, %v5752_v57 }
 0x2d6   :  { %v7229_v62 = vpop.f32.mrb[60].mxu0 }
 0x2d7   :  { %v7230_v63 = vpop.f32.mrb[61].mxu0 }
 0x2d8   :  { %v7251_v0 = vpop.f32.mrb[60].mxu1  ;;  %v7231_v1 = vadd.f32 %v7230_v63, %v7229_v62  ;;  %v7232_v2 = vpop.f32.mrb[62].mxu0 }
 0x2d9   :  { %v7252_v3 = vpop.f32.mrb[61].mxu1  ;;  %v7233_v4 = vpop.f32.mrb[63].mxu0 }
 0x2da   :  { %v5832_v5 = vadd.f32 %v7231_v1, %v5792_v61  ;;  %v7253_v6 = vadd.f32 %v7252_v3, %v7251_v0  ;;  %v7254_v7 = vpop.f32.mrb[62].mxu1 }
 0x2db   :  { %v7255_v8 = vpop.f32.mrb[63].mxu1 }
 0x2dc   :  { %v5872_v9 = vadd.f32 %v7253_v6, %v5832_v5 }
 0x2de   :  { %v5877_v10 = vsub.f32 0.0, %v5872_v9 }
 0x2e0   :  { %v5878_v11 = vmul.f32 1.442695, %v5877_v10 }
 0x2e2   :  { %7818 = vpow2.f32 %v5878_v11 }
 0x2ec   :  { %v7819_v12 = vpop.eup %7818 }
 0x2ed   :  { %v5880_v13 = vadd.f32 1.0, %v7819_v12 }
 0x2ef   :  { %7820 = vrcp.f32 %v5880_v13 }
 0x2f9   :  { %v7821_v14 = vpop.eup %7820 }
 0x2fa   :  { %v5882_v15 = vpack.c.bf16 %v7821_v14, %v7821_v14 }
 0x2fc   :  { %7283 = vmatmul.mubr.bf16.vlgmr.msra.gmra.mrb[64].mxu0 %v5882_v15 }
 0x3cf   :  { %v5988_v17 = vpop.f32.mrb[64].mxu0 }
 0x3d0   :  { %v5989_v18 = vadd.f32 %v6544_v16, %v5988_v17  ;;  %v7284_v19 = vpop.f32.mrb[65].mxu0 }
 0x3d1   :  { %v5991_v20 = vpop.f32.mrb[66].mxu0 }
 0x3d2   :  { %v5995_v21 = vsel %vm5994_vm1, %v5989_v18, -inf  ;;  %v7285_v22 = vpop.f32.mrb[67].mxu0 }
 0x3d3   :  { %v5996_v23 = vrot.slane %v5995_v21, 4 }
 0x3d5   :  { %v5997_v24 = vmax.f32 %v5995_v21, %v5996_v23 }
 0x3d7   :  { %v5998_v25 = vrot.slane %v5997_v24, 2 }
 0x3d9   :  { %v5999_v26 = vmax.f32 %v5997_v24, %v5998_v25 }
 0x3db   :  { %v6000_v27 = vrot.slane %v5999_v26, 1 }
 0x3dd   :  { %v6001_v28 = vmax.f32 %v5999_v26, %v6000_v27 }
 0x3df   :  { %v6002_v29 = vsub.f32 %v5989_v18, %v6001_v28 }
 0x3e1   :  { %v6003_v30 = vmul.f32 1.442695, %v6002_v29 }
 0x3e3   :  { %7822 = vpow2.f32 %v6003_v30 }
 0x3ed   :  { %v7823_v31 = vpop.eup %7822 }
 0x3ee   :  { %v6005_v32 = vsel %vm5994_vm1, %v7823_v31, 0.0 }
 0x3ef   :  { %v6006_v33 = vrot.slane %v6005_v32, 4 }
 0x3f1   :  { %v6007_v34 = vadd.f32 %v6006_v33, %v6005_v32 }
 0x3f3   :  { %v6008_v35 = vrot.slane %v6007_v34, 2 }
 0x3f5   :  { %v6009_v36 = vadd.f32 %v6008_v35, %v6007_v34 }
 0x3f7   :  { %v6010_v37 = vrot.slane %v6009_v36, 1 }
 0x3f9   :  { %v6011_v38 = vadd.f32 %v6010_v37, %v6009_v36 }
 0x3fb   :  { %7824 = vlog2.f32 %v6011_v38 }
 0x405   :  { %v7825_v39 = vpop.eup %7824 }
 0x406   :  { %v6013_v40 = vmul.f32 0.6931472, %v7825_v39 }
 0x408   :  { %v6014_v42 = vadd.f32 %v6013_v40, %v6001_v28 }
 0x40a   :  { %v6015_v43 = vsub.f32 %v5989_v18, %v6014_v42 }
 0x40c   :  { %6016 = vst [vmem:[#allocation2] sm:$0x3] %v6015_v43 }
 0x40d   :  { %7837 = shalt.err (!%p7834_p4)
}
 0x40e   :  { %s7838_s2 = scalar_lea.hbm %s9607_s5, 32 }
 0x40f   :  { %p7839_p5 = scmp.ne.s32.totalorder %s9607_s5, %s7838_s2  ;;  %p7842_p6 = scmp.lt.u32.totalorder %s7838_s2, %s9607_s5 }
 0x411   :  { %p7844_p7 = pnand %p7842_p6, %p7839_p5 }
 0x413   :  { %7847 = shalt.err (!%p7844_p7)
}
 0x414   :  { %6026 = dma.vmem_to_hbm [thread:$0]  %s6024_s27, 32, %s9607_s5, [#allocation3]  }
 0x415   :  { %7848 = dma.done.wait [#allocation3], 32  }
 0x416   :  { %7849 = vsyncadd [#allocation3], 4294967264 }
 0x417   :  { %6030 = vsyncpa [#allocation3], 1 }

</bundles_post_ra>
